<compile_context>
chip_gen: v7x
topology: tpu7x:2x2x1
jax: 0.10.0
libtpu: 0.0.40
codegen_flags: <defaults>
</compile_context>

<pallas_src>
import numpy as np
import jax
import jax.numpy as jnp
from jax.experimental import pallas as pl
from jax.experimental.pallas import tpu as pltpu

_VMEM_LIMIT = 32 * 1024 * 1024   # fits v7x's 64 MiB / TC; plenty for v5e/v6e


def _nbytes(arrs):
    return int(sum(a.size * a.dtype.itemsize for a in arrs))


# ----------------------------- Pallas kernels ------------------------------

def _regress12_kernel(xs_ref, wc_ref, cb_ref, pmat_ref,
                      w1_ref, b1_ref, w2_ref, b2_ref, out_ref, flat_sc):
    """Fused regress1/regress2 head.

    grid = (head, n).  head is "parallel" (independent heads, one per TC on
    v7x); n tiles the 1024 fc1 outputs and is "arbitrary" (innermost).
    NOTE: out_ref accumulation and flat_sc reuse rely on the grid running
    h-outer / n-inner with the parallel split ONLY on the head axis — do not
    reorder the grid or parallelize n.
    """
    n = pl.program_id(1)
    B = out_ref.shape[1]

    @pl.when(n == 0)
    def _():
        # AvgPool2d(5,3): block-diagonal ones-matrix (B*16, B*196) matmul,
        # scaled by 1/25 afterwards (bf16 x bf16 -> f32 accumulate on MXU).
        pooled = jnp.dot(pmat_ref[...], xs_ref[...],
                         preferred_element_type=jnp.float32) * (1.0 / 25.0)
        # 1x1 Conv2d(C->128) + bias + ReLU  (lane-dense N=128).
        conv = jnp.dot(pooled.astype(jnp.bfloat16), wc_ref[...],
                       preferred_element_type=jnp.float32)           # (B*16,128)
        conv = jnp.maximum(conv + cb_ref[...], 0.0)
        # flatten order (p*128 + o); fc1 weight columns were permuted to
        # match at parameter-prep time.
        flat_sc[...] = conv.reshape(B, 16 * 128).astype(jnp.bfloat16)
        # init output accumulator with the lane-padded fc2 bias.
        out_ref[...] = jnp.broadcast_to(b2_ref[...], out_ref.shape)

    # Linear(2048, 1024) tile + ReLU.   Dropout(0.7) == identity (eval).
    h1 = jnp.dot(flat_sc[...], w1_ref[...],
                 preferred_element_type=jnp.float32) + b1_ref[...]    # (B, TN)
    h1 = jnp.maximum(h1, 0.0).astype(jnp.bfloat16)
    # Linear(1024, 2) padded to 128 lanes — accumulate partial sums over n.
    out_ref[...] += jnp.dot(h1, w2_ref[...],
                            preferred_element_type=jnp.float32)[None]


def _regress3_kernel(x_ref, w1_ref, b1_ref, w2_ref, b2_ref, out_ref, pooled_sc):
    """regress3: AvgPool2d(7,1) -> Linear(1024,2048)+ReLU -> Linear(2048,2).

    grid = (chunk, n): the 2048 fc1 outputs are split into `chunk` parallel
    halves (so v7x's second TensorCore streams half the weights); each chunk
    writes its own (B,128) partial sum which the wrapper adds together.
    """
    c = pl.program_id(0)
    n = pl.program_id(1)

    @pl.when(n == 0)
    def _():
        # global average pool over the 7x7 = 49 spatial positions.
        pooled_sc[...] = jnp.mean(x_ref[...].astype(jnp.float32),
                                  axis=1).astype(jnp.bfloat16)        # (B, 1024)
        bias = jnp.broadcast_to(b2_ref[...], out_ref.shape)
        out_ref[...] = bias * (c == 0).astype(jnp.float32)            # bias once

    h1 = jnp.dot(pooled_sc[...], w1_ref[...],
                 preferred_element_type=jnp.float32) + b1_ref[...]     # (B, TN)
    h1 = jnp.maximum(h1, 0.0).astype(jnp.bfloat16)                     # Dropout == id
    out_ref[...] += jnp.dot(h1, w2_ref[...],
                            preferred_element_type=jnp.float32)[None]


# ------------------------------ Pallas glue --------------------------------

def regression12_fused(feat4a, feat4d, pp, *, tile_n=512):
    """Fused Regression('regress1') + Regression('regress2') forward."""
    B, C1, H, W = feat4a.shape
    _, C2, _, _ = feat4d.shape
    assert (H, W) == (14, 14) and C1 <= 528 and C2 == 528
    S = H * W
    assert pp['pmat'].shape == (B * 16, B * S), "prepare_params batch mismatch"

    # NCHW -> (B*H*W, C) bf16; pad regress1 channels 512->528 and stack the
    # heads so each grid step only streams its own head's activation block.
    x1 = jnp.transpose(feat4a.reshape(B, C1, S), (0, 2, 1))
    x1 = jnp.pad(x1, ((0, 0), (0, 0), (0, 528 - C1)))
    x2 = jnp.transpose(feat4d.reshape(B, C2, S), (0, 2, 1))
    xs = jnp.stack([x1, x2], 0).reshape(2, B * S, 528).astype(jnp.bfloat16)

    assert 1024 % tile_n == 0
    nt = 1024 // tile_n
    args = (xs, pp['wcs'], pp['cbs'], pp['pmat'],
            pp['w1ts'], pp['b1s'], pp['w2ps'], pp['b2ps'])

    flops = 2 * 2 * B * (16 * S * 528 + 16 * 528 * 128 + 2048 * 1024 + 1024 * 128)
    bytes_acc = _nbytes(args) + 2 * B * 128 * 4

    out = pl.pallas_call(
        _regress12_kernel,
        out_shape=jax.ShapeDtypeStruct((2, B, 128), jnp.float32),
        grid_spec=pltpu.PrefetchScalarGridSpec(
            num_scalar_prefetch=0,
            grid=(2, nt),
            in_specs=[
                pl.BlockSpec((pl.Squeezed(), B * S, 528), lambda h, n: (h, 0, 0)),
                pl.BlockSpec((pl.Squeezed(), 528, 128), lambda h, n: (h, 0, 0)),
                pl.BlockSpec((pl.Squeezed(), 1, 128), lambda h, n: (h, 0, 0)),
                pl.BlockSpec(pp['pmat'].shape, lambda h, n: (0, 0)),
                pl.BlockSpec((pl.Squeezed(), 2048, tile_n), lambda h, n: (h, 0, n)),
                pl.BlockSpec((pl.Squeezed(), 1, tile_n), lambda h, n: (h, 0, n)),
                pl.BlockSpec((pl.Squeezed(), tile_n, 128), lambda h, n: (h, n, 0)),
                pl.BlockSpec((pl.Squeezed(), 1, 128), lambda h, n: (h, 0, 0)),
            ],
            out_specs=pl.BlockSpec((1, B, 128), lambda h, n: (h, 0, 0)),
            scratch_shapes=[pltpu.VMEM((B, 2048), jnp.bfloat16)],
        ),
        compiler_params=pltpu.CompilerParams(
            dimension_semantics=("parallel", "arbitrary"),
            vmem_limit_bytes=_VMEM_LIMIT),
        cost_estimate=pl.CostEstimate(flops=flops, transcendentals=0,
                                      bytes_accessed=bytes_acc),
    )(*args)
    return out[:, :, :2]                  # (2, B, 2)


def regression3(feat5b, pp, *, tile_n=1024, n_chunks=2):
    """Regression('regress3') forward, fc1 outputs split across n_chunks."""
    B, C, H, W = feat5b.shape
    assert (C, H, W) == (1024, 7, 7)
    x3 = jnp.transpose(feat5b.reshape(B, C, H * W),
                       (0, 2, 1)).astype(jnp.bfloat16)               # (B, 49, 1024)

    assert 2048 % (n_chunks * tile_n) == 0
    nt = 2048 // (n_chunks * tile_n)
    args = (x3, pp['w1t3'], pp['b1_3'], pp['w2p3'], pp['b2p3'])
    flops = 2 * B * (C * H * W + 1024 * 2048 + 2048 * 128)
    bytes_acc = _nbytes(args) + n_chunks * B * 128 * 4

    out = pl.pallas_call(
        _regress3_kernel,
        out_shape=jax.ShapeDtypeStruct((n_chunks, B, 128), jnp.float32),
        grid_spec=pltpu.PrefetchScalarGridSpec(
            num_scalar_prefetch=0,
            grid=(n_chunks, nt),
            in_specs=[
                pl.BlockSpec(x3.shape, lambda c, n: (0, 0, 0)),
                pl.BlockSpec((1024, tile_n), lambda c, n: (0, c * nt + n)),
                pl.BlockSpec((1, tile_n), lambda c, n: (0, c * nt + n)),
                pl.BlockSpec((tile_n, 128), lambda c, n: (c * nt + n, 0)),
                pl.BlockSpec((1, 128), lambda c, n: (0, 0)),
            ],
            out_specs=pl.BlockSpec((1, B, 128), lambda c, n: (c, 0, 0)),
            scratch_shapes=[pltpu.VMEM((B, 1024), jnp.bfloat16)],
        ),
        compiler_params=pltpu.CompilerParams(
            dimension_semantics=("parallel", "arbitrary"),
            vmem_limit_bytes=_VMEM_LIMIT),
        cost_estimate=pl.CostEstimate(flops=flops, transcendentals=0,
                                      bytes_accessed=bytes_acc),
    )(*args)
    return jnp.sum(out, axis=0)[:, :2]    # (B, 2)


def posenet_forward(feat4a, feat4d, feat5b, prepped, training=True):
    """PoseNet.forward (backbone outputs supplied as inputs)."""
    if training:
        xy12 = regression12_fused(feat4a, feat4d, prepped)
        xy3 = regression3(feat5b, prepped)
        return [xy12[0], xy12[1], xy3]
    else:
        return regression3(feat5b, prepped)


# -------------------- one-time parameter preparation ------------------------

def prepare_params(params, batch):
    """Hoisted, one-time conversion of PyTorch-layout params to kernel layout
    (transposes, fc1 column permutation, fc2 lane-padding, channel padding,
    bf16 cast, pooling matrix)."""
    f32, bf16 = jnp.float32, jnp.bfloat16

    def prep_head12(p):
        C = p['conv_w'].shape[1]
        wct = p['conv_w'].reshape(128, C).T                         # (C, 128)
        wct = jnp.pad(wct, ((0, 528 - C), (0, 0))).astype(bf16)     # (528, 128)
        cb = p['conv_b'].reshape(1, 128).astype(f32)
        # permute fc1 columns: PyTorch flatten (o*16+p) -> kernel (p*128+o)
        w1p = p['fc1_w'].reshape(1024, 128, 16).transpose(0, 2, 1).reshape(1024, 2048)
        w1t = w1p.T.astype(bf16)                                    # (2048, 1024)
        b1 = p['fc1_b'].reshape(1, 1024).astype(f32)
        w2p = jnp.zeros((1024, 128), f32).at[:, :2].set(p['fc2_w'].T).astype(bf16)
        b2p = jnp.zeros((1, 128), f32).at[:, :2].set(p['fc2_b'][None])
        return wct, cb, w1t, b1, w2p, b2p

    r1 = prep_head12(params['regress1'])
    r2 = prep_head12(params['regress2'])
    p3 = params['regress3']

    # AvgPool2d(k=5, s=3) over 14x14 -> 4x4 as a ones matrix (scaled by 1/25
    # in-kernel), block-diagonal over the batch so the pool is one matmul.
    pm = np.zeros((16, 196), np.float32)
    for oh in range(4):
        for ow in range(4):
            for hh in range(oh * 3, oh * 3 + 5):
                for ww in range(ow * 3, ow * 3 + 5):
                    pm[oh * 4 + ow, hh * 14 + ww] = 1.0
    pmat = np.kron(np.eye(batch, dtype=np.float32), pm)             # (B*16, B*196)

    prepped = {
        'wcs':  jnp.stack([r1[0], r2[0]], 0),     # (2, 528, 128)   bf16
        'cbs':  jnp.stack([r1[1], r2[1]], 0),     # (2, 1, 128)     f32
        'pmat': jnp.asarray(pmat, bf16),          # (B*16, B*196)   bf16
        'w1ts': jnp.stack([r1[2], r2[2]], 0),     # (2, 2048, 1024) bf16
        'b1s':  jnp.stack([r1[3], r2[3]], 0),     # (2, 1, 1024)    f32
        'w2ps': jnp.stack([r1[4], r2[4]], 0),     # (2, 1024, 128)  bf16
        'b2ps': jnp.stack([r1[5], r2[5]], 0),     # (2, 1, 128)     f32
        'w1t3': p3['fc1_w'].T.astype(bf16),       # (1024, 2048)    bf16
        'b1_3': p3['fc1_b'].reshape(1, 2048).astype(f32),
        'w2p3': jnp.zeros((2048, 128), f32).at[:, :2].set(p3['fc2_w'].T).astype(bf16),
        'b2p3': jnp.zeros((1, 128), f32).at[:, :2].set(p3['fc2_b'][None]),
    }
    return jax.tree_util.tree_map(jax.block_until_ready, prepped)


# ------------------------- deterministic parameters ------------------------

def init_params(key):
    ks = jax.random.split(key, 16)

    def n(k, shape, scale):
        return jax.random.normal(k, shape, jnp.float32) * scale

    return {
        'regress1': dict(
            conv_w=n(ks[0], (128, 512, 1, 1), 0.05), conv_b=n(ks[1], (128,), 0.05),
            fc1_w=n(ks[2], (1024, 2048), 0.02),      fc1_b=n(ks[3], (1024,), 0.02),
            fc2_w=n(ks[4], (2, 1024), 0.02),         fc2_b=n(ks[5], (2,), 0.02)),
        'regress2': dict(
            conv_w=n(ks[6], (128, 528, 1, 1), 0.05), conv_b=n(ks[7], (128,), 0.05),
            fc1_w=n(ks[8], (1024, 2048), 0.02),      fc1_b=n(ks[9], (1024,), 0.02),
            fc2_w=n(ks[10], (2, 1024), 0.02),        fc2_b=n(ks[11], (2,), 0.02)),
        'regress3': dict(
            fc1_w=n(ks[12], (2048, 1024), 0.02),     fc1_b=n(ks[13], (2048,), 0.02),
            fc2_w=n(ks[14], (2, 2048), 0.02),        fc2_b=n(ks[15], (2,), 0.02)),
    }


# -------------------------- pure-JAX reference -----------------------------

def _ref_regress12(x, p):
    B, C, H, W = x.shape
    pooled = jnp.stack([jnp.stack([
        jnp.mean(x[:, :, oh * 3:oh * 3 + 5, ow * 3:ow * 3 + 5], axis=(2, 3))
        for ow in range(4)], axis=-1) for oh in range(4)], axis=-2)  # (B,C,4,4)
    conv = jnp.einsum('oc,bchw->bohw', p['conv_w'].reshape(128, C), pooled) \
        + p['conv_b'][None, :, None, None]
    conv = jnp.maximum(conv, 0.0)
    flat = conv.reshape(B, -1)                                       # PyTorch view(B,-1)
    h = jnp.maximum(flat @ p['fc1_w'].T + p['fc1_b'], 0.0)
    return h @ p['fc2_w'].T + p['fc2_b']


def _ref_regress3(x, p):
    pooled = jnp.mean(x, axis=(2, 3))
    h = jnp.maximum(pooled @ p['fc1_w'].T + p['fc1_b'], 0.0)
    return h @ p['fc2_w'].T + p['fc2_b']


# --------------------------------- main -------------------------------------

if __name__ == "__main__":
    key = jax.random.PRNGKey(0)
    kp, k4a, k4d, k5b = jax.random.split(key, 4)
    params = init_params(kp)

    B = 2
    prepped = prepare_params(params, batch=B)   # hoisted, one-time weight prep

    # Canonical GoogLeNet/PoseNet backbone feature-map shapes (NCHW):
    feat4a = jax.random.normal(k4a, (B, 512, 14, 14), jnp.float32)   # inception 4a
    feat4d = jax.random.normal(k4d, (B, 528, 14, 14), jnp.float32)   # inception 4d
    feat5b = jax.random.normal(k5b, (B, 1024, 7, 7), jnp.float32)    # inception 5b

    poses = posenet_forward(feat4a, feat4d, feat5b, prepped, training=True)
    poses = jax.block_until_ready(poses)

    refs = [_ref_regress12(feat4a, params['regress1']),
            _ref_regress12(feat4d, params['regress2']),
            _ref_regress3(feat5b, params['regress3'])]
    for got, ref in zip(poses, refs):
        assert got.shape == (B, 2)
        assert jnp.allclose(got, ref, rtol=5e-2, atol=3e-2), (got, ref)

    # eval path (regress3 only)
    eval_pose = jax.block_until_ready(
        posenet_forward(feat4a, feat4d, feat5b, prepped, training=False))
    assert jnp.allclose(eval_pose, refs[2], rtol=5e-2, atol=3e-2)

    print("KERNEL_OK")
</pallas_src>

<mosaic_0001>
module attributes {stable_mosaic.version = 11 : i64} {
  func.func @_regress12_kernel(%arg0: i32, %arg1: i32, %arg2: memref<1x392x528xbf16, #tpu.memory_space<vmem>>, %arg3: memref<1x528x128xbf16, #tpu.memory_space<vmem>>, %arg4: memref<1x1x128xf32, #tpu.memory_space<vmem>>, %arg5: memref<32x392xbf16, #tpu.memory_space<vmem>>, %arg6: memref<1x2048x512xbf16, #tpu.memory_space<vmem>>, %arg7: memref<1x1x512xf32, #tpu.memory_space<vmem>>, %arg8: memref<1x512x128xbf16, #tpu.memory_space<vmem>>, %arg9: memref<1x1x128xf32, #tpu.memory_space<vmem>>, %arg10: memref<1x2x128xf32, #tpu.memory_space<vmem>>, %arg11: memref<2x2048xbf16, #tpu.memory_space<vmem>>) attributes {dimension_semantics = [#tpu.dimension_semantics<parallel>, #tpu.dimension_semantics<arbitrary>], iteration_bounds = array<i64: 2, 2>, scalar_prefetch = 0 : i64, scratch_operands = 1 : i64, tpu.core_type = #tpu.core_type<tc>, window_params = [{transform_indices = @transform_0, window_bounds = array<i64: 1, 392, 528>}, {transform_indices = @transform_1, window_bounds = array<i64: 1, 528, 128>}, {transform_indices = @transform_2, window_bounds = array<i64: 1, 1, 128>}, {pipeline_mode = #tpu.pipeline_mode<synchronous>, transform_indices = @transform_3, window_bounds = array<i64: 32, 392>}, {transform_indices = @transform_4, window_bounds = array<i64: 1, 2048, 512>}, {transform_indices = @transform_5, window_bounds = array<i64: 1, 1, 512>}, {transform_indices = @transform_6, window_bounds = array<i64: 1, 512, 128>}, {transform_indices = @transform_7, window_bounds = array<i64: 1, 1, 128>}, {transform_indices = @transform_8, window_bounds = array<i64: 1, 2, 128>}]} {
    %c0_i32 = arith.constant 0 : i32
    %0 = arith.cmpi eq, %arg1, %c0_i32 : i32
    %1 = arith.extui %0 : i1 to i32
    %c0_i32_0 = arith.constant 0 : i32
    %2 = arith.cmpi ne, %1, %c0_i32_0 : i32
    scf.if %2 {
      %c0_19 = arith.constant 0 : index
      %c0_20 = arith.constant 0 : index
      %21 = vector.load %arg5[%c0_19, %c0_20] : memref<32x392xbf16, #tpu.memory_space<vmem>>, vector<32x392xbf16>
      %c0_21 = arith.constant 0 : index
      %c0_22 = arith.constant 0 : index
      %c0_23 = arith.constant 0 : index
      %22 = vector.load %arg2[%c0_21, %c0_22, %c0_23] : memref<1x392x528xbf16, #tpu.memory_space<vmem>>, vector<1x392x528xbf16>
      %23 = vector.shape_cast %22 : vector<1x392x528xbf16> to vector<392x528xbf16>
      %cst_24 = arith.constant dense<0.000000e+00> : vector<32x528xf32>
      %24 = tpu.matmul %21, %23, %cst_24 {dimension_numbers = #tpu.dot_dimension_numbers<[1], [0], [0], [1], [0, 0, 1, 1], [], []>} : vector<32x392xbf16>, vector<392x528xbf16>, vector<32x528xf32> -> vector<32x528xf32>
      %cst_25 = arith.constant 4.000000e-02 : f32
      %25 = vector.broadcast %cst_25 : f32 to vector<32x528xf32>
      %26 = arith.mulf %24, %25 : vector<32x528xf32>
      %27 = arith.truncf %26 : vector<32x528xf32> to vector<32x528xbf16>
      %c0_26 = arith.constant 0 : index
      %c0_27 = arith.constant 0 : index
      %c0_28 = arith.constant 0 : index
      %28 = vector.load %arg3[%c0_26, %c0_27, %c0_28] : memref<1x528x128xbf16, #tpu.memory_space<vmem>>, vector<1x528x128xbf16>
      %29 = vector.shape_cast %28 : vector<1x528x128xbf16> to vector<528x128xbf16>
      %cst_29 = arith.constant dense<0.000000e+00> : vector<32x128xf32>
      %30 = tpu.matmul %27, %29, %cst_29 {dimension_numbers = #tpu.dot_dimension_numbers<[1], [0], [0], [1], [0, 0, 1, 1], [], []>} : vector<32x528xbf16>, vector<528x128xbf16>, vector<32x128xf32> -> vector<32x128xf32>
      %c0_30 = arith.constant 0 : index
      %c0_31 = arith.constant 0 : index
      %c0_32 = arith.constant 0 : index
      %31 = vector.load %arg4[%c0_30, %c0_31, %c0_32] : memref<1x1x128xf32, #tpu.memory_space<vmem>>, vector<1x1x128xf32>
      %32 = vector.shape_cast %31 : vector<1x1x128xf32> to vector<1x128xf32>
      %33 = vector.broadcast %32 : vector<1x128xf32> to vector<32x128xf32>
      %34 = arith.addf %30, %33 : vector<32x128xf32>
      %cst_33 = arith.constant 0.000000e+00 : f32
      %35 = vector.broadcast %cst_33 : f32 to vector<32x128xf32>
      %36 = arith.maximumf %34, %35 : vector<32x128xf32>
      %37 = vector.shape_cast %36 : vector<32x128xf32> to vector<2x2048xf32>
      %38 = arith.truncf %37 : vector<2x2048xf32> to vector<2x2048xbf16>
      %c0_34 = arith.constant 0 : index
      %c0_35 = arith.constant 0 : index
      %39 = vector.load %arg11[%c0_34, %c0_35] : memref<2x2048xbf16, #tpu.memory_space<vmem>>, vector<2x2048xbf16>
      tpu.vector_store %arg11[%c0_34, %c0_35], %38 {strides = array<i32>} : memref<2x2048xbf16, #tpu.memory_space<vmem>>, vector<2x2048xbf16>,
      %c0_36 = arith.constant 0 : index
      %c0_37 = arith.constant 0 : index
      %c0_38 = arith.constant 0 : index
      %40 = vector.load %arg9[%c0_36, %c0_37, %c0_38] : memref<1x1x128xf32, #tpu.memory_space<vmem>>, vector<1x1x128xf32>
      %41 = vector.shape_cast %40 : vector<1x1x128xf32> to vector<1x128xf32>
      %42 = vector.shape_cast %41 : vector<1x128xf32> to vector<1x1x128xf32>
      %43 = vector.broadcast %42 : vector<1x1x128xf32> to vector<1x2x128xf32>
      %c0_39 = arith.constant 0 : index
      %c0_40 = arith.constant 0 : index
      %c0_41 = arith.constant 0 : index
      %44 = vector.load %arg10[%c0_39, %c0_40, %c0_41] : memref<1x2x128xf32, #tpu.memory_space<vmem>>, vector<1x2x128xf32>
      tpu.vector_store %arg10[%c0_39, %c0_40, %c0_41], %43 {strides = array<i32>} : memref<1x2x128xf32, #tpu.memory_space<vmem>>, vector<1x2x128xf32>,
    } else {
    }
    %c0 = arith.constant 0 : index
    %c0_1 = arith.constant 0 : index
    %3 = vector.load %arg11[%c0, %c0_1] : memref<2x2048xbf16, #tpu.memory_space<vmem>>, vector<2x2048xbf16>
    %c0_2 = arith.constant 0 : index
    %c0_3 = arith.constant 0 : index
    %c0_4 = arith.constant 0 : index
    %4 = vector.load %arg6[%c0_2, %c0_3, %c0_4] : memref<1x2048x512xbf16, #tpu.memory_space<vmem>>, vector<1x2048x512xbf16>
    %5 = vector.shape_cast %4 : vector<1x2048x512xbf16> to vector<2048x512xbf16>
    %cst = arith.constant dense<0.000000e+00> : vector<2x512xf32>
    %6 = tpu.matmul %3, %5, %cst {dimension_numbers = #tpu.dot_dimension_numbers<[1], [0], [0], [1], [0, 0, 1, 1], [], []>} : vector<2x2048xbf16>, vector<2048x512xbf16>, vector<2x512xf32> -> vector<2x512xf32>
    %c0_5 = arith.constant 0 : index
    %c0_6 = arith.constant 0 : index
    %c0_7 = arith.constant 0 : index
    %7 = vector.load %arg7[%c0_5, %c0_6, %c0_7] : memref<1x1x512xf32, #tpu.memory_space<vmem>>, vector<1x1x512xf32>
    %8 = vector.shape_cast %7 : vector<1x1x512xf32> to vector<1x512xf32>
    %9 = vector.broadcast %8 : vector<1x512xf32> to vector<2x512xf32>
    %10 = arith.addf %6, %9 : vector<2x512xf32>
    %cst_8 = arith.constant 0.000000e+00 : f32
    %11 = vector.broadcast %cst_8 : f32 to vector<2x512xf32>
    %12 = arith.maximumf %10, %11 : vector<2x512xf32>
    %13 = arith.truncf %12 : vector<2x512xf32> to vector<2x512xbf16>
    %c0_9 = arith.constant 0 : index
    %c0_10 = arith.constant 0 : index
    %c0_11 = arith.constant 0 : index
    %14 = vector.load %arg10[%c0_9, %c0_10, %c0_11] : memref<1x2x128xf32, #tpu.memory_space<vmem>>, vector<1x2x128xf32>
    %c0_12 = arith.constant 0 : index
    %c0_13 = arith.constant 0 : index
    %c0_14 = arith.constant 0 : index
    %15 = vector.load %arg8[%c0_12, %c0_13, %c0_14] : memref<1x512x128xbf16, #tpu.memory_space<vmem>>, vector<1x512x128xbf16>
    %16 = vector.shape_cast %15 : vector<1x512x128xbf16> to vector<512x128xbf16>
    %cst_15 = arith.constant dense<0.000000e+00> : vector<2x128xf32>
    %17 = tpu.matmul %13, %16, %cst_15 {dimension_numbers = #tpu.dot_dimension_numbers<[1], [0], [0], [1], [0, 0, 1, 1], [], []>} : vector<2x512xbf16>, vector<512x128xbf16>, vector<2x128xf32> -> vector<2x128xf32>
    %18 = vector.shape_cast %17 : vector<2x128xf32> to vector<1x2x128xf32>
    %19 = arith.addf %14, %18 : vector<1x2x128xf32>
    %c0_16 = arith.constant 0 : index
    %c0_17 = arith.constant 0 : index
    %c0_18 = arith.constant 0 : index
    %20 = vector.load %arg10[%c0_16, %c0_17, %c0_18] : memref<1x2x128xf32, #tpu.memory_space<vmem>>, vector<1x2x128xf32>
    tpu.vector_store %arg10[%c0_16, %c0_17, %c0_18], %19 {strides = array<i32>} : memref<1x2x128xf32, #tpu.memory_space<vmem>>, vector<1x2x128xf32>,
    return
  }
  func.func @transform_0(%arg0: i32, %arg1: i32) -> (i32, i32, i32) {
    %c0_i32 = arith.constant 0 : i32
    %c0_i32_0 = arith.constant 0 : i32
    %c0_i32_1 = arith.constant 0 : i32
    return %arg0, %c0_i32, %c0_i32_0 : i32, i32, i32
  }
  func.func @transform_1(%arg0: i32, %arg1: i32) -> (i32, i32, i32) {
    %c0_i32 = arith.constant 0 : i32
    %c0_i32_0 = arith.constant 0 : i32
    %c0_i32_1 = arith.constant 0 : i32
    return %arg0, %c0_i32, %c0_i32_0 : i32, i32, i32
  }
  func.func @transform_2(%arg0: i32, %arg1: i32) -> (i32, i32, i32) {
    %c0_i32 = arith.constant 0 : i32
    %c0_i32_0 = arith.constant 0 : i32
    %c0_i32_1 = arith.constant 0 : i32
    return %arg0, %c0_i32, %c0_i32_0 : i32, i32, i32
  }
  func.func @transform_3(%arg0: i32, %arg1: i32) -> (i32, i32) {
    %c0_i32 = arith.constant 0 : i32
    %c0_i32_0 = arith.constant 0 : i32
    %c0_i32_1 = arith.constant 0 : i32
    return %c0_i32, %c0_i32_0 : i32, i32
  }
  func.func @transform_4(%arg0: i32, %arg1: i32) -> (i32, i32, i32) {
    %c0_i32 = arith.constant 0 : i32
    %c0_i32_0 = arith.constant 0 : i32
    return %arg0, %c0_i32, %arg1 : i32, i32, i32
  }
  func.func @transform_5(%arg0: i32, %arg1: i32) -> (i32, i32, i32) {
    %c0_i32 = arith.constant 0 : i32
    %c0_i32_0 = arith.constant 0 : i32
    return %arg0, %c0_i32, %arg1 : i32, i32, i32
  }
  func.func @transform_6(%arg0: i32, %arg1: i32) -> (i32, i32, i32) {
    %c0_i32 = arith.constant 0 : i32
    %c0_i32_0 = arith.constant 0 : i32
    return %arg0, %arg1, %c0_i32 : i32, i32, i32
  }
  func.func @transform_7(%arg0: i32, %arg1: i32) -> (i32, i32, i32) {
    %c0_i32 = arith.constant 0 : i32
    %c0_i32_0 = arith.constant 0 : i32
    %c0_i32_1 = arith.constant 0 : i32
    return %arg0, %c0_i32, %c0_i32_0 : i32, i32, i32
  }
  func.func @transform_8(%arg0: i32, %arg1: i32) -> (i32, i32, i32) {
    %c0_i32 = arith.constant 0 : i32
    %c0_i32_0 = arith.constant 0 : i32
    %c0_i32_1 = arith.constant 0 : i32
    return %arg0, %c0_i32, %c0_i32_0 : i32, i32, i32
  }
}

</mosaic_0001>

<bundles_post_ra>
// kernel: tpu_custom_call.1
= control target key start
LH: loop header
LB: loop body
LE: loop exit
PB: predicated region body
PF: predicated region fallthrough
CT: control target
= control target key end

     0   :  { %s10895_s0 = inlined_call_operand.hbm [shape: bf16[2,392,528], index: 0, kind: input, shape index: {}]   ;;  %s10896_s1 = inlined_call_operand.hbm [shape: bf16[2,528,128], index: 1, kind: input, shape index: {}]   ;;  %s10897_s2 = inlined_call_operand.hbm [shape: f32[2,1,128], index: 2, kind: input, shape index: {}]   ;;  %s10898_s3 = inlined_call_operand.hbm [shape: bf16[32,392], index: 3, kind: input, shape index: {}]   ;;  %s10899_s4 = inlined_call_operand.hbm [shape: bf16[2,2048,1024], index: 4, kind: input, shape index: {}]   ;;  %s10900_s5 = inlined_call_operand.hbm [shape: f32[2,1,1024], index: 5, kind: input, shape index: {}]   ;;  %s10901_s6 = inlined_call_operand.hbm [shape: bf16[2,1024,128], index: 6, kind: input, shape index: {}]   ;;  %s10902_s7 = inlined_call_operand.hbm [shape: f32[2,1,128], index: 7, kind: input, shape index: {}]   ;;  %s10903_s8 = inlined_call_operand.hbm [shape: f32[2,2,128], index: 8, kind: output, shape index: {}]  }
   0x1   :  { %10940 = sst [smem:[#allocation38_spill]] %s10895_s0 }
   0x2   :  { %10941 = sst [smem:[#allocation39_spill]] %s10896_s1 }
   0x3   :  { %10942 = sst [smem:[#allocation40_spill]] %s10897_s2 }
   0x4   :  { %10943 = sst [smem:[#allocation41_spill]] %s10898_s3 }
   0x5   :  { %10944 = sst [smem:[#allocation42_spill]] %s10899_s4 }
   0x6   :  { %10945 = sst [smem:[#allocation43_spill]] %s10900_s5 }
   0x7   :  { %10946 = sst [smem:[#allocation44_spill]] %s10901_s6 }
   0x8   :  { %10947 = sst [smem:[#allocation45_spill]] %s10902_s7 }
   0x9   :  { %10948 = sst [smem:[#allocation46_spill]] %s10903_s8 }
   0xa   :  { %13 = vsyncpa [#allocation4], 0 }
   0xb   :  { %15 = vsyncpa [#allocation4 + $0x1], 0 }
   0xc   :  { %16 = vsyncpa [#allocation7], 0 }
   0xd   :  { %18 = vsyncpa [#allocation7 + $0x1], 0 }
   0xe   :  { %19 = vsyncpa [#allocation10], 0 }
   0xf   :  { %20 = vsyncpa [#allocation5], 0 }
  0x10   :  { %22 = vsyncpa [#allocation5 + $0x1], 0  ;;  %s9516_s27 = smov 0   ;;  %s9518_s28 = smov 0  }
  0x11   :  { %s9520_s29 = smov 0   ;;  %s9522_s30 = smov 0  }
  0x12   :  { %s9524_s9 = smov 0   ;;  %s9526_s10 = smov 0  }
  0x13   :  { %s9528_s11 = smov 0   ;;  %s9530_s12 = smov 0  }
  0x14   :  { %s9532_s13 = smov 0   ;;  %s9534_s14 = smov 0  }
  0x15   :  { %s9536_s15 = smov 0  }
  0x16 LB: > { %10949 = sst [smem:[#allocation24_spill]] %s9414_s28  ;;  %p10906_p0 = scmp.ne.s32.totalorder %s9430_s10, %s9426_s9  ;;  %s9450_s15 = sphi %s9536_s15, %s28_s15   ;;  %s9446_s14 = sphi %s9534_s14, %s11025_s14   ;;  %s9442_s13 = sphi %s9532_s13, %s11019_s13   ;;  %s9438_s12 = sphi %s9530_s12, %s11024_s12   ;;  %s9434_s11 = sphi %s9528_s11, %s11023_s11   ;;  %s9430_s10 = sphi %s9526_s10, %s11017_s10   ;;  %s9426_s9 = sphi %s9524_s9, %s11022_s9   ;;  %s9422_s30 = sphi %s9522_s30, %s11021_s30   ;;  %s9418_s29 = sphi %s9520_s29, %s11015_s29   ;;  %s9414_s28 = sphi %s9518_s28, %s11014_s28   ;;  %s9410_s27 = sphi %s9516_s27, %s11013_s27  }
  0x17   : > { %10950 = sst [smem:[#allocation25_spill]] %s9418_s29  ;;  %p55_p1 = scmp.eq.s32.totalorder %s9450_s15, 0 }
  0x18   : > { %10951 = sst [smem:[#allocation26_spill]] %s9430_s10  ;;  %p155_p2 = scmp.ne.s32.totalorder %s9418_s29, %s9414_s28 }
  0x19   : > { %10952 = sst [smem:[#allocation27_spill]] %s9434_s11  ;;  %p7944_p3 = scmp.lt.s32.totalorder %s9450_s15, 4 }
  0x1a   : > { %10953 = sst [smem:[#allocation28_spill]] %s9438_s12  ;;  %p56_p4 = por %p55_p1, %p10906_p0 }
  0x1b   : > { %10954 = sst [smem:[#allocation29_spill]] %s9442_s13  ;;  %p157_p5 = por %p155_p2, %p55_p1 }
  0x1c   : > { %s10905_s17 = sand.u32 1, %s9450_s15   ;;  %s9583_s18 = sand.u32 1, %s9430_s10  }
  0x1d   : > { %10955 = sst [smem:[#allocation30_spill]] %s9583_s18  ;;  %p9585_p6 = pnand %p7944_p3, %p56_p4 }
  0x1e   : > { %s7889_s20 = smul.u32 264, %s9583_s18  ;;  %s10958_s1 = sld [smem:[#allocation39_spill]] }
  0x1f   : > { %s10956_s19 = scalar_select %p9585_p6, 1, 0 }
  0x20   : > { %s7890_s21 = smul.u32 4224, %s9446_s14  ;;  %s331_s25 = scalar_lea.vmem [#allocation6], %s7889_s20 }
  0x21   : > { %10957 = sst [smem:[#allocation31_spill]] %s10956_s19  ;;  %s338_s26 = sshll.u32 %s331_s25, 4  ;;  %s9596_s26 = int_to_ptr.vmem [resolvable:$true] %s338_s26 }
  0x22   : > { %p9598_p7 = pnand %p7944_p3, %p157_p5  ;;  %s9604_s8 = scalar_lea.sflag [#allocation7], %s10905_s17 }
  0x23   : > { %p9610_p9 = pneg %p9585_p6 }
  0x24   : > { %s9594_s24 = scalar_lea.hbm %s10958_s1, %s7890_s21  ;;  %s9071_s23 = scalar_lea.hbm %s10958_s1, 8448 }
  0x25   : > { %s10959_s16 = scalar_select %p9598_p7, 1, 0 }
  0x26   : > { %s9066_s12 = scalar_lea.hbm %s9594_s24, 4224  ;;  %p9072_p12 = scmp.lt.u32.totalorder %s9594_s24, %s10958_s1 }
  0x27   : > { %p9067_p8 = scmp.ne.s32.totalorder %s9594_s24, %s9066_s12  ;;  %p9073_p13 = scmp.lt.u32.totalorder %s9071_s23, %s9066_s12 }
  0x28   : > { %s10960_s21 = scalar_select %p9610_p9, 1, 0 }
  0x29   : > { %p9069_p10 = pnand %p9610_p9, %p9067_p8  ;;  %p9074_p1 = por %p9073_p13, %p9072_p12 }
  0x2a   : > { %10961 = sst [smem:[#allocation32_spill]] %s10960_s21  ;;  %p9075_p2 = scmp.lt.u32.totalorder %s9066_s12, %s9594_s24 }
  0x2b   : > { %p9070_p11 = pneg %p9069_p10 }
  0x2c   : > { %p9076_p3 = por %p9075_p2, %p9074_p1 }
  0x2e   : > { %p9077_p4 = pnand %p9076_p3, %p9070_p11 }
  0x30   : > { %9080 = shalt.err (!%p9077_p4)
}
  0x31   : > { %s9081_s17 = scalar_lea.vmem %s9596_s26, 4224  ;;  %s9452_s20 = smov [#allocation6]  }
  0x32   : > { %p9082_p5 = scmp.ne.s32.totalorder %s9596_s26, %s9081_s17  ;;  %s9086_s22 = sshll.u32 %s9452_s20, 4  ;;  %s9087_s22 = int_to_ptr.vmem [resolvable:$false] %s9086_s22 }
  0x33   : > { %s9088_s11 = scalar_lea.vmem %s9087_s22, 8448  ;;  %p9089_p0 = scmp.lt.s32.totalorder %s9596_s26, %s9087_s22 }
  0x34   : > { %p9084_p8 = pnand %p9082_p5, %p9610_p9  ;;  %p9090_p7 = scmp.lt.s32.totalorder %s9088_s11, %s9081_s17 }
  0x36   : > { %p9085_p10 = pneg %p9084_p8  ;;  %p9091_p12 = por %p9090_p7, %p9089_p0 }
  0x38   : > { %p9092_p13 = pnand %p9091_p12, %p9085_p10 }
  0x3a   : > { %9095 = shalt.err (!%p9092_p13)
}
  0x3b   : > { %s10912_s12 = smov 64   ;;  %s10916_s23 = smov 4  }
  0x3c   : > { %7923 = dma.hbm_to_vmem [thread:$0]  (!%p9585_p6), %s9594_s24, 4224, %s9596_s26, %s9604_s8, %s10912_s12, %s10912_s12, %s10916_s23  }
  0x3d   : > { %s7887_s17 = smul.u32 980, %s9583_s18  ;;  %s10962_s0 = sld [smem:[#allocation38_spill]] }
  0x3e   : > { %s7888_s25 = smul.u32 15680, %s9446_s14  ;;  %s10915_s3 = sshll.u32 %s9446_s14, 4 }
  0x3f   : > { %s310_s1 = scalar_lea.vmem [#allocation3], %s7887_s17  ;;  %s10963_s6 = sand.u32 1, %s9450_s15  }
  0x40   : > { %s317_s7 = sshll.u32 %s310_s1, 4  ;;  %s9649_s28 = scalar_lea.sflag [#allocation4], %s10963_s6  ;;  %s9644_s7 = int_to_ptr.vmem [resolvable:$true] %s317_s7 }
  0x43   : > { %s9642_s11 = scalar_lea.hbm %s10962_s0, %s7888_s25  ;;  %s9101_s20 = scalar_lea.hbm %s10962_s0, 31360 }
  0x44   : > { %s9096_s24 = scalar_lea.hbm %s9642_s11, 15680  ;;  %p9102_p1 = scmp.lt.u32.totalorder %s9642_s11, %s10962_s0 }
  0x45   : > { %p9097_p0 = scmp.ne.s32.totalorder %s9642_s11, %s9096_s24  ;;  %p9103_p2 = scmp.lt.u32.totalorder %s9101_s20, %s9096_s24 }
  0x46   : > { %p9105_p4 = scmp.lt.u32.totalorder %s9096_s24, %s9642_s11 }
  0x47   : > { %p9099_p7 = pnand %p9097_p0, %p9610_p9  ;;  %p9104_p3 = por %p9103_p2, %p9102_p1 }
  0x49   : > { %p9100_p11 = pneg %p9099_p7  ;;  %p9106_p5 = por %p9105_p4, %p9104_p3 }
  0x4b   : > { %p9107_p8 = pnand %p9106_p5, %p9100_p11 }
  0x4d   : > { %9110 = shalt.err (!%p9107_p8)
}
  0x4e   : > { %s9111_s1 = scalar_lea.vmem %s9644_s7, 15680  ;;  %s9455_s6 = smov [#allocation3]  }
  0x4f   : > { %p9112_p10 = scmp.ne.s32.totalorder %s9644_s7, %s9111_s1  ;;  %s9116_s17 = sshll.u32 %s9455_s6, 4  ;;  %s9117_s17 = int_to_ptr.vmem [resolvable:$false] %s9116_s17 }
  0x50   : > { %s9118_s12 = scalar_lea.vmem %s9117_s17, 31360  ;;  %p9119_p0 = scmp.lt.s32.totalorder %s9644_s7, %s9117_s17 }
  0x51   : > { %p9114_p12 = pnand %p9112_p10, %p9610_p9  ;;  %p9120_p7 = scmp.lt.s32.totalorder %s9118_s12, %s9111_s1 }
  0x53   : > { %p9115_p13 = pneg %p9114_p12  ;;  %p9121_p1 = por %p9120_p7, %p9119_p0 }
  0x55   : > { %p9122_p2 = pnand %p9121_p1, %p9115_p13 }
  0x57   : > { %9125 = shalt.err (!%p9122_p2)
}
  0x58   : > { %s9456_s24 = smov 320   ;;  %s9457_s26 = smov 20  }
  0x59   : > { %7920 = dma.hbm_to_vmem [thread:$0]  (!%p9585_p6), %s9642_s11, 15680, %s9644_s7, %s9649_s28, %s9456_s24, %s9456_s24, %s9457_s26  }
  0x5a   : > { %s10964_s2 = sld [smem:[#allocation40_spill]]  ;;  %s351_s1 = scalar_lea.vmem [#allocation8], %s9583_s18 }
  0x5b   : > { %s358_s6 = sshll.u32 %s351_s1, 4  ;;  %s359_s6 = int_to_ptr.vmem [resolvable:$true] %s358_s6 }
  0x60   : > { %s9678_s22 = scalar_lea.hbm %s10964_s2, %s10915_s3  ;;  %s9131_s11 = scalar_lea.hbm %s10964_s2, 32 }
  0x61   : > { %s9126_s17 = scalar_lea.hbm %s9678_s22, 16  ;;  %p9132_p5 = scmp.lt.u32.totalorder %s9678_s22, %s10964_s2 }
  0x62   : > { %p9127_p11 = scmp.ne.s32.totalorder %s9678_s22, %s9126_s17  ;;  %p9133_p8 = scmp.lt.u32.totalorder %s9131_s11, %s9126_s17 }
  0x63   : > { %p9135_p12 = scmp.lt.u32.totalorder %s9126_s17, %s9678_s22 }
  0x64   : > { %p9129_p3 = pnand %p9127_p11, %p9610_p9  ;;  %p9134_p10 = por %p9133_p8, %p9132_p5 }
  0x66   : > { %p9130_p4 = pneg %p9129_p3  ;;  %p9136_p13 = por %p9135_p12, %p9134_p10 }
  0x68   : > { %p9137_p0 = pnand %p9136_p13, %p9130_p4 }
  0x6a   : > { %9140 = shalt.err (!%p9137_p0)
}
  0x6b   : > { %s9141_s25 = scalar_lea.vmem %s359_s6, 16  ;;  %s9458_s20 = smov [#allocation8]  }
  0x6c   : > { %p9142_p7 = scmp.ne.s32.totalorder %s359_s6, %s9141_s25  ;;  %s9146_s1 = sshll.u32 %s9458_s20, 4  ;;  %s9147_s1 = int_to_ptr.vmem [resolvable:$false] %s9146_s1 }
  0x6d   : > { %s9148_s12 = scalar_lea.vmem %s9147_s1, 32  ;;  %p9149_p11 = scmp.lt.s32.totalorder %s359_s6, %s9147_s1 }
  0x6e   : > { %p9144_p1 = pnand %p9142_p7, %p9610_p9  ;;  %p9150_p3 = scmp.lt.s32.totalorder %s9148_s12, %s9141_s25 }
  0x70   : > { %p9145_p2 = pneg %p9144_p1  ;;  %p9151_p6 = por %p9150_p3, %p9149_p11 }
  0x72   : > { %p9152_p5 = pnand %p9151_p6, %p9145_p2 }
  0x74   : > { %9155 = shalt.err (!%p9152_p5)
}
  0x75   : > { %p10965_p8 = scmp.ne.s32.totalorder %s10956_s19, 0  ;;  %s40_s17 = sadd.s32 1, %s9446_s14 }
  0x76   : > { %s37_s7 = sadd.s32 1, %s9442_s13  ;;  %s148_s11 = sadd.s32 1, %s9418_s29 }
  0x77   : > { %7926 = dma.hbm_to_vmem [thread:$0]  (!%p10965_p8), %s9678_s22, 16, %s359_s6, %s9604_s8  }
  0x78   : > { %p38_p6 = scmp.ge.s32.totalorder %s37_s7, 2  ;;  %s9703_s24 = sand.u32 1, %s9418_s29  }
  0x79   : > { %s6920_s25 = sshll.u32 %s9703_s24, 12  ;;  %s6921_s20 = sshll.u32 %s9442_s13, 2 }
  0x7a   : > { %s11027_s7 = smov (%p38_p6, %s37_s7), 0  ;;  %s11029_s17 = smov (!%p38_p6, %s40_s17), %s9446_s14 }
  0x7b   : > { %10966 = sst [smem:[#allocation33_spill]] %s11027_s7  ;;  %s144_s26 = ssub.s32 %s9442_s13, %s11027_s7 }
  0x7c   : > { %p42_p4 = scmp.ge.s32.totalorder %s11029_s17, 2  ;;  %s6922_s22 = sshll.u32 %s9446_s14, 11 }
  0x7d   : > { %s375_s6 = sadd.s32 %s6922_s22, %s6921_s20  ;;  %s369_s1 = scalar_lea.vmem [#allocation11], %s6920_s25 }
  0x7e   : > { %s11031_s17 = smov (%p42_p4, %s11029_s17), 0  ;;  %s378_s12 = sshll.u32 %s369_s1, 4  ;;  %s9732_s12 = int_to_ptr.vmem [resolvable:$true] %s378_s12 }
  0x7f   : > { %10967 = sst [smem:[#allocation34_spill]] %s11031_s17  ;;  %s44_s3 = ssub.s32 %s9446_s14, %s11031_s17 }
  0x80   : > { %s6923_s23 = sshll.u32 %s375_s6, 6  ;;  %p45_p10 = scmp.eq.s32.totalorder %s44_s3, 0 }
  0x81   : > { %s145_s0 = sor.u32 %s144_s26, %s44_s3  ;;  %s10968_s4 = sld [smem:[#allocation42_spill]] }
  0x82   : > { %p146_p12 = scmp.eq.s32.totalorder %s145_s0, 0  ;;  %s10969_s21 = sadd.s32 1, %s9430_s10 }
  0x83   : > { %s9727_s18 = scalar_select %p45_p10, %s9430_s10, %s10969_s21  }
  0x84   : > { %s9730_s22 = scalar_select %p146_p12, %s9418_s29, %s148_s11  }
  0x85   : > { %10970 = sst [smem:[#allocation35_spill]] %s9727_s18  ;;  %p10972_p0 = scmp.ne.s32.totalorder %s10959_s16, 0 }
  0x86   : > { %10971 = sst [smem:[#allocation36_spill]] %s9730_s22 }
  0x87   : > { %s9722_s19 = scalar_lea.hbm %s10968_s4, %s6923_s23  ;;  %p9738_p7 = pneg %p10972_p0 }
  0x88   : > { %s9156_s25 = scalar_lea.hbm %s9722_s19, 65536  ;;  %s9161_s21 = scalar_lea.hbm %s10968_s4, 262144 }
  0x89   : > { %p9157_p13 = scmp.ne.s32.totalorder %s9722_s19, %s9156_s25  ;;  %p9162_p11 = scmp.lt.u32.totalorder %s9722_s19, %s10968_s4 }
  0x8a   : > { %s10973_s0 = scalar_select %p9738_p7, 1, 0 }
  0x8b   : > { %p9159_p1 = pnand %p9738_p7, %p9157_p13  ;;  %p9163_p3 = scmp.lt.u32.totalorder %s9161_s21, %s9156_s25 }
  0x8c   : > { %p9165_p6 = scmp.lt.u32.totalorder %s9156_s25, %s9722_s19 }
  0x8d   : > { %p9160_p2 = pneg %p9159_p1  ;;  %p9164_p5 = por %p9163_p3, %p9162_p11 }
  0x8f   : > { %p9166_p4 = por %p9165_p6, %p9164_p5 }
  0x91   : > { %p9167_p10 = pnand %p9166_p4, %p9160_p2 }
  0x93   : > { %9170 = shalt.err (!%p9167_p10)
}
  0x94   : > { %s9171_s11 = scalar_lea.vmem %s9732_s12, 65536  ;;  %s9459_s26 = smov [#allocation11]  }
  0x95   : > { %p9172_p12 = scmp.ne.s32.totalorder %s9732_s12, %s9171_s11  ;;  %s9176_s6 = sshll.u32 %s9459_s26, 4  ;;  %s9177_s6 = int_to_ptr.vmem [resolvable:$false] %s9176_s6 }
  0x96   : > { %s9178_s1 = scalar_lea.vmem %s9177_s6, 131072  ;;  %p9179_p8 = scmp.lt.s32.totalorder %s9732_s12, %s9177_s6 }
  0x97   : > { %p9174_p13 = pnand %p9172_p12, %p9738_p7  ;;  %p9180_p9 = scmp.lt.s32.totalorder %s9178_s1, %s9171_s11 }
  0x99   : > { %p9175_p1 = pneg %p9174_p13  ;;  %p9181_p11 = por %p9180_p9, %p9179_p8 }
  0x9b   : > { %p9182_p3 = pnand %p9181_p11, %p9175_p1 }
  0x9d   : > { %9185 = shalt.err (!%p9182_p3)
}
  0x9e   : > { %s9460_s25 = smov 512   ;;  %s10928_s2 = smov 256  }
  0x9f   : > { %s10929_s3 = smov 16   ;;  %s6924_s21 = sshll.u32 %s9703_s24, 2 }
  0xa0   : > { %7929 = dma.hbm_to_vmem [thread:$0]  (!%p10972_p0), %s9722_s19, 65536, %s9732_s12, %s9649_s28, %s9460_s25, %s10928_s2, %s10929_s3  }
  0xa1   : > { %s6926_s23 = sshll.u32 %s9446_s14, 3  ;;  %s392_s26 = scalar_lea.vmem [#allocation12], %s6924_s21 }
  0xa2   : > { %s398_s7 = sadd.s32 %s6926_s23, %s6921_s20  ;;  %s402_s6 = sshll.u32 %s392_s26, 4  ;;  %s403_s6 = int_to_ptr.vmem [resolvable:$true] %s402_s6 }
  0xa3   : > { %s6927_s11 = sshll.u32 %s398_s7, 4  ;;  %s10974_s5 = sld [smem:[#allocation43_spill]] }
  0xa9   : > { %s400_s17 = scalar_lea.hbm %s10974_s5, %s6927_s11  ;;  %s9191_s19 = scalar_lea.hbm %s10974_s5, 256 }
  0xaa   : > { %s9186_s18 = scalar_lea.hbm %s400_s17, 64  ;;  %p9192_p5 = scmp.lt.u32.totalorder %s400_s17, %s10974_s5 }
  0xab   : > { %p9187_p9 = scmp.ne.s32.totalorder %s400_s17, %s9186_s18  ;;  %p9193_p6 = scmp.lt.u32.totalorder %s9191_s19, %s9186_s18 }
  0xac   : > { %p9195_p10 = scmp.lt.u32.totalorder %s9186_s18, %s400_s17 }
  0xad   : > { %p9189_p8 = pnand %p9187_p9, %p9738_p7  ;;  %p9194_p4 = por %p9193_p6, %p9192_p5 }
  0xaf   : > { %p9190_p2 = pneg %p9189_p8  ;;  %p9196_p12 = por %p9195_p10, %p9194_p4 }
  0xb1   : > { %p9197_p13 = pnand %p9196_p12, %p9190_p2 }
  0xb3   : > { %9200 = shalt.err (!%p9197_p13)
}
  0xb4   : > { %s9201_s4 = scalar_lea.vmem %s403_s6, 64  ;;  %s9463_s20 = smov [#allocation12]  }
  0xb5   : > { %p9202_p1 = scmp.ne.s32.totalorder %s403_s6, %s9201_s4  ;;  %s9206_s21 = sshll.u32 %s9463_s20, 4  ;;  %s9207_s21 = int_to_ptr.vmem [resolvable:$false] %s9206_s21 }
  0xb6   : > { %s9208_s29 = scalar_lea.vmem %s9207_s21, 128  ;;  %p9209_p9 = scmp.lt.s32.totalorder %s403_s6, %s9207_s21 }
  0xb7   : > { %p9204_p11 = pnand %p9202_p1, %p9738_p7  ;;  %p9210_p8 = scmp.lt.s32.totalorder %s9208_s29, %s9201_s4 }
  0xb9   : > { %p9205_p3 = pneg %p9204_p11  ;;  %p9211_p0 = por %p9210_p8, %p9209_p9 }
  0xbb   : > { %p9212_p5 = pnand %p9211_p0, %p9205_p3 }
  0xbd   : > { %9215 = shalt.err (!%p9212_p5)
}
  0xbe   : > { %p10975_p6 = scmp.ne.s32.totalorder %s10959_s16, 0  ;;  %s10976_s18 = sld [smem:[#allocation24_spill]] }
  0xbf   : > { %s9785_s22 = sadd.s32 4294967295, %s9450_s15   ;;  %s6913_s23 = sadd.s32 4294967294, %s9450_s15  }
  0xc0   : > { %7932 = dma.hbm_to_vmem [thread:$0]  (!%p10975_p6), %s400_s17, 64, %s403_s6, %s9604_s8  }
  0xc1   : > { %p60_p0 = scmp.ne.s32.totalorder %s9426_s9, %s9422_s30  ;;  %p10934_p2 = scmp.eq.s32.totalorder %s9785_s22, 0 }
  0xc2   : > { %p267_p10 = scmp.eq.s32.totalorder %s9785_s22, 3  ;;  %p273_p13 = scmp.eq.s32.totalorder %s6913_s23, 3 }
  0xc3   : > { %p9796_p12 = por %p10934_p2, %p60_p0  ;;  %p10980_p11 = scmp.ne.s32.totalorder %s9430_s10, %s9426_s9 }
  0xc4   : > { %p161_p4 = scmp.ne.s32.totalorder %s10976_s18, %s9410_s27  ;;  %p9813_p9 = por %p273_p13, %p60_p0 }
  0xc5   : > { %s10977_s7 = scalar_select %p9796_p12, 1, 0 }
  0xc6   : > { %p9802_p1 = por %p161_p4, %p10934_p2  ;;  %p9809_p3 = por %p267_p10, %p10980_p11 }
  0xc7   : > { %s10982_s27 = scalar_select %p9813_p9, 1, 0 }
  0xc8   : > { %s10978_s17 = scalar_select %p9802_p1, 1, 0 }
  0xc9   : > { %s10981_s11 = scalar_select %p9809_p3, 1, 0 }
  0xca   : > { %10979 = sst [smem:[#allocation37_spill]] %s10978_s17  ;;  %p6914_p8 = scmp.ge.s32.totalorder %s9450_s15, 1 }
  0xcb   : > { %p280_p5 = scmp.lt.s32.totalorder %s9450_s15, 5  ;;  %s6928_s26 = sshll.u32 %s9703_s24, 8 }
  0xcc   : > { %s9464_s1 = smov [#allocation9]   ;;  %s6929_s12 = sshll.u32 %s9442_s13, 6 }
  0xcd   : > { %p9820_p12 = pnand %p6914_p8, %p280_p5  ;;  %s292_s19 = sshll.u32 %s9464_s1, 4  ;;  %s9824_s19 = int_to_ptr.vmem [resolvable:$true] %s292_s19 }
  0xce   : > { %s6930_s25 = sshll.u32 %s9446_s14, 7  ;;  %s413_s4 = scalar_lea.vmem [#allocation13], %s6928_s26 }
  0xcf   : > { %s10983_s6 = scalar_select %p9820_p12, 1, 0 }
  0xd0   : > { %p7913_p4 = pneg %p9820_p12  ;;  %s422_s20 = sshll.u32 %s413_s4, 4  ;;  %s9836_s20 = int_to_ptr.vmem [resolvable:$true] %s422_s20 }
  0xd1   : > { %s419_s24 = sadd.s32 %s6930_s25, %s6929_s12  ;;  %s10985_s1 = sld [smem:[#allocation44_spill]] }
  0xd2   : > { %p9832_p0 = pnand %p7913_p4, %p10934_p2  ;;  %s6931_s29 = sshll.u32 %s419_s24, 6 }
  0xd3   : > { %s10986_s13 = sld [smem:[#allocation41_spill]] }
  0xd4   : > { %p9218_p13 = pneg %p9832_p0 }
  0xd7   : > { %s9841_s2 = scalar_lea.hbm %s10985_s1, %s6931_s29 }
  0xd9   : > { %s10987_s17 = smov %s10986_s13  ;;  %s9216_s26 = scalar_lea.hbm %s10986_s13, 1024 }
  0xda   : > { %p9217_p10 = scmp.ne.s32.totalorder %s10987_s17, %s9216_s26  ;;  %p9223_p5 = scmp.lt.u32.totalorder %s9216_s26, %s10987_s17 }
  0xdc   : > { %p9219_p11 = pnand %p9218_p13, %p9217_p10 }
  0xde   : > { %p9220_p8 = pneg %p9219_p11 }
  0xe0   : > { %p9225_p4 = pnand %p9223_p5, %p9220_p8 }
  0xe2   : > { %9228 = shalt.err (!%p9225_p4)
}
  0xe3   : > { %s9229_s24 = scalar_lea.vmem %s9824_s19, 1024  ;;  %p9237_p1 = scmp.lt.s32.totalorder %s9824_s19, %s9824_s19 }
  0xe4   : > { %p9230_p2 = scmp.ne.s32.totalorder %s9824_s19, %s9229_s24  ;;  %p9238_p12 = scmp.lt.s32.totalorder %s9229_s24, %s9229_s24 }
  0xe6   : > { %p9232_p9 = pnand %p9230_p2, %p9218_p13  ;;  %p9239_p6 = por %p9238_p12, %p9237_p1 }
  0xe8   : > { %p9233_p3 = pneg %p9232_p9 }
  0xea   : > { %p9240_p7 = pnand %p9239_p6, %p9233_p3 }
  0xec   : > { %9243 = shalt.err (!%p9240_p7)
}
  0xed   : > { %s10988_s5 = smov 16   ;;  %s10989_s10 = smov 256  }
  0xee   : > { %7916 = dma.hbm_to_vmem [thread:$0]  (!%p9832_p0), %s10987_s17, 1024, %s9824_s19, [#allocation10], %s10989_s10, %s10989_s10, %s10988_s5  }
  0xef   : > { %s9244_s29 = scalar_lea.hbm %s9841_s2, 4096  ;;  %p10990_p12 = scmp.ne.s32.totalorder %s10973_s0, 0 }
  0xf0   : > { %p9245_p2 = scmp.ne.s32.totalorder %s9841_s2, %s9244_s29  ;;  %s9249_s23 = scalar_lea.hbm %s10985_s1, 16384 }
  0xf1   : > { %p9250_p1 = scmp.lt.u32.totalorder %s9841_s2, %s10985_s1  ;;  %p9251_p3 = scmp.lt.u32.totalorder %s9249_s23, %s9244_s29 }
  0xf2   : > { %p9247_p6 = pnand %p9245_p2, %p10990_p12  ;;  %p9253_p10 = scmp.lt.u32.totalorder %s9244_s29, %s9841_s2 }
  0xf3   : > { %p9252_p9 = por %p9251_p3, %p9250_p1 }
  0xf4   : > { %p9248_p7 = pneg %p9247_p6 }
  0xf5   : > { %p9254_p13 = por %p9253_p10, %p9252_p9 }
  0xf7   : > { %p9255_p11 = pnand %p9254_p13, %p9248_p7 }
  0xf9   : > { %9258 = shalt.err (!%p9255_p11)
}
  0xfa   : > { %s9259_s19 = scalar_lea.vmem %s9836_s20, 4096  ;;  %s9465_s12 = smov [#allocation13]  }
  0xfb   : > { %p9260_p0 = scmp.ne.s32.totalorder %s9836_s20, %s9259_s19  ;;  %s9264_s25 = sshll.u32 %s9465_s12, 4  ;;  %s9265_s25 = int_to_ptr.vmem [resolvable:$false] %s9264_s25 }
  0xfc   : > { %s9266_s24 = scalar_lea.vmem %s9265_s25, 8192  ;;  %p9267_p4 = scmp.lt.s32.totalorder %s9836_s20, %s9265_s25 }
  0xfd   : > { %p9262_p8 = pnand %p9260_p0, %p10990_p12  ;;  %p9268_p2 = scmp.lt.s32.totalorder %s9266_s24, %s9259_s19 }
  0xff   : > { %p9263_p5 = pneg %p9262_p8  ;;  %p9269_p6 = por %p9268_p2, %p9267_p4 }
 0x101   : > { %p9270_p1 = pnand %p9269_p6, %p9263_p5 }
 0x103   : > { %9273 = shalt.err (!%p9270_p1)
}
 0x104   : > { %p10991_p7 = scmp.ne.s32.totalorder %s10959_s16, 0  ;;  %s10992_s5 = smov 4  }
 0x105   : > { %s10993_s10 = smov 64   ;;  %s10994_s0 = sld [smem:[#allocation30_spill]] }
 0x106   : > { %s10995_s13 = sld [smem:[#allocation32_spill]]  ;;  %s10996_s3 = sshll.u32 %s9446_s14, 4 }
 0x107   : > { %7935 = dma.hbm_to_vmem [thread:$0]  (!%p10991_p7), %s9841_s2, 4096, %s9836_s20, %s9649_s28, %s10993_s10, %s10993_s10, %s10992_s5  }
 0x108   : > { %s10997_s21 = sld [smem:[#allocation45_spill]] }
 0x10b   : > { %s435_s16 = scalar_lea.vmem [#allocation14], %s10994_s0 }
 0x10c   : > { %s442_s26 = sshll.u32 %s435_s16, 4  ;;  %p10998_p3 = scmp.ne.s32.totalorder %s10995_s13, 0  ;;  %s443_s26 = int_to_ptr.vmem [resolvable:$true] %s442_s26 }
 0x10e   : > { %s9897_s23 = scalar_lea.hbm %s10997_s21, %s10996_s3  ;;  %s9279_s2 = scalar_lea.hbm %s10997_s21, 32 }
 0x10f   : > { %s9274_s4 = scalar_lea.hbm %s9897_s23, 16  ;;  %p9280_p13 = scmp.lt.u32.totalorder %s9897_s23, %s10997_s21 }
 0x110   : > { %p9275_p12 = scmp.ne.s32.totalorder %s9897_s23, %s9274_s4  ;;  %p9281_p11 = scmp.lt.u32.totalorder %s9279_s2, %s9274_s4 }
 0x111   : > { %p9283_p8 = scmp.lt.u32.totalorder %s9274_s4, %s9897_s23 }
 0x112   : > { %p9277_p9 = pnand %p9275_p12, %p10998_p3  ;;  %p9282_p0 = por %p9281_p11, %p9280_p13 }
 0x114   : > { %p9278_p10 = pneg %p9277_p9  ;;  %p9284_p5 = por %p9283_p8, %p9282_p0 }
 0x116   : > { %p9285_p4 = pnand %p9284_p5, %p9278_p10 }
 0x118   : > { %9288 = shalt.err (!%p9285_p4)
}
 0x119   : > { %s9289_s25 = scalar_lea.vmem %s443_s26, 16  ;;  %s9466_s24 = smov [#allocation14]  }
 0x11a   : > { %p9290_p2 = scmp.ne.s32.totalorder %s443_s26, %s9289_s25  ;;  %s9294_s5 = sshll.u32 %s9466_s24, 4  ;;  %s9295_s5 = int_to_ptr.vmem [resolvable:$false] %s9294_s5 }
 0x11b   : > { %s9296_s10 = scalar_lea.vmem %s9295_s5, 32  ;;  %p9297_p7 = scmp.lt.s32.totalorder %s443_s26, %s9295_s5 }
 0x11c   : > { %p9292_p6 = pnand %p9290_p2, %p10998_p3  ;;  %p9298_p12 = scmp.lt.s32.totalorder %s9296_s10, %s9289_s25 }
 0x11e   : > { %p9293_p1 = pneg %p9292_p6  ;;  %p9299_p9 = por %p9298_p12, %p9297_p7 }
 0x120   : > { %p9300_p11 = pnand %p9299_p9, %p9293_p1 }
 0x122   : > { %9303 = shalt.err (!%p9300_p11)
}
 0x123   : > { %s10999_s0 = sld [smem:[#allocation31_spill]]  ;;  %p11001_p10 = scmp.ne.s32.totalorder %s10983_s6, 0 }
 0x124   : > { %s453_s13 = sand.u32 (!%p11001_p10), 1, %s9785_s22   ;;  %s9922_s3 = sand.u32 (!%p11001_p10), 1, %s9426_s9  }
 0x125   : > { %451 = sbr.rel (%p11001_p10) target bundleno = 1905 (0x771), region = 52  ;;  %s454_s18 = scalar_lea.sflag (!%p11001_p10), [#allocation4], %s453_s13 }
 0x126   : > { %s7891_s29 = smul.u32 (!%p11001_p10), 980, %s9922_s3  ;;  %p11002_p3 = scmp.ne.s32.totalorder (!%p11001_p10), %s10977_s7, 0 }
 0x128   : > { %s9925_s16 = scalar_lea.vmem (!%p11001_p10), [#allocation3], %s7891_s29 }
 0x129   : > { %p11000_p13 = scmp.ne.s32.totalorder %s10999_s0, 0 }
 0x12b   : > { %7938 = dma.hbm_to_vmem [thread:$0]  (!%p11000_p13), %s9897_s23, 16, %s443_s26, %s9604_s8  }
 0x12c   : > { %9377 = dma.done.wait (%p11002_p3), %s454_s18, 15680  }
 0x12d   : > { %9379 = vsyncadd (%p11002_p3), %s454_s18, 4294951616  ;;  %s7892_s8 = smul.u32 264, %s9922_s3  ;;  %s463_s6 = scalar_lea.sflag [#allocation7], %s453_s13 }
 0x12f   : > { %s9932_s23 = scalar_lea.vmem [#allocation6], %s7892_s8 }
 0x130   : > { %9381 = dma.done.wait (%p11002_p3), %s463_s6, 4240  }
 0x131   : > { %9383 = vsyncadd (%p11002_p3), %s463_s6, 4294963056  ;;  %s474_s26 = scalar_lea.vmem [#allocation8], %s9922_s3  ;;  %p11003_p0 = scmp.eq.s32.totalorder %s9785_s22, 0 }
 0x133   : > { %9385 = dma.done.wait (%p11003_p0), [#allocation10], 1024   ;;  %p11004_p8 = pmov %p11003_p0 }
 0x134   : > { %s11005_s4 = sld [smem:[#allocation24_spill]]  ;;  %s11006_s19 = sld [smem:[#allocation37_spill]] }
 0x135   : > { %9387 = vsyncadd (%p11004_p8), [#allocation10], 4294966272 }
 0x13a   : > { %s485_s28 = sand.u32 1, %s11005_s4   ;;  %p11007_p5 = scmp.ne.s32.totalorder %s11006_s19, 0 }
 0x13b   : > { %s6935_s2 = sshll.u32 %s485_s28, 12 }
 0x13c   : > { %s9944_s20 = scalar_lea.vmem [#allocation11], %s6935_s2 }
 0x13d   : > { %9389 = dma.done.wait (%p11007_p5), %s454_s18, 65536  }
 0x13e   : > { %9391 = vsyncadd (%p11007_p5), %s454_s18, 4294901760  ;;  %s6936_s12 = sshll.u32 %s485_s28, 2 }
 0x13f   : > { %s9950_s25 = scalar_lea.vmem [#allocation12], %s6936_s12 }
 0x140   : > { %9393 = dma.done.wait (%p11007_p5), %s463_s6, 64  }
 0x141   : > { %9395 = vsyncadd (%p11007_p5), %s463_s6, 4294967232  ;;  %s6937_s22 = sshll.u32 %s485_s28, 8 }
 0x142   : > { %s9956_s24 = scalar_lea.vmem [#allocation13], %s6937_s22 }
 0x143   : > { %9397 = dma.done.wait (%p11007_p5), %s454_s18, 4096  }
 0x144   : > { %9399 = vsyncadd (%p11007_p5), %s454_s18, 4294963200  ;;  %s513_s5 = scalar_lea.vmem [#allocation14], %s9922_s3 }
 0x145   : > { %9401 = dma.done.wait (%p11002_p3), %s463_s6, 16  }
 0x146   : > { %9403 = vsyncadd (%p11002_p3), %s463_s6, 4294967280  ;;  %s6938_s10 = sshll.u32 %s9922_s3, 1  ;;  %s11008_s13 = sld [smem:[#allocation27_spill]] }
 0x147   : > { %s9968_s0 = scalar_lea.vmem [#allocation15], %s6938_s10 }
 0x14c   : > { %p6939_p4 = scmp.ne.s32.totalorder %s11008_s13, 0 }
 0x14d   : > { %v8046_v0 = vld [vmem:[%s9925_s16 + $0x4] ss:$20 sps:$4 sm:$0xff] (!%p6939_p4)   ;;  %v8048_v1 = vld [vmem:[%s9925_s16 + $0xc] ss:$20 sps:$4 sm:$0xff] (!%p6939_p4)   ;;  %v8051_v3 = vld [vmem:[%s9925_s16 + $0x8] ss:$20 sps:$4 sm:$0xff] (!%p6939_p4)  }
 0x14e   : > { %581 = sbr.rel (%p6939_p4) target bundleno = 939 (0x3ab), region = 88  ;;  %1435 = vmatprep.subr.bf16.mxu0 (!%p6939_p4), %v8046_v0  ;;  %v8050_v2 = vld [vmem:[%s9925_s16] ss:$20 sps:$4 sm:$0xff] (!%p6939_p4)   ;;  %1541 = vmatprep.subr.bf16.mxu1 (!%p6939_p4), %v8048_v1  ;;  %v8056_v6 = vld [vmem:[%s9925_s16 + $0x28] ss:$20 sps:$4 sm:$0xff] (!%p6939_p4)   ;;  %vm1412_vm0 = vcmask (!%p6939_p4), 64512  }
 0x14f   : > { %v8052_v4 = vld [vmem:[%s9925_s16 + $0x2c] ss:$20 sps:$4 sm:$0xff] (!%p6939_p4)   ;;  %1436 = vmatpush1.bf16.msra.mxu0 (!%p6939_p4), %v8050_v2  ;;  %1542 = vmatpush1.bf16.msra.mxu1 (!%p6939_p4), %v8051_v3  ;;  %v8054_v5 = vld [vmem:[%s9925_s16 + $0x34] ss:$20 sps:$4 sm:$0xff] (!%p6939_p4)   ;;  %v8057_v7 = vld [vmem:[%s9925_s16 + $0x30] ss:$20 sps:$4 sm:$0xff] (!%p6939_p4)  }
 0x150   : > { %1437 = vmatprep.subr.bf16.mxu0 (!%p6939_p4), %v8052_v4  ;;  %1543 = vmatprep.subr.bf16.mxu1 (!%p6939_p4), %v8054_v5  ;;  %v8058_v8 = vld [vmem:[%s9925_s16 + $0x54] ss:$20 sps:$4 sm:$0xff] (!%p6939_p4)   ;;  %v8060_v9 = vld [vmem:[%s9925_s16 + $0x5c] ss:$20 sps:$4 sm:$0xff] (!%p6939_p4)   ;;  %v8063_v11 = vld [vmem:[%s9925_s16 + $0x58] ss:$20 sps:$4 sm:$0xff] (!%p6939_p4)  }
 0x151   : > { %v8062_v10 = vld [vmem:[%s9925_s16 + $0x50] ss:$20 sps:$4 sm:$0xff] (!%p6939_p4)   ;;  %v8068_v14 = vld [vmem:[%s9925_s16 + $0x78] ss:$20 sps:$4 sm:$0xff] (!%p6939_p4)   ;;  %v8069_v15 = vld [vmem:[%s9925_s16 + $0x80] ss:$20 sps:$4 sm:$0xff] (!%p6939_p4)  }
 0x152   : > { %v8064_v12 = vld [vmem:[%s9925_s16 + $0x7c] ss:$20 sps:$4 sm:$0xff] (!%p6939_p4)   ;;  %v8066_v13 = vld [vmem:[%s9925_s16 + $0x84] ss:$20 sps:$4 sm:$0xff] (!%p6939_p4)   ;;  %v8072_v17 = vld [vmem:[%s9925_s16 + $0xac] ss:$20 sps:$4 sm:$0xff] (!%p6939_p4)  }
 0x153   : > { %1438 = vmatpush1.bf16.msra.mxu0 (!%p6939_p4), %v8056_v6  ;;  %1544 = vmatpush1.bf16.msra.mxu1 (!%p6939_p4), %v8057_v7  ;;  %v8070_v16 = vld [vmem:[%s9925_s16 + $0xa4] ss:$20 sps:$4 sm:$0xff] (!%p6939_p4)   ;;  %v8074_v18 = vld [vmem:[%s9925_s16 + $0xa0] ss:$20 sps:$4 sm:$0xff] (!%p6939_p4)   ;;  %v8075_v19 = vld [vmem:[%s9925_s16 + $0xa8] ss:$20 sps:$4 sm:$0xff] (!%p6939_p4)  }
 0x154   : > { %1439 = vmatprep.subr.bf16.mxu0 (!%p6939_p4), %v8058_v8  ;;  %1545 = vmatprep.subr.bf16.mxu1 (!%p6939_p4), %v8060_v9  ;;  %v8076_v20 = vld [vmem:[%s9925_s16 + $0xcc] ss:$20 sps:$4 sm:$0xff] (!%p6939_p4)   ;;  %v8078_v21 = vld [vmem:[%s9925_s16 + $0xd4] ss:$20 sps:$4 sm:$0xff] (!%p6939_p4)   ;;  %v8081_v23 = vld [vmem:[%s9925_s16 + $0xd0] ss:$20 sps:$4 sm:$0xff] (!%p6939_p4)  }
 0x155   : > { %v8080_v22 = vld [vmem:[%s9925_s16 + $0xc8] ss:$20 sps:$4 sm:$0xff]   ;;  %v8086_v26 = vld [vmem:[%s9925_s16 + $0xf0] ss:$20 sps:$4 sm:$0xff]   ;;  %v8087_v27 = vld [vmem:[%s9925_s16 + $0xf8] ss:$20 sps:$4 sm:$0xff]  }
 0x156   : > { %v8082_v24 = vld [vmem:[%s9925_s16 + $0xf4] ss:$20 sps:$4 sm:$0xff]   ;;  %v8084_v25 = vld [vmem:[%s9925_s16 + $0xfc] ss:$20 sps:$4 sm:$0xff]   ;;  %v8090_v29 = vld [vmem:[%s9925_s16 + $0x124] ss:$20 sps:$4 sm:$0xff]  }
 0x157   : > { %1440 = vmatpush1.bf16.msra.mxu0 %v8062_v10  ;;  %1546 = vmatpush1.bf16.msra.mxu1 %v8063_v11  ;;  %v8088_v28 = vld [vmem:[%s9925_s16 + $0x11c] ss:$20 sps:$4 sm:$0xff]   ;;  %v8092_v30 = vld [vmem:[%s9925_s16 + $0x118] ss:$20 sps:$4 sm:$0xff]   ;;  %v8093_v31 = vld [vmem:[%s9925_s16 + $0x120] ss:$20 sps:$4 sm:$0xff]  }
 0x158   : > { %1441 = vmatprep.subr.bf16.mxu0 %v8064_v12  ;;  %1547 = vmatprep.subr.bf16.mxu1 %v8066_v13  ;;  %v8094_v32 = vld [vmem:[%s9925_s16 + $0x144] ss:$20 sps:$4 sm:$0xff]   ;;  %v8096_v33 = vld [vmem:[%s9925_s16 + $0x14c] ss:$20 sps:$4 sm:$0xff]   ;;  %v8099_v35 = vld [vmem:[%s9925_s16 + $0x148] ss:$20 sps:$4 sm:$0xff]  }
 0x159   : > { %v8098_v34 = vld [vmem:[%s9925_s16 + $0x140] ss:$20 sps:$4 sm:$0xff]   ;;  %v8104_v38 = vld [vmem:[%s9925_s16 + $0x168] ss:$20 sps:$4 sm:$0xff]   ;;  %v8105_v39 = vld [vmem:[%s9925_s16 + $0x170] ss:$20 sps:$4 sm:$0xff]  }
 0x15a   : > { %v8100_v36 = vld [vmem:[%s9925_s16 + $0x16c] ss:$20 sps:$4 sm:$0xff]   ;;  %v8102_v37 = vld [vmem:[%s9925_s16 + $0x174] ss:$20 sps:$4 sm:$0xff]   ;;  %v8108_v41 = vld [vmem:[%s9925_s16 + $0x19c] ss:$20 sps:$4 sm:$0xff]  }
 0x15b   : > { %1442 = vmatpush1.bf16.msra.mxu0 %v8068_v14  ;;  %1548 = vmatpush1.bf16.msra.mxu1 %v8069_v15  ;;  %v8106_v40 = vld [vmem:[%s9925_s16 + $0x194] ss:$20 sps:$4 sm:$0xff]   ;;  %v8110_v42 = vld [vmem:[%s9925_s16 + $0x190] ss:$20 sps:$4 sm:$0xff]   ;;  %v8111_v43 = vld [vmem:[%s9925_s16 + $0x198] ss:$20 sps:$4 sm:$0xff]  }
 0x15c   : > { %1443 = vmatprep.subr.bf16.mxu0 %v8070_v16  ;;  %1549 = vmatprep.subr.bf16.mxu1 %v8072_v17  ;;  %v8112_v44 = vld [vmem:[%s9925_s16 + $0x1bc] ss:$20 sps:$4 sm:$0xff]   ;;  %v8114_v45 = vld [vmem:[%s9925_s16 + $0x1c4] ss:$20 sps:$4 sm:$0xff]   ;;  %v8117_v48 = vld [vmem:[%s9925_s16 + $0x1c0] ss:$20 sps:$4 sm:$0xff]  }
 0x15d   : > { %v8116_v46 = vld [vmem:[%s9925_s16 + $0x1b8] ss:$20 sps:$4 sm:$0xff]   ;;  %v8122_v51 = vld [vmem:[%s9925_s16 + $0x1e0] ss:$20 sps:$4 sm:$0xff]   ;;  %v8123_v52 = vld [vmem:[%s9925_s16 + $0x1e8] ss:$20 sps:$4 sm:$0xff]  }
 0x15e   : > { %v10018_v47 = vld [vmem:[#allocation9 + $0x4] ss:$16 sps:$4 sm:$0xff]   ;;  %v10043_v5 = vld [vmem:[#allocation9] ss:$16 sps:$4 sm:$0xff]   ;;  %vm1419_vm1 = vcmask 1043456   ;;  %vm2046_vm2 = vcmask 130048  }
 0x15f   : > { %1444 = vmatpush1.bf16.msra.mxu0 %v8074_v18  ;;  %1550 = vmatpush1.bf16.msra.mxu1 %v8075_v19  ;;  %v8118_v49 = vld [vmem:[%s9925_s16 + $0x1e4] ss:$20 sps:$4 sm:$0xff]   ;;  %v8120_v50 = vld [vmem:[%s9925_s16 + $0x1ec] ss:$20 sps:$4 sm:$0xff]   ;;  %v8126_v54 = vld [vmem:[%s9925_s16 + $0x214] ss:$20 sps:$4 sm:$0xff]  }
 0x160   : > { %1445 = vmatprep.subr.bf16.mxu0 %v8076_v20  ;;  %1551 = vmatprep.subr.bf16.mxu1 %v8078_v21  ;;  %v8124_v53 = vld [vmem:[%s9925_s16 + $0x20c] ss:$20 sps:$4 sm:$0xff]   ;;  %v8128_v55 = vld [vmem:[%s9925_s16 + $0x208] ss:$20 sps:$4 sm:$0xff]   ;;  %v8129_v56 = vld [vmem:[%s9925_s16 + $0x210] ss:$20 sps:$4 sm:$0xff]  }
 0x161   : > { %1467 = vmatprep.mubr.bf16.mxu0 %v10018_v47  ;;  %1573 = vmatprep.mubr.bf16.mxu1 %v10018_v47  ;;  %v8130_v57 = vld [vmem:[%s9925_s16 + $0x234] ss:$20 sps:$4 sm:$0xff]   ;;  %v8132_v58 = vld [vmem:[%s9925_s16 + $0x23c] ss:$20 sps:$4 sm:$0xff]   ;;  %v8135_v60 = vld [vmem:[%s9925_s16 + $0x238] ss:$20 sps:$4 sm:$0xff]  }
 0x162   : > { %v8134_v59 = vld [vmem:[%s9925_s16 + $0x230] ss:$20 sps:$4 sm:$0xff]   ;;  %v8140_v63 = vld [vmem:[%s9925_s16 + $0x258] ss:$20 sps:$4 sm:$0xff]   ;;  %v8141_v0 = vld [vmem:[%s9925_s16 + $0x260] ss:$20 sps:$4 sm:$0xff]  }
 0x163   : > { %1446 = vmatpush1.bf16.msra.mxu0 %v8080_v22  ;;  %1552 = vmatpush1.bf16.msra.mxu1 %v8081_v23  ;;  %v8136_v61 = vld [vmem:[%s9925_s16 + $0x25c] ss:$20 sps:$4 sm:$0xff]   ;;  %v8138_v62 = vld [vmem:[%s9925_s16 + $0x264] ss:$20 sps:$4 sm:$0xff]   ;;  %v8149_v2 = vld [vmem:[%s9925_s16 + $0x28c] ss:$20 sps:$4 sm:$0xff]  }
 0x164   : > { %1447 = vmatprep.subr.bf16.mxu0 %v8082_v24  ;;  %1553 = vmatprep.subr.bf16.mxu1 %v8084_v25  ;;  %v8146_v1 = vld [vmem:[%s9925_s16 + $0x284] ss:$20 sps:$4 sm:$0xff]   ;;  %v8144_v3 = vld [vmem:[%s9925_s16 + $0x280] ss:$20 sps:$4 sm:$0xff]   ;;  %v8147_v4 = vld [vmem:[%s9925_s16 + $0x288] ss:$20 sps:$4 sm:$0xff]  }
 0x165   : > { %v8153_v6 = vld [vmem:[%s9925_s16 + $0x2ac] ss:$20 sps:$4 sm:$0xff]   ;;  %v8156_v7 = vld [vmem:[%s9925_s16 + $0x2b4] ss:$20 sps:$4 sm:$0xff]   ;;  %v8154_v10 = vld [vmem:[%s9925_s16 + $0x2b0] ss:$20 sps:$4 sm:$0xff]  }
 0x166   : > { %v10047_v8 = vld [vmem:[#allocation9 + $0x24] ss:$16 sps:$4 sm:$0xff]   ;;  %v10059_v15 = vld [vmem:[#allocation9 + $0x20] ss:$16 sps:$4 sm:$0xff]   ;;  %v10063_v18 = vld [vmem:[#allocation9 + $0xc] ss:$16 sps:$4 sm:$0xff]  }
 0x167   : > { %1448 = vmatpush1.bf16.msra.mxu0 %v8086_v26  ;;  %1554 = vmatpush1.bf16.msra.mxu1 %v8087_v27  ;;  %v8151_v9 = vld [vmem:[%s9925_s16 + $0x2a8] ss:$20 sps:$4 sm:$0xff]   ;;  %v8157_v13 = vld [vmem:[%s9925_s16 + $0x2d0] ss:$20 sps:$4 sm:$0xff]   ;;  %v8160_v14 = vld [vmem:[%s9925_s16 + $0x2d8] ss:$20 sps:$4 sm:$0xff]  }
 0x168   : > { %1449 = vmatprep.subr.bf16.mxu0 %v8088_v28  ;;  %1555 = vmatprep.subr.bf16.mxu1 %v8090_v29  ;;  %v8159_v11 = vld [vmem:[%s9925_s16 + $0x2d4] ss:$20 sps:$4 sm:$0xff]   ;;  %v8162_v12 = vld [vmem:[%s9925_s16 + $0x2dc] ss:$20 sps:$4 sm:$0xff]   ;;  %v8168_v17 = vld [vmem:[%s9925_s16 + $0x304] ss:$20 sps:$4 sm:$0xff]  }
 0x169   : > { %v8165_v16 = vld [vmem:[%s9925_s16 + $0x2fc] ss:$20 sps:$4 sm:$0xff]   ;;  %v8163_v19 = vld [vmem:[%s9925_s16 + $0x2f8] ss:$20 sps:$4 sm:$0xff]   ;;  %v8166_v20 = vld [vmem:[%s9925_s16 + $0x300] ss:$20 sps:$4 sm:$0xff]  }
 0x16a   : > { %v8171_v21 = vld [vmem:[%s9925_s16 + $0x324] ss:$20 sps:$4 sm:$0xff]   ;;  %v8174_v22 = vld [vmem:[%s9925_s16 + $0x32c] ss:$20 sps:$4 sm:$0xff]   ;;  %v8172_v24 = vld [vmem:[%s9925_s16 + $0x328] ss:$20 sps:$4 sm:$0xff]  }
 0x16b   : > { %1450 = vmatpush1.bf16.msra.mxu0 %v8092_v30  ;;  %1556 = vmatpush1.bf16.msra.mxu1 %v8093_v31  ;;  %v8169_v23 = vld [vmem:[%s9925_s16 + $0x320] ss:$20 sps:$4 sm:$0xff]   ;;  %v8175_v27 = vld [vmem:[%s9925_s16 + $0x348] ss:$20 sps:$4 sm:$0xff]   ;;  %v8178_v28 = vld [vmem:[%s9925_s16 + $0x350] ss:$20 sps:$4 sm:$0xff]  }
 0x16c   : > { %1451 = vmatprep.subr.bf16.mxu0 %v8094_v32  ;;  %1557 = vmatprep.subr.bf16.mxu1 %v8096_v33  ;;  %v8177_v25 = vld [vmem:[%s9925_s16 + $0x34c] ss:$20 sps:$4 sm:$0xff]   ;;  %v8180_v26 = vld [vmem:[%s9925_s16 + $0x354] ss:$20 sps:$4 sm:$0xff]   ;;  %v8186_v30 = vld [vmem:[%s9925_s16 + $0x37c] ss:$20 sps:$4 sm:$0xff]  }
 0x16d   : > { %v8183_v29 = vld [vmem:[%s9925_s16 + $0x374] ss:$20 sps:$4 sm:$0xff]   ;;  %v8181_v31 = vld [vmem:[%s9925_s16 + $0x370] ss:$20 sps:$4 sm:$0xff]   ;;  %v8184_v32 = vld [vmem:[%s9925_s16 + $0x378] ss:$20 sps:$4 sm:$0xff]  }
 0x16e   : > { %v8192_v33 = vld [vmem:[%s9925_s16 + $0x39c] ss:$20 sps:$4 sm:$0xff]  }
 0x16f   : > { %1452 = vmatpush1.bf16.msra.mxu0 %v8098_v34  ;;  %1558 = vmatpush1.bf16.msra.mxu1 %v8099_v35  ;;  %v8195_v34 = vld [vmem:[%s9925_s16 + $0x3a4] ss:$20 sps:$4 sm:$0xff]  }
 0x170   : > { %1453 = vmatprep.subr.bf16.mxu0 %v8100_v36  ;;  %1559 = vmatprep.subr.bf16.mxu1 %v8102_v37  ;;  %v734_v35 = vld [vmem:[%s9925_s16 + $0x3c0] sm:$0xff]  ;;  %v735_v36 = vld [vmem:[%s9925_s16 + $0x3c8] sm:$0xff] }
 0x171   : > { %v8190_v37 = vld [vmem:[%s9925_s16 + $0x398] ss:$20 sps:$4 sm:$0xff]  }
 0x173   : > { %1454 = vmatpush1.bf16.msra.mxu0 %v8104_v38  ;;  %1560 = vmatpush1.bf16.msra.mxu1 %v8105_v39  ;;  %v8193_v38 = vld [vmem:[%s9925_s16 + $0x3a0] ss:$20 sps:$4 sm:$0xff]   ;;  %v7069_v39 = vcombine.high %v734_v35, %v734_v35 }
 0x174   : > { %1455 = vmatprep.subr.bf16.mxu0 %v8106_v40  ;;  %1561 = vmatprep.subr.bf16.mxu1 %v8108_v41  ;;  %v7071_v40 = vcombine.high %v735_v36, %v735_v36  ;;  %v7068_v41 = vcombine.low %v734_v35, %v734_v35  ;;  %v8255_v35 = vld [vmem:[%s9932_s23 + $0x70] sm:$0xff]  }
 0x177   : > { %1456 = vmatpush1.bf16.msra.mxu0 %v8110_v42  ;;  %1562 = vmatpush1.bf16.msra.mxu1 %v8111_v43  ;;  %v7070_v42 = vcombine.low %v735_v36, %v735_v36  ;;  %v8203_v43 = vld [vmem:[%s9925_s16 + $0x150] ss:$20 sps:$4 sm:$0xff]  }
 0x178   : > { %1457 = vmatprep.subr.bf16.mxu0 %v8112_v44  ;;  %1563 = vmatprep.subr.bf16.mxu1 %v8114_v45  ;;  %v1421_v44 = vsel %vm1419_vm1, %v7068_v41, 0  ;;  %v8256_v36 = vld [vmem:[%s9932_s23 + $0xf0] sm:$0xff]   ;;  %v8261_v41 = vld [vmem:[%s9932_s23 + $0x38] sm:$0xff]  }
 0x179   : > { %v1427_v45 = vsel %vm1419_vm1, %v7070_v42, 0  ;;  %v8262_v42 = vld [vmem:[%s9932_s23 + $0xb8] sm:$0xff]  }
 0x17b   : > { %1458 = vmatpush1.bf16.msra.mxu0 %v8116_v46  ;;  %1564 = vmatpush1.bf16.msra.mxu1 %v8117_v48  ;;  %v10096_v46 = vld [vmem:[#allocation9 + $0x8] ss:$16 sps:$4 sm:$0xff]  }
 0x17c   : > { %1459 = vmatprep.subr.bf16.mxu0 %v8118_v49  ;;  %1565 = vmatprep.subr.bf16.mxu1 %v8120_v50  ;;  %v8204_v48 = vld [vmem:[%s9925_s16 + $0x10] ss:$20 sps:$4 sm:$0xff]   ;;  %v9467_v50 = vmov 0  }
 0x17d   : > { %v8205_v49 = vld [vmem:[%s9925_s16 + $0x290] ss:$20 sps:$4 sm:$0xff]  }
 0x17f   : > { %1460 = vmatpush1.bf16.msra.mxu0 %v8122_v51  ;;  %1566 = vmatpush1.bf16.msra.mxu1 %v8123_v52  ;;  %v8206_v51 = vld [vmem:[%s9925_s16 + $0x178] ss:$20 sps:$4 sm:$0xff]  }
 0x180   : > { %1461 = vmatprep.subr.bf16.mxu0 %v8124_v53  ;;  %1567 = vmatprep.subr.bf16.mxu1 %v8126_v54  ;;  %v10102_v52 = vld [vmem:[#allocation9 + $0x2c] ss:$16 sps:$4 sm:$0xff]  }
 0x181   : > { %v8207_v53 = vld [vmem:[%s9925_s16 + $0x38] ss:$20 sps:$4 sm:$0xff]  }
 0x182   : > { %v8208_v54 = vld [vmem:[%s9925_s16 + $0x2b8] ss:$20 sps:$4 sm:$0xff]  }
 0x183   : > { %1462 = vmatpush1.bf16.msra.mxu0 %v8128_v55  ;;  %1568 = vmatpush1.bf16.msra.mxu1 %v8129_v56  ;;  %v8212_v55 = vld [vmem:[%s9925_s16 + $0x1a0] ss:$20 sps:$4 sm:$0xff]  }
 0x184   : > { %1463 = vmatprep.subr.bf16.mxu0 %v8130_v57  ;;  %1569 = vmatprep.subr.bf16.mxu1 %v8132_v58  ;;  %v10114_v56 = vld [vmem:[#allocation9 + $0x28] ss:$16 sps:$4 sm:$0xff]  }
 0x185   : > { %v8213_v57 = vld [vmem:[%s9925_s16 + $0x60] ss:$20 sps:$4 sm:$0xff]  }
 0x186   : > { %v8214_v58 = vld [vmem:[%s9925_s16 + $0x2e0] ss:$20 sps:$4 sm:$0xff]  }
 0x187   : > { %1464 = vmatpush1.bf16.msra.mxu0 %v8134_v59  ;;  %1570 = vmatpush1.bf16.msra.mxu1 %v8135_v60  ;;  %v8215_v59 = vld [vmem:[%s9925_s16 + $0x1c8] ss:$20 sps:$4 sm:$0xff]  }
 0x188   : > { %1465 = vmatprep.subr.bf16.mxu0 %v8136_v61  ;;  %1571 = vmatprep.subr.bf16.mxu1 %v8138_v62  ;;  %v8216_v60 = vld [vmem:[%s9925_s16 + $0x88] ss:$20 sps:$4 sm:$0xff]   ;;  %v8218_v62 = vld [vmem:[%s9925_s16 + $0x1f0] ss:$20 sps:$4 sm:$0xff]  }
 0x189   : > { %v8217_v61 = vld [vmem:[%s9925_s16 + $0x308] ss:$20 sps:$4 sm:$0xff]  }
 0x18b   : > { %1466 = vmatpush1.bf16.msra.mxu0 %v8140_v63  ;;  %1572 = vmatpush1.bf16.msra.mxu1 %v8141_v0  ;;  %v8219_v63 = vld [vmem:[%s9925_s16 + $0xb0] ss:$20 sps:$4 sm:$0xff]  }
 0x18c   : > { %1488 = vmatprep.subr.bf16.mxu0 %v8146_v1  ;;  %1594 = vmatprep.subr.bf16.mxu1 %v8149_v2  ;;  %v8220_v0 = vld [vmem:[%s9925_s16 + $0x330] ss:$20 sps:$4 sm:$0xff]   ;;  %v8221_v1 = vld [vmem:[%s9925_s16 + $0x218] ss:$20 sps:$4 sm:$0xff]  }
 0x18d   : > { %v8222_v2 = vld [vmem:[%s9925_s16 + $0xd8] ss:$20 sps:$4 sm:$0xff]  }
 0x18e   : > { %1468 = vmatmul.mubr.bf16.vlgmr.msra.gmra.mrb[0].mxu0 %v10043_v5  ;;  %1574 = vmatmul.mubr.bf16.vlgmr.msra.gmra.mrb[0].mxu1 %v10043_v5 }
 0x18f   : > { %1489 = vmatpush1.bf16.msra.mxu0 %v8144_v3  ;;  %1595 = vmatpush1.bf16.msra.mxu1 %v8147_v4  ;;  %v8223_v3 = vld [vmem:[%s9925_s16 + $0x358] ss:$20 sps:$4 sm:$0xff]   ;;  %v8224_v4 = vld [vmem:[%s9925_s16 + $0x240] ss:$20 sps:$4 sm:$0xff]  }
 0x190   : > { %1490 = vmatprep.subr.bf16.mxu0 %v8153_v6  ;;  %1596 = vmatprep.subr.bf16.mxu1 %v8156_v7  ;;  %v8226_v6 = vld [vmem:[%s9925_s16 + $0x380] ss:$20 sps:$4 sm:$0xff]   ;;  %v8227_v7 = vld [vmem:[%s9925_s16 + $0x268] ss:$20 sps:$4 sm:$0xff]  }
 0x191   : > { %1477 = vmatprep.mubr.bf16.mxu0 %v10047_v8  ;;  %1583 = vmatprep.mubr.bf16.mxu1 %v10047_v8 }
 0x193   : > { %1491 = vmatpush1.bf16.msra.mxu0 %v8151_v9  ;;  %1597 = vmatpush1.bf16.msra.mxu1 %v8154_v10  ;;  %v8228_v9 = vld [vmem:[%s9925_s16 + $0x128] ss:$20 sps:$4 sm:$0xff]  }
 0x194   : > { %1492 = vmatprep.subr.bf16.mxu0 %v8159_v11  ;;  %1598 = vmatprep.subr.bf16.mxu1 %v8162_v12  ;;  %v8229_v10 = vld [vmem:[%s9925_s16 + $0x3a8] ss:$20 sps:$4 sm:$0xff]   ;;  %v8230_v11 = vld [vmem:[%s9925_s16 + $0x3d0] ss:$0 sps:$4 sm:$0xff]  }
 0x195   : > { %v8231_v12 = vld [vmem:[%s9932_s23 + $0x40] sm:$0xff]  }
 0x196   : > { %1478 = vmatmul.mubr.bf16.gmra.mrb[4].mxu0 %v10059_v15  ;;  %1584 = vmatmul.mubr.bf16.gmra.mrb[4].mxu1 %v10059_v15 }
 0x197   : > { %1493 = vmatpush1.bf16.msra.mxu0 %v8157_v13  ;;  %1599 = vmatpush1.bf16.msra.mxu1 %v8160_v14  ;;  %v1433_v13 = vsel %vm1419_vm1, %v8230_v11, 0  ;;  %v8232_v14 = vld [vmem:[%s9932_s23 + $0xc0] sm:$0xff]  }
 0x198   : > { %1494 = vmatprep.subr.bf16.mxu0 %v8165_v16  ;;  %1600 = vmatprep.subr.bf16.mxu1 %v8168_v17  ;;  %v8233_v16 = vld [vmem:[%s9932_s23] sm:$0xff]   ;;  %v8235_v17 = vld [vmem:[%s9932_s23 + $0x48] sm:$0xff]  }
 0x199   : > { %7074 = vmatprep.mubr.msk.bf16.mxu0 %vm1412_vm0, %v10063_v18  ;;  %7077 = vmatprep.mubr.msk.bf16.mxu1 %vm1412_vm0, %v10063_v18 }
 0x19b   : > { %1495 = vmatpush1.bf16.msra.mxu0 %v8163_v19  ;;  %1601 = vmatpush1.bf16.msra.mxu1 %v8166_v20  ;;  %v8236_v19 = vld [vmem:[%s9932_s23 + $0xc8] sm:$0xff]  }
 0x19c   : > { %1496 = vmatprep.subr.bf16.mxu0 %v8171_v21  ;;  %1602 = vmatprep.subr.bf16.mxu1 %v8174_v22  ;;  %v8237_v20 = vld [vmem:[%s9932_s23 + $0x8] sm:$0xff]   ;;  %v8239_v21 = vld [vmem:[%s9932_s23 + $0x50] sm:$0xff]  }
 0x19d   : > { %v8241_v22 = vld [vmem:[%s9932_s23 + $0x10] sm:$0xff]  }
 0x19f   : > { %1497 = vmatpush1.bf16.msra.mxu0 %v8169_v23  ;;  %1603 = vmatpush1.bf16.msra.mxu1 %v8172_v24  ;;  %v8243_v23 = vld [vmem:[%s9932_s23 + $0x58] sm:$0xff]   ;;  %v8242_v24 = vld [vmem:[%s9932_s23 + $0x90] sm:$0xff]  }
 0x1a0   : > { %1498 = vmatprep.subr.bf16.mxu0 %v8177_v25  ;;  %1604 = vmatprep.subr.bf16.mxu1 %v8180_v26  ;;  %v8244_v25 = vld [vmem:[%s9932_s23 + $0xd8] sm:$0xff]  }
 0x1a1   : > { %v8245_v26 = vld [vmem:[%s9932_s23 + $0x18] sm:$0xff]  }
 0x1a3   : > { %1499 = vmatpush1.bf16.msra.mxu0 %v8175_v27  ;;  %1605 = vmatpush1.bf16.msra.mxu1 %v8178_v28  ;;  %v8247_v27 = vld [vmem:[%s9932_s23 + $0x60] sm:$0xff]   ;;  %v8246_v28 = vld [vmem:[%s9932_s23 + $0x98] sm:$0xff]  }
 0x1a4   : > { %1500 = vmatprep.subr.bf16.mxu0 %v8183_v29  ;;  %1606 = vmatprep.subr.bf16.mxu1 %v8186_v30  ;;  %v8249_v29 = vld [vmem:[%s9932_s23 + $0x20] sm:$0xff]   ;;  %v8251_v30 = vld [vmem:[%s9932_s23 + $0x68] sm:$0xff]  }
 0x1a7   : > { %1501 = vmatpush1.bf16.msra.mxu0 %v8181_v31  ;;  %1607 = vmatpush1.bf16.msra.mxu1 %v8184_v32  ;;  %v8250_v31 = vld [vmem:[%s9932_s23 + $0xa0] sm:$0xff]   ;;  %v8252_v32 = vld [vmem:[%s9932_s23 + $0xe8] sm:$0xff]  }
 0x1a8   : > { %1502 = vmatprep.subr.bf16.mxu0 %v8192_v33  ;;  %1608 = vmatprep.subr.bf16.mxu1 %v8195_v34  ;;  %v8253_v33 = vld [vmem:[%s9932_s23 + $0x28] sm:$0xff]  }
 0x1a9   : > { %v8254_v34 = vld [vmem:[%s9932_s23 + $0xa8] sm:$0xff]  }
 0x1ab   : > { %1503 = vmatpush1.bf16.msra.mxu0 %v8190_v37  ;;  %1609 = vmatpush1.bf16.msra.mxu1 %v8193_v38  ;;  %v8257_v37 = vld [vmem:[%s9932_s23 + $0x30] sm:$0xff]  }
 0x1ac   : > { %7073 = vmatprep.subr.msk.bf16.mxu0 %vm1419_vm1, %v7069_v39  ;;  %7076 = vmatprep.subr.msk.bf16.mxu1 %vm1419_vm1, %v7071_v40  ;;  %v8258_v38 = vld [vmem:[%s9932_s23 + $0xb0] sm:$0xff]   ;;  %v8259_v39 = vld [vmem:[%s9932_s23 + $0x78] sm:$0xff]  }
 0x1ad   : > { %v8260_v40 = vld [vmem:[%s9932_s23 + $0xf8] sm:$0xff]  }
 0x1af   : > { %1505 = vmatpush1.bf16.msra.mxu0 %v1421_v44  ;;  %1611 = vmatpush1.bf16.msra.mxu1 %v1427_v45 }
 0x1b0   : > { %7674 = vmatprep.subr.bf16.mxu0 %v8203_v43  ;;  %1696 = vmatprep.subr.bf16.mxu1 %v9467_v50  ;;  %v8263_v43 = vld [vmem:[%s9932_s23 + $0x100] sm:$0xff]  }
 0x1b2   : > { %1521 = vmatmul.mubr.bf16.vlgmr.msra.gmra.mrb[0].mxu0 %v10096_v46  ;;  %1627 = vmatmul.mubr.bf16.vlgmr.msra.gmra.mrb[0].mxu1 %v10096_v46 }
 0x1b3   : > { %7675 = vmatpush3.bf16.msra.mxu0 %v8204_v48  ;;  %1697 = vmatpush1.bf16.msra.mxu1 %v8205_v49 }
 0x1b4   : > { %7676 = vmatprep.subr.bf16.mxu0 %v8206_v51  ;;  %1698 = vmatprep.subr.bf16.mxu1 %v9467_v50 }
 0x1b5   : > { %7075 = vmatprep.mubr.msk.bf16.mxu0 %vm1412_vm0, %v10102_v52  ;;  %7078 = vmatprep.mubr.msk.bf16.mxu1 %vm1412_vm0, %v10102_v52 }
 0x1b7   : > { %7677 = vmatpush3.bf16.msra.mxu0 %v8207_v53  ;;  %1699 = vmatpush1.bf16.msra.mxu1 %v8208_v54 }
 0x1b8   : > { %7678 = vmatprep.subr.bf16.mxu0 %v8212_v55  ;;  %1700 = vmatprep.subr.bf16.mxu1 %v9467_v50 }
 0x1ba   : > { %1531 = vmatmul.mubr.bf16.gmra.mrb[4].mxu0 %v10114_v56  ;;  %1637 = vmatmul.mubr.bf16.gmra.mrb[4].mxu1 %v10114_v56 }
 0x1bb   : > { %7679 = vmatpush3.bf16.msra.mxu0 %v8213_v57  ;;  %1701 = vmatpush1.bf16.msra.mxu1 %v8214_v58 }
 0x1bc   : > { %7680 = vmatprep.subr.bf16.mxu0 %v8215_v59  ;;  %1702 = vmatprep.subr.bf16.mxu1 %v9467_v50 }
 0x1bd   : > { %1679 = vmatprep.mubr.bf16.mxu0 %v10018_v47  ;;  %7079 = vmatprep.mubr.msk.bf16.mxu1 %vm1412_vm0, %v10063_v18  ;;  %v8225_v47 = vld [vmem:[%s9925_s16 + $0x100] ss:$20 sps:$4 sm:$0xff]  }
 0x1be   : > { %v8234_v18 = vld [vmem:[%s9932_s23 + $0x80] sm:$0xff]  }
 0x1bf   : > { %7681 = vmatpush3.bf16.msra.mxu0 %v8216_v60  ;;  %1703 = vmatpush1.bf16.msra.mxu1 %v8217_v61 }
 0x1c0   : > { %7682 = vmatprep.subr.bf16.mxu0 %v8218_v62  ;;  %1704 = vmatprep.subr.bf16.mxu1 %v9467_v50 }
 0x1c3   : > { %7683 = vmatpush3.bf16.msra.mxu0 %v8219_v63  ;;  %1705 = vmatpush1.bf16.msra.mxu1 %v8220_v0 }
 0x1c4   : > { %7684 = vmatprep.subr.bf16.mxu0 %v8221_v1  ;;  %1706 = vmatprep.subr.bf16.mxu1 %v9467_v50 }
 0x1c7   : > { %7685 = vmatpush3.bf16.msra.mxu0 %v8222_v2  ;;  %1707 = vmatpush1.bf16.msra.mxu1 %v8223_v3 }
 0x1c8   : > { %7686 = vmatprep.subr.bf16.mxu0 %v8224_v4  ;;  %1708 = vmatprep.subr.bf16.mxu1 %v9467_v50 }
 0x1cb   : > { %7687 = vmatpush3.bf16.msra.mxu0 %v8225_v47  ;;  %1709 = vmatpush1.bf16.msra.mxu1 %v8226_v6 }
 0x1cc   : > { %7688 = vmatprep.subr.bf16.mxu0 %v8227_v7  ;;  %1710 = vmatprep.subr.bf16.mxu1 %v9467_v50 }
 0x1cf   : > { %7689 = vmatpush3.bf16.msra.mxu0 %v8228_v9  ;;  %1711 = vmatpush1.bf16.msra.mxu1 %v8229_v10 }
 0x1d0   : > { %1712 = vmatprep.subr.bf16.mxu1 %v9467_v50  ;;  %7702 = vmatprep.subr.bf16.mxu0 %v8231_v12 }
 0x1d2   : > { %1680 = vmatmul.mubr.bf16.vlgmr.msra.gmra.mrb[8].mxu0 %v10043_v5  ;;  %v8238_v5 = vld [vmem:[%s9932_s23 + $0x88] sm:$0xff]  }
 0x1d3   : > { %1713 = vmatpush1.bf16.msra.mxu1 %v1433_v13  ;;  %1687 = vmatprep.mubr.bf16.mxu0 %v10047_v8  ;;  %v8240_v8 = vld [vmem:[%s9932_s23 + $0xd0] sm:$0xff]  }
 0x1d4   : > { %7730 = vmatprep.subr.bf16.mxu1 %v8232_v14  ;;  %7703 = vmatpush3.bf16.msra.mxu0 %v8233_v16 }
 0x1d5   : > { %7704 = vmatprep.subr.bf16.mxu0 %v8235_v17 }
 0x1d6   : > { %1729 = vmatmul.mubr.bf16.vlgmr.msra.gmra.mrb[8].mxu1 %v10096_v46 }
 0x1d7   : > { %7080 = vmatprep.mubr.msk.bf16.mxu1 %vm1412_vm0, %v10102_v52  ;;  %7731 = vmatpush3.bf16.msra.mxu1 %v8234_v18 }
 0x1d8   : > { %7732 = vmatprep.subr.bf16.mxu1 %v8236_v19  ;;  %7705 = vmatpush3.bf16.msra.mxu0 %v8237_v20 }
 0x1d9   : > { %7706 = vmatprep.subr.bf16.mxu0 %v8239_v21 }
 0x1da   : > { %1688 = vmatmul.mubr.bf16.gmra.mrb[12].mxu0 %v10059_v15  ;;  %v8248_v15 = vld [vmem:[%s9932_s23 + $0xe0] sm:$0xff]  }
 0x1db   : > { %7733 = vmatpush3.bf16.msra.mxu1 %v8238_v5 }
 0x1dc   : > { %7734 = vmatprep.subr.bf16.mxu1 %v8240_v8  ;;  %7707 = vmatpush3.bf16.msra.mxu0 %v8241_v22 }
 0x1dd   : > { %7708 = vmatprep.subr.bf16.mxu0 %v8243_v23 }
 0x1de   : > { %1737 = vmatmul.mubr.bf16.gmra.mrb[12].mxu1 %v10114_v56 }
 0x1df   : > { %7735 = vmatpush3.bf16.msra.mxu1 %v8242_v24 }
 0x1e0   : > { %7736 = vmatprep.subr.bf16.mxu1 %v8244_v25  ;;  %7709 = vmatpush3.bf16.msra.mxu0 %v8245_v26 }
 0x1e1   : > { %7710 = vmatprep.subr.bf16.mxu0 %v8247_v27 }
 0x1e3   : > { %7737 = vmatpush3.bf16.msra.mxu1 %v8246_v28 }
 0x1e4   : > { %7738 = vmatprep.subr.bf16.mxu1 %v8248_v15  ;;  %7711 = vmatpush3.bf16.msra.mxu0 %v8249_v29 }
 0x1e5   : > { %7712 = vmatprep.subr.bf16.mxu0 %v8251_v30 }
 0x1e7   : > { %7739 = vmatpush3.bf16.msra.mxu1 %v8250_v31 }
 0x1e8   : > { %7740 = vmatprep.subr.bf16.mxu1 %v8252_v32  ;;  %7713 = vmatpush3.bf16.msra.mxu0 %v8253_v33 }
 0x1e9   : > { %7714 = vmatprep.subr.bf16.mxu0 %v8255_v35 }
 0x1eb   : > { %7741 = vmatpush3.bf16.msra.mxu1 %v8254_v34 }
 0x1ec   : > { %7742 = vmatprep.subr.bf16.mxu1 %v8256_v36  ;;  %7715 = vmatpush3.bf16.msra.mxu0 %v8257_v37 }
 0x1ed   : > { %7716 = vmatprep.subr.bf16.mxu0 %v8259_v39 }
 0x1ef   : > { %7743 = vmatpush3.bf16.msra.mxu1 %v8258_v38 }
 0x1f0   : > { %7744 = vmatprep.subr.bf16.mxu1 %v8260_v40  ;;  %7717 = vmatpush3.bf16.msra.mxu0 %v8261_v41 }
 0x1f1   : > { %7805 = vmatprep.subr.bf16.mxu0 %v8263_v43 }
 0x1f3   : > { %7745 = vmatpush3.bf16.msra.mxu1 %v8262_v42 }
 0x285   : > { %v1522_v44 = vpop.f32.mrb[0].mxu0  ;;  %v1628_v45 = vpop.f32.mrb[0].mxu1 }
 0x286   : > { %v1745_v46 = vmul.f32 0.04, %v1522_v44  ;;  %v1524_v48 = vpop.f32.mrb[1].mxu0  ;;  %v1630_v49 = vpop.f32.mrb[1].mxu1  ;;  %v1747_v50 = vmul.f32 0.04, %v1628_v45 }
 0x287   : > { %v1746_v51 = vmul.f32 0.04, %v1524_v48  ;;  %v1526_v52 = vpop.f32.mrb[2].mxu0  ;;  %v1632_v53 = vpop.f32.mrb[2].mxu1  ;;  %v1748_v58 = vmul.f32 0.04, %v1630_v49 }
 0x288   : > { %v1750_v54 = vmul.f32 0.04, %v1526_v52  ;;  %v1752_v55 = vmul.f32 0.04, %v1632_v53  ;;  %v1528_v56 = vpop.f32.mrb[3].mxu0  ;;  %v1634_v57 = vpop.f32.mrb[3].mxu1 }
 0x289   : > { %v1751_v59 = vmul.f32 0.04, %v1528_v56  ;;  %v1753_v60 = vmul.f32 0.04, %v1634_v57 }
 0x28a   : > { %v1765_v61 = vpack.c.bf16 %v1750_v54, %v1745_v46  ;;  %v1767_v62 = vpack.c.bf16 %v1752_v55, %v1747_v50  ;;  %v7081_v54 = vld [vmem:[%s474_s26] ss:$0 sm:$0xff] }
 0x28b   : > { %v1766_v63 = vpack.c.bf16 %v1751_v59, %v1746_v51  ;;  %v1768_v0 = vpack.c.bf16 %v1753_v60, %v1748_v58  ;;  %v7125_v51 = vld [vmem:[%s513_s5] ss:$0 sm:$0xff] }
 0x28c   : > { %2465 = vst [vmem:[%s9968_s0] sm:$0x3] %v7125_v51 }
 0x28d   : > { %v1532_v1 = vpop.f32.mrb[4].mxu0  ;;  %v1638_v2 = vpop.f32.mrb[4].mxu1  ;;  %2085 = vmatprep.mubr.bf16.mxu0 %v1766_v63  ;;  %2134 = vmatprep.mubr.bf16.mxu1 %v1768_v0 }
 0x28e   : > { %v1755_v3 = vmul.f32 0.04, %v1532_v1  ;;  %v1534_v4 = vpop.f32.mrb[5].mxu0  ;;  %v1640_v47 = vpop.f32.mrb[5].mxu1  ;;  %2086 = vmatmul.mubr.bf16.vlgmr.msra.gmra.mrb[16].mxu0 %v1765_v61  ;;  %2135 = vmatmul.mubr.bf16.vlgmr.msra.gmra.mrb[16].mxu1 %v1767_v62  ;;  %v1757_v6 = vmul.f32 0.04, %v1638_v2 }
 0x28f   : > { %v1756_v7 = vmul.f32 0.04, %v1534_v4  ;;  %v1536_v9 = vpop.f32.mrb[6].mxu0  ;;  %v1642_v10 = vpop.f32.mrb[6].mxu1  ;;  %7806 = vmatpush3.bf16.msra.mxu0 %v8263_v43  ;;  %v1758_v16 = vmul.f32 0.04, %v1640_v47 }
 0x290   : > { %v1760_v11 = vmul.f32 0.04, %v1536_v9  ;;  %v1762_v12 = vmul.f32 0.04, %v1642_v10  ;;  %v1538_v13 = vpop.f32.mrb[7].mxu0  ;;  %v1644_v14 = vpop.f32.mrb[7].mxu1 }
 0x291   : > { %v1761_v17 = vmul.f32 0.04, %v1538_v13  ;;  %v1763_v18 = vmul.f32 0.04, %v1644_v14 }
 0x292   : > { %v1770_v19 = vpack.c.bf16 %v1760_v11, %v1755_v3  ;;  %v1772_v20 = vpack.c.bf16 %v1762_v12, %v1757_v6 }
 0x293   : > { %v1771_v21 = vpack.c.bf16 %v1761_v17, %v1756_v7  ;;  %v1773_v5 = vpack.c.bf16 %v1763_v18, %v1758_v16 }
 0x295   : > { %2093 = vmatprep.mubr.bf16.mxu0 %v1771_v21  ;;  %2142 = vmatprep.mubr.bf16.mxu1 %v1773_v5 }
 0x296   : > { %2094 = vmatmul.mubr.bf16.gmra.mrb[20].mxu0 %v1770_v19  ;;  %2143 = vmatmul.mubr.bf16.gmra.mrb[20].mxu1 %v1772_v20 }
 0x2a5   : > { %v7690_v8 = vpop.f32.mrb[8].mxu0 }
 0x2a6   : > { %v7691_v22 = vpop.f32.mrb[9].mxu0 }
 0x2a7   : > { %v7692_v23 = vadd.f32 %v7691_v22, %v7690_v8  ;;  %v7693_v24 = vpop.f32.mrb[10].mxu0  ;;  %v9468_v8 = vmov 1966171168  }
 0x2a8   : > { %v7694_v25 = vpop.f32.mrb[11].mxu0  ;;  %v2211_v22 = vunpack.c.l.s4 %v9468_v8 }
 0x2a9   : > { %v7695_v26 = vadd.f32 %v7694_v25, %v7693_v24  ;;  %v1730_v27 = vpop.f32.mrb[8].mxu1 }
 0x2aa   : > { %v1731_v28 = vadd.f32 %v7692_v23, %v1730_v27  ;;  %v1732_v15 = vpop.f32.mrb[9].mxu1  ;;  %v2213_v23 = vlaneseq  ;;  %v2212_v25 = vunpack.c.0.s8 %v2211_v22 }
 0x2ab   : > { %v1733_v29 = vpop.f32.mrb[10].mxu1 }
 0x2ac   : > { %v1734_v30 = vadd.f32 %v7695_v26, %v1733_v29  ;;  %v1735_v31 = vpop.f32.mrb[11].mxu1  ;;  %v1749_v33 = vmul.f32 0.04, %v1731_v28  ;;  %v2214_v26 = vshrl.u32 %v2213_v23, 7 }
 0x2ad   : > { %v7696_v32 = vpop.f32.mrb[12].mxu0 }
 0x2ae   : > { %v1754_v34 = vmul.f32 0.04, %v1734_v30  ;;  %v7697_v35 = vpop.f32.mrb[13].mxu0 }
 0x2af   : > { %v7698_v36 = vadd.f32 %v7697_v35, %v7696_v32  ;;  %v7699_v37 = vpop.f32.mrb[14].mxu0 }
 0x2b0   : > { %v1769_v38 = vpack.c.bf16 %v1754_v34, %v1749_v33  ;;  %v7700_v39 = vpop.f32.mrb[15].mxu0  ;;  %v2215_v34 = vsub.s32 %v2212_v25, %v2214_v26 }
 0x2b1   : > { %v7701_v40 = vadd.f32 %v7700_v39, %v7699_v37  ;;  %v1738_v41 = vpop.f32.mrb[12].mxu1 }
 0x2b2   : > { %v1739_v42 = vadd.f32 %v7698_v36, %v1738_v41  ;;  %v1740_v43 = vpop.f32.mrb[13].mxu1  ;;  %7807 = vmatprep.mubr.msk.bf16.mxu0 %vm2046_vm2, %v1769_v38 }
 0x2b3   : > { %v1741_v44 = vpop.f32.mrb[14].mxu1 }
 0x2b4   : > { %v1742_v45 = vadd.f32 %v7701_v40, %v1741_v44  ;;  %v1743_v46 = vpop.f32.mrb[15].mxu1  ;;  %v1759_v48 = vmul.f32 0.04, %v1739_v42 }
 0x2b6   : > { %v1764_v49 = vmul.f32 0.04, %v1742_v45 }
 0x2b8   : > { %v1774_v50 = vpack.c.bf16 %v1764_v49, %v1759_v48 }
 0x2ba   : > { %7808 = vmatmul.mubr.msk.bf16.vlgmr.msra.gmra.mrb[24].mxu0 %vm2046_vm2, %v1774_v50 }
 0x361   : > { %v7718_v52 = vpop.f32.mrb[16].mxu0  ;;  %v7746_v53 = vpop.f32.mrb[16].mxu1 }
 0x362   : > { %v7719_v55 = vpop.f32.mrb[17].mxu0  ;;  %v7747_v56 = vpop.f32.mrb[17].mxu1 }
 0x363   : > { %v7720_v57 = vadd.f32 %v7719_v55, %v7718_v52  ;;  %v7748_v58 = vadd.f32 %v7747_v56, %v7746_v53  ;;  %v7721_v59 = vpop.f32.mrb[18].mxu0  ;;  %v7749_v60 = vpop.f32.mrb[18].mxu1 }
 0x364   : > { %v7722_v61 = vpop.f32.mrb[19].mxu0  ;;  %v7750_v62 = vpop.f32.mrb[19].mxu1 }
 0x365   : > { %v2088_v63 = vadd.f32 %v7720_v57, %v7081_v54  ;;  %v7723_v0 = vadd.f32 %v7722_v61, %v7721_v59  ;;  %v7751_v1 = vadd.f32 %v7750_v62, %v7749_v60 }
 0x367   : > { %v2091_v2 = vadd.f32 %v7723_v0, %v7081_v54  ;;  %v2137_v3 = vadd.f32 %v7748_v58, %v2088_v63 }
 0x369   : > { %v7724_v4 = vpop.f32.mrb[20].mxu0  ;;  %v7752_v47 = vpop.f32.mrb[20].mxu1  ;;  %v2140_v6 = vadd.f32 %v7751_v1, %v2091_v2 }
 0x36a   : > { %v7725_v7 = vpop.f32.mrb[21].mxu0  ;;  %v7753_v9 = vpop.f32.mrb[21].mxu1 }
 0x36b   : > { %v7726_v10 = vadd.f32 %v7725_v7, %v7724_v4  ;;  %v7754_v11 = vadd.f32 %v7753_v9, %v7752_v47  ;;  %v7727_v12 = vpop.f32.mrb[22].mxu0  ;;  %v7755_v13 = vpop.f32.mrb[22].mxu1 }
 0x36c   : > { %v7728_v14 = vpop.f32.mrb[23].mxu0  ;;  %v7756_v16 = vpop.f32.mrb[23].mxu1 }
 0x36d   : > { %v2096_v17 = vadd.f32 %v7726_v10, %v7081_v54  ;;  %v7729_v18 = vadd.f32 %v7728_v14, %v7727_v12  ;;  %v7757_v19 = vadd.f32 %v7756_v16, %v7755_v13 }
 0x36f   : > { %v2099_v20 = vadd.f32 %v7729_v18, %v7081_v54  ;;  %v2145_v21 = vadd.f32 %v7754_v11, %v2096_v17 }
 0x371   : > { %v2148_v5 = vadd.f32 %v7757_v19, %v2099_v20 }
 0x38d   : > { %v7809_v24 = vpop.f32.mrb[24].mxu0 }
 0x38e   : > { %v2194_v27 = vadd.f32 %v7809_v24, %v2145_v21  ;;  %v2185_v28 = vpop.f32.mrb[25].mxu0 }
 0x38f   : > { %v2186_v15 = vadd.f32 %v2185_v28, %v2137_v3  ;;  %v7810_v29 = vpop.f32.mrb[26].mxu0 }
 0x390   : > { %v2202_v30 = vmax.f32 %v2194_v27, 0.0  ;;  %v2197_v31 = vadd.f32 %v7810_v29, %v2148_v5  ;;  %v2188_v32 = vpop.f32.mrb[27].mxu0 }
 0x391   : > { %v2200_v33 = vmax.f32 %v2186_v15, 0.0  ;;  %v2189_v35 = vadd.f32 %v2188_v32, %v2140_v6 }
 0x392   : > { %v2203_v36 = vmax.f32 %v2197_v31, 0.0 }
 0x393   : > { %v2208_v37 = vcombine.low %v2200_v33, %v2202_v30  ;;  %v2209_v38 = vcombine.high %v2200_v33, %v2202_v30  ;;  %v2201_v39 = vmax.f32 %v2189_v35, 0.0 }
 0x395   : > { %v2216_v40 = vrot.slane %v2208_v37, %v2215_v34  ;;  %v2223_v41 = vrot.slane %v2209_v38, %v2215_v34  ;;  %v2258_v42 = vcombine.low %v2201_v39, %v2203_v36  ;;  %v2259_v43 = vcombine.high %v2201_v39, %v2203_v36 }
 0x397   : > { %v2224_v44 = vcombine.high %v2216_v40, %v2216_v40  ;;  %v2225_v45 = vcombine.high %v2223_v41, %v2223_v41  ;;  %v2232_v46 = vrot.slane %v2216_v40, %v2215_v34  ;;  %v2239_v48 = vrot.slane %v2223_v41, %v2215_v34 }
 0x398   : > { %v2266_v49 = vrot.slane %v2258_v42, %v2215_v34  ;;  %v2273_v50 = vrot.slane %v2259_v43, %v2215_v34 }
 0x399   : > { %v2246_v51 = vrot.slane %v2224_v44, %v2215_v34  ;;  %v2253_v52 = vrot.slane %v2225_v45, %v2215_v34  ;;  %v2254_v53 = vcombine.high %v2232_v46, %v2232_v46  ;;  %v2255_v54 = vcombine.high %v2239_v48, %v2239_v48 }
 0x39a   : > { %v2274_v55 = vcombine.high %v2266_v49, %v2266_v49  ;;  %v2275_v56 = vcombine.high %v2273_v50, %v2273_v50  ;;  %v2282_v57 = vrot.slane %v2266_v49, %v2215_v34  ;;  %v2289_v58 = vrot.slane %v2273_v50, %v2215_v34 }
 0x39b   : > { %v2256_v59 = vcombine.high %v2246_v51, %v2246_v51  ;;  %v2257_v60 = vcombine.high %v2253_v52, %v2253_v52  ;;  %v7117_v61 = vpack.c.bf16 %v2246_v51, %v2232_v46  ;;  %v7119_v62 = vpack.c.bf16 %v2253_v52, %v2239_v48 }
 0x39c   : > { %v2296_v63 = vrot.slane %v2274_v55, %v2215_v34  ;;  %v2303_v0 = vrot.slane %v2275_v56, %v2215_v34  ;;  %v2304_v3 = vcombine.high %v2282_v57, %v2282_v57  ;;  %v2305_v4 = vcombine.high %v2289_v58, %v2289_v58 }
 0x39d   : > { %v7118_v1 = vpack.c.bf16 %v2256_v59, %v2254_v53  ;;  %v7120_v2 = vpack.c.bf16 %v2257_v60, %v2255_v54  ;;  %v2366_v10 = vrot.slane %v7117_v61, %v2215_v34  ;;  %v2380_v12 = vrot.slane %v7119_v62, %v2215_v34 }
 0x39e   : > { %v2306_v47 = vcombine.high %v2296_v63, %v2296_v63  ;;  %v2307_v6 = vcombine.high %v2303_v0, %v2303_v0  ;;  %v7121_v7 = vpack.c.bf16 %v2296_v63, %v2282_v57  ;;  %v7123_v9 = vpack.c.bf16 %v2303_v0, %v2289_v58 }
 0x39f   : > { %v2373_v11 = vrot.slane %v7118_v1, %v2215_v34  ;;  %v2387_v13 = vrot.slane %v7120_v2, %v2215_v34 }
 0x3a0   : > { %v7122_v14 = vpack.c.bf16 %v2306_v47, %v2304_v3  ;;  %v7124_v16 = vpack.c.bf16 %v2307_v6, %v2305_v4  ;;  %v2415_v19 = vrot.slane %v7121_v7, %v2215_v34  ;;  %v2429_v21 = vrot.slane %v7123_v9, %v2215_v34 }
 0x3a1   : > { %v2388_v17 = vcombine.low %v2366_v10, %v2373_v11  ;;  %v2389_v18 = vcombine.low %v2380_v12, %v2387_v13 }
 0x3a2   : > { %v2422_v20 = vrot.slane %v7122_v14, %v2215_v34  ;;  %v2436_v5 = vrot.slane %v7124_v16, %v2215_v34 }
 0x3a3   : > { %v2396_v8 = vrot.slane %v2388_v17, %v2215_v34  ;;  %v2403_v22 = vrot.slane %v2389_v18, %v2215_v34 }
 0x3a4   : > { %v2437_v23 = vcombine.low %v2415_v19, %v2422_v20  ;;  %v2438_v24 = vcombine.low %v2429_v21, %v2436_v5 }
 0x3a5   : > { %v2404_v25 = vcombine.low %v2396_v8, %v2403_v22 }
 0x3a6   : > { %v2445_v26 = vrot.slane %v2437_v23, %v2215_v34  ;;  %v2452_v27 = vrot.slane %v2438_v24, %v2215_v34 }
 0x3a7   : > { %2456 = vst [vmem:[#allocation2] sm:$0xff] %v2404_v25 }
 0x3a8   : > { %v2453_v28 = vcombine.low %v2445_v26, %v2452_v27 }
 0x3aa   : > { %2457 = vst [vmem:[#allocation2 + $0x8] sm:$0xff] %v2453_v28 }
 0x3ab PF: > { %v8264_v15 = vld [vmem:[%s9944_s20 + $0x4] ss:$16 sps:$4 sm:$0xff]   ;;  %v8266_v29 = vld [vmem:[%s9944_s20 + $0xc] ss:$16 sps:$4 sm:$0xff]   ;;  %v8268_v30 = vld [vmem:[%s9944_s20] ss:$16 sps:$4 sm:$0xff]   ;;  %v2982_v1 = vlaneseq }
 0x3ac   : > { %5678 = vmatprep.subr.bf16.mxu0 %v8264_v15  ;;  %v8269_v31 = vld [vmem:[%s9944_s20 + $0x8] ss:$16 sps:$4 sm:$0xff]   ;;  %6006 = vmatprep.subr.bf16.mxu1 %v8266_v29  ;;  %v8270_v32 = vld [vmem:[%s9944_s20 + $0x24] ss:$16 sps:$4 sm:$0xff]   ;;  %v8272_v33 = vld [vmem:[%s9944_s20 + $0x2c] ss:$16 sps:$4 sm:$0xff]  }
 0x3ad   : > { %5679 = vmatpush1.bf16.msra.mxu0 %v8268_v30  ;;  %6007 = vmatpush1.bf16.msra.mxu1 %v8269_v31  ;;  %v8274_v34 = vld [vmem:[%s9944_s20 + $0x20] ss:$16 sps:$4 sm:$0xff]   ;;  %v8275_v35 = vld [vmem:[%s9944_s20 + $0x28] ss:$16 sps:$4 sm:$0xff]   ;;  %v8276_v36 = vld [vmem:[%s9944_s20 + $0x44] ss:$16 sps:$4 sm:$0xff]  }
 0x3ae   : > { %5680 = vmatprep.subr.bf16.mxu0 %v8270_v32  ;;  %6008 = vmatprep.subr.bf16.mxu1 %v8272_v33  ;;  %v8278_v37 = vld [vmem:[%s9944_s20 + $0x4c] ss:$16 sps:$4 sm:$0xff]   ;;  %v8280_v38 = vld [vmem:[%s9944_s20 + $0x40] ss:$16 sps:$4 sm:$0xff]   ;;  %v8281_v39 = vld [vmem:[%s9944_s20 + $0x48] ss:$16 sps:$4 sm:$0xff]  }
 0x3af   : > { %v8282_v40 = vld [vmem:[%s9944_s20 + $0x64] ss:$16 sps:$4 sm:$0xff]   ;;  %v8284_v41 = vld [vmem:[%s9944_s20 + $0x6c] ss:$16 sps:$4 sm:$0xff]   ;;  %v8286_v42 = vld [vmem:[%s9944_s20 + $0x60] ss:$16 sps:$4 sm:$0xff]  }
 0x3b0   : > { %v8287_v43 = vld [vmem:[%s9944_s20 + $0x68] ss:$16 sps:$4 sm:$0xff]   ;;  %v8288_v44 = vld [vmem:[%s9944_s20 + $0x84] ss:$16 sps:$4 sm:$0xff]   ;;  %v8290_v45 = vld [vmem:[%s9944_s20 + $0x8c] ss:$16 sps:$4 sm:$0xff]  }
 0x3b1   : > { %5681 = vmatpush1.bf16.msra.mxu0 %v8274_v34  ;;  %6009 = vmatpush1.bf16.msra.mxu1 %v8275_v35  ;;  %v8292_v46 = vld [vmem:[%s9944_s20 + $0x80] ss:$16 sps:$4 sm:$0xff]   ;;  %v8293_v48 = vld [vmem:[%s9944_s20 + $0x88] ss:$16 sps:$4 sm:$0xff]   ;;  %v8294_v49 = vld [vmem:[%s9944_s20 + $0xa4] ss:$16 sps:$4 sm:$0xff]  }
 0x3b2   : > { %5682 = vmatprep.subr.bf16.mxu0 %v8276_v36  ;;  %6010 = vmatprep.subr.bf16.mxu1 %v8278_v37  ;;  %v8296_v50 = vld [vmem:[%s9944_s20 + $0xac] ss:$16 sps:$4 sm:$0xff]   ;;  %v8298_v51 = vld [vmem:[%s9944_s20 + $0xa0] ss:$16 sps:$4 sm:$0xff]   ;;  %v8299_v52 = vld [vmem:[%s9944_s20 + $0xa8] ss:$16 sps:$4 sm:$0xff]  }
 0x3b3   : > { %v8300_v53 = vld [vmem:[%s9944_s20 + $0xc4] ss:$16 sps:$4 sm:$0xff]   ;;  %v8302_v54 = vld [vmem:[%s9944_s20 + $0xcc] ss:$16 sps:$4 sm:$0xff]   ;;  %v8304_v55 = vld [vmem:[%s9944_s20 + $0xc0] ss:$16 sps:$4 sm:$0xff]  }
 0x3b4   : > { %v8305_v56 = vld [vmem:[%s9944_s20 + $0xc8] ss:$16 sps:$4 sm:$0xff]   ;;  %v8306_v57 = vld [vmem:[%s9944_s20 + $0xe4] ss:$16 sps:$4 sm:$0xff]   ;;  %v8308_v58 = vld [vmem:[%s9944_s20 + $0xec] ss:$16 sps:$4 sm:$0xff]  }
 0x3b5   : > { %5683 = vmatpush1.bf16.msra.mxu0 %v8280_v38  ;;  %6011 = vmatpush1.bf16.msra.mxu1 %v8281_v39  ;;  %v8310_v59 = vld [vmem:[%s9944_s20 + $0xe0] ss:$16 sps:$4 sm:$0xff]   ;;  %v8311_v60 = vld [vmem:[%s9944_s20 + $0xe8] ss:$16 sps:$4 sm:$0xff]   ;;  %v8312_v61 = vld [vmem:[%s9944_s20 + $0x104] ss:$16 sps:$4 sm:$0xff]  }
 0x3b6   : > { %5684 = vmatprep.subr.bf16.mxu0 %v8282_v40  ;;  %6012 = vmatprep.subr.bf16.mxu1 %v8284_v41  ;;  %v8314_v62 = vld [vmem:[%s9944_s20 + $0x10c] ss:$16 sps:$4 sm:$0xff]   ;;  %v8316_v63 = vld [vmem:[%s9944_s20 + $0x100] ss:$16 sps:$4 sm:$0xff]   ;;  %v8317_v0 = vld [vmem:[%s9944_s20 + $0x108] ss:$16 sps:$4 sm:$0xff]  }
 0x3b7   : > { %v9469_v2 = vmov 1966171168   ;;  %v8318_v4 = vld [vmem:[%s9944_s20 + $0x124] ss:$16 sps:$4 sm:$0xff]   ;;  %v8320_v47 = vld [vmem:[%s9944_s20 + $0x12c] ss:$16 sps:$4 sm:$0xff]  }
 0x3b8   : > { %v3006_v3 = vunpack.c.l.s4 %v9469_v2  ;;  %v8322_v6 = vld [vmem:[%s9944_s20 + $0x120] ss:$16 sps:$4 sm:$0xff]   ;;  %v10231_v7 = vshrl.u32 %v2982_v1, 7  ;;  %v8323_v10 = vld [vmem:[%s9944_s20 + $0x128] ss:$16 sps:$4 sm:$0xff]   ;;  %s11009_s7 = sld [smem:[#allocation28_spill]] }
 0x3b9   : > { %5685 = vmatpush1.bf16.msra.mxu0 %v8286_v42  ;;  %6013 = vmatpush1.bf16.msra.mxu1 %v8287_v43  ;;  %v8324_v11 = vld [vmem:[%s9944_s20 + $0x144] ss:$16 sps:$4 sm:$0xff]   ;;  %v8326_v12 = vld [vmem:[%s9944_s20 + $0x14c] ss:$16 sps:$4 sm:$0xff]   ;;  %v8328_v13 = vld [vmem:[%s9944_s20 + $0x140] ss:$16 sps:$4 sm:$0xff]  }
 0x3ba   : > { %5686 = vmatprep.subr.bf16.mxu0 %v8288_v44  ;;  %6014 = vmatprep.subr.bf16.mxu1 %v8290_v45  ;;  %v3007_v9 = vunpack.c.0.s8 %v3006_v3  ;;  %v8329_v14 = vld [vmem:[%s9944_s20 + $0x148] ss:$16 sps:$4 sm:$0xff]   ;;  %v8330_v17 = vld [vmem:[%s9944_s20 + $0x164] ss:$16 sps:$4 sm:$0xff]   ;;  %v8332_v18 = vld [vmem:[%s9944_s20 + $0x16c] ss:$16 sps:$4 sm:$0xff]  }
 0x3bb   : > { %v10243_v19 = vld [vmem:[#allocation2] sm:$0xff]  ;;  %v8334_v20 = vld [vmem:[%s9944_s20 + $0x160] ss:$16 sps:$4 sm:$0xff]   ;;  %s6695_s18 = sshll.u32 %s9968_s0, 4  ;;  %s11010_s6 = sld [smem:[#allocation46_spill]]  ;;  %s10833_s18 = int_to_ptr.vmem [resolvable:$true] %s6695_s18 }
 0x3bc   : > { %v10239_v16 = vsub.s32 %v3007_v9, %v10231_v7  ;;  %v8335_v5 = vld [vmem:[%s9944_s20 + $0x168] ss:$16 sps:$4 sm:$0xff]   ;;  %v8336_v8 = vld [vmem:[%s9944_s20 + $0x184] ss:$16 sps:$4 sm:$0xff]   ;;  %v8338_v22 = vld [vmem:[%s9944_s20 + $0x18c] ss:$16 sps:$4 sm:$0xff]  }
 0x3bd   : > { %5687 = vmatpush1.bf16.msra.mxu0 %v8292_v46  ;;  %6015 = vmatpush1.bf16.msra.mxu1 %v8293_v48  ;;  %v8340_v24 = vld [vmem:[%s9944_s20 + $0x180] ss:$16 sps:$4 sm:$0xff]   ;;  %v8341_v26 = vld [vmem:[%s9944_s20 + $0x188] ss:$16 sps:$4 sm:$0xff]   ;;  %v8342_v27 = vld [vmem:[%s9944_s20 + $0x1a4] ss:$16 sps:$4 sm:$0xff]  }
 0x3be   : > { %5688 = vmatprep.subr.bf16.mxu0 %v8294_v49  ;;  %6016 = vmatprep.subr.bf16.mxu1 %v8296_v50  ;;  %v3011_v21 = vrot.slane %v10243_v19, %v10239_v16  ;;  %v8344_v28 = vld [vmem:[%s9944_s20 + $0x1ac] ss:$16 sps:$4 sm:$0xff]   ;;  %v8346_v15 = vld [vmem:[%s9944_s20 + $0x1a0] ss:$16 sps:$4 sm:$0xff]   ;;  %v8347_v29 = vld [vmem:[%s9944_s20 + $0x1a8] ss:$16 sps:$4 sm:$0xff]  }
 0x3bf   : > { %v8348_v30 = vld [vmem:[%s9944_s20 + $0x1c4] ss:$16 sps:$4 sm:$0xff]   ;;  %v8350_v31 = vld [vmem:[%s9944_s20 + $0x1cc] ss:$16 sps:$4 sm:$0xff]   ;;  %v8352_v32 = vld [vmem:[%s9944_s20 + $0x1c0] ss:$16 sps:$4 sm:$0xff]  }
 0x3c0   : > { %v3019_v23 = vcombine.high %v3011_v21, %v3011_v21  ;;  %v8353_v33 = vld [vmem:[%s9944_s20 + $0x1c8] ss:$16 sps:$4 sm:$0xff]   ;;  %v8354_v34 = vld [vmem:[%s9944_s20 + $0x1e4] ss:$16 sps:$4 sm:$0xff]   ;;  %v8356_v35 = vld [vmem:[%s9944_s20 + $0x1ec] ss:$16 sps:$4 sm:$0xff]   ;;  %v10270_v41 = vrot.slane %v3011_v21, %v10239_v16 }
 0x3c1   : > { %5689 = vmatpush1.bf16.msra.mxu0 %v8298_v51  ;;  %6017 = vmatpush1.bf16.msra.mxu1 %v8299_v52  ;;  %v8358_v36 = vld [vmem:[%s9944_s20 + $0x1e0] ss:$16 sps:$4 sm:$0xff]   ;;  %v8359_v37 = vld [vmem:[%s9944_s20 + $0x1e8] ss:$16 sps:$4 sm:$0xff]   ;;  %v8362_v38 = vld [vmem:[%s9944_s20 + $0x204] ss:$16 sps:$4 sm:$0xff]  }
 0x3c2   : > { %5690 = vmatprep.subr.bf16.mxu0 %v8300_v53  ;;  %6018 = vmatprep.subr.bf16.mxu1 %v8302_v54  ;;  %v3041_v25 = vrot.slane %v3019_v23, %v10239_v16  ;;  %v8365_v39 = vld [vmem:[%s9944_s20 + $0x20c] ss:$16 sps:$4 sm:$0xff]   ;;  %v8360_v40 = vld [vmem:[%s9944_s20 + $0x200] ss:$16 sps:$4 sm:$0xff]   ;;  %v8363_v42 = vld [vmem:[%s9944_s20 + $0x208] ss:$16 sps:$4 sm:$0xff]  }
 0x3c3   : > { %v8368_v43 = vld [vmem:[%s9944_s20 + $0x224] ss:$16 sps:$4 sm:$0xff]   ;;  %v8371_v44 = vld [vmem:[%s9944_s20 + $0x22c] ss:$16 sps:$4 sm:$0xff]   ;;  %v8366_v46 = vld [vmem:[%s9944_s20 + $0x220] ss:$16 sps:$4 sm:$0xff]  }
 0x3c4   : > { %5710 = vmatprep.mubr.bf16.mxu0 %v3041_v25  ;;  %6038 = vmatprep.mubr.bf16.mxu1 %v3041_v25  ;;  %v3051_v45 = vcombine.high %v3041_v25, %v3041_v25  ;;  %v8369_v48 = vld [vmem:[%s9944_s20 + $0x228] ss:$16 sps:$4 sm:$0xff]   ;;  %v8374_v49 = vld [vmem:[%s9944_s20 + $0x244] ss:$16 sps:$4 sm:$0xff]   ;;  %v8377_v50 = vld [vmem:[%s9944_s20 + $0x24c] ss:$16 sps:$4 sm:$0xff]  }
 0x3c5   : > { %5691 = vmatpush1.bf16.msra.mxu0 %v8304_v55  ;;  %6019 = vmatpush1.bf16.msra.mxu1 %v8305_v56  ;;  %v8372_v51 = vld [vmem:[%s9944_s20 + $0x240] ss:$16 sps:$4 sm:$0xff]   ;;  %v8375_v52 = vld [vmem:[%s9944_s20 + $0x248] ss:$16 sps:$4 sm:$0xff]   ;;  %v8380_v53 = vld [vmem:[%s9944_s20 + $0x264] ss:$16 sps:$4 sm:$0xff]  }
 0x3c6   : > { %5692 = vmatprep.subr.bf16.mxu0 %v8306_v57  ;;  %6020 = vmatprep.subr.bf16.mxu1 %v8308_v58  ;;  %v8383_v54 = vld [vmem:[%s9944_s20 + $0x26c] ss:$16 sps:$4 sm:$0xff]   ;;  %v8378_v55 = vld [vmem:[%s9944_s20 + $0x260] ss:$16 sps:$4 sm:$0xff]   ;;  %v8381_v56 = vld [vmem:[%s9944_s20 + $0x268] ss:$16 sps:$4 sm:$0xff]  }
 0x3c7   : > { %v8386_v57 = vld [vmem:[%s9944_s20 + $0x284] ss:$16 sps:$4 sm:$0xff]   ;;  %v8389_v58 = vld [vmem:[%s9944_s20 + $0x28c] ss:$16 sps:$4 sm:$0xff]   ;;  %v8396_v3 = vld [vmem:[%s9944_s20 + $0x2c0] ss:$16 sps:$4 sm:$0xff]  }
 0x3c8   : > { %v8398_v1 = vld [vmem:[%s9944_s20 + $0x2c4] ss:$16 sps:$4 sm:$0xff]   ;;  %v8401_v2 = vld [vmem:[%s9944_s20 + $0x2cc] ss:$16 sps:$4 sm:$0xff]   ;;  %v8402_v9 = vld [vmem:[%s9944_s20 + $0x2e0] ss:$16 sps:$4 sm:$0xff]  }
 0x3c9   : > { %5693 = vmatpush1.bf16.msra.mxu0 %v8310_v59  ;;  %6021 = vmatpush1.bf16.msra.mxu1 %v8311_v60  ;;  %v8384_v59 = vld [vmem:[%s9944_s20 + $0x280] ss:$16 sps:$4 sm:$0xff]   ;;  %v8387_v60 = vld [vmem:[%s9944_s20 + $0x288] ss:$16 sps:$4 sm:$0xff]   ;;  %v8431_v25 = vld [vmem:[%s9944_s20 + $0x36c] ss:$16 sps:$4 sm:$0xff]  }
 0x3ca   : > { %5694 = vmatprep.subr.bf16.mxu0 %v8312_v61  ;;  %6022 = vmatprep.subr.bf16.mxu1 %v8314_v62  ;;  %v8392_v61 = vld [vmem:[%s9944_s20 + $0x2a4] ss:$16 sps:$4 sm:$0xff]   ;;  %v8395_v62 = vld [vmem:[%s9944_s20 + $0x2ac] ss:$16 sps:$4 sm:$0xff]   ;;  %v8417_v21 = vld [vmem:[%s9944_s20 + $0x328] ss:$16 sps:$4 sm:$0xff]  }
 0x3cb   : > { %v8423_v23 = vld [vmem:[%s9944_s20 + $0x348] ss:$16 sps:$4 sm:$0xff]   ;;  %s7671_s29 = sshll.u32 %s11009_s7, 5  ;;  %s6682_s26 = scalar_lea.sflag [#allocation5], %s9922_s3 }
 0x3cc   : > { %s10831_s23 = scalar_lea.hbm %s11010_s6, %s7671_s29  ;;  %s9304_s4 = scalar_lea.vmem %s10833_s18, 32 }
 0x3cd   : > { %5695 = vmatpush1.bf16.msra.mxu0 %v8316_v63  ;;  %6023 = vmatpush1.bf16.msra.mxu1 %v8317_v0  ;;  %v8390_v63 = vld [vmem:[%s9944_s20 + $0x2a0] ss:$16 sps:$4 sm:$0xff]   ;;  %v8393_v0 = vld [vmem:[%s9944_s20 + $0x2a8] ss:$16 sps:$4 sm:$0xff]   ;;  %p9305_p2 = scmp.ne.s32.totalorder %s10833_s18, %s9304_s4  ;;  %p11011_p6 = scmp.ne.s32.totalorder %s10981_s11, 0 }
 0x3ce   : > { %5696 = vmatprep.subr.bf16.mxu0 %v8318_v4  ;;  %6024 = vmatprep.subr.bf16.mxu1 %v8320_v47  ;;  %v8399_v4 = vld [vmem:[%s9944_s20 + $0x2c8] ss:$16 sps:$4 sm:$0xff]   ;;  %v8404_v47 = vld [vmem:[%s9944_s20 + $0x2e4] ss:$16 sps:$4 sm:$0xff]   ;;  %s9470_s19 = smov [#allocation15]  }
 0x3cf   : > { %p9306_p1 = pnand %p9305_p2, %p11011_p6  ;;  %s9308_s28 = sshll.u32 %s9470_s19, 4  ;;  %s9309_s28 = int_to_ptr.vmem [resolvable:$false] %s9308_s28 }
 0x3d0   : > { %s9310_s2 = scalar_lea.vmem %s9309_s28, 64  ;;  %p9311_p12 = scmp.lt.s32.totalorder %s10833_s18, %s9309_s28 }
 0x3d1   : > { %5697 = vmatpush1.bf16.msra.mxu0 %v8322_v6  ;;  %6025 = vmatpush1.bf16.msra.mxu1 %v8323_v10  ;;  %v8407_v6 = vld [vmem:[%s9944_s20 + $0x2ec] ss:$16 sps:$4 sm:$0xff]   ;;  %v8405_v10 = vld [vmem:[%s9944_s20 + $0x2e8] ss:$16 sps:$4 sm:$0xff]   ;;  %p9307_p7 = pneg %p9306_p1  ;;  %p9312_p9 = scmp.lt.s32.totalorder %s9310_s2, %s9304_s4 }
 0x3d2   : > { %5698 = vmatprep.subr.bf16.mxu0 %v8324_v11  ;;  %6026 = vmatprep.subr.bf16.mxu1 %v8326_v12  ;;  %v8410_v11 = vld [vmem:[%s9944_s20 + $0x304] ss:$16 sps:$4 sm:$0xff]   ;;  %v8413_v12 = vld [vmem:[%s9944_s20 + $0x30c] ss:$16 sps:$4 sm:$0xff]  }
 0x3d3   : > { %p9313_p11 = por %p9312_p9, %p9311_p12 }
 0x3d5   : > { %5699 = vmatpush1.bf16.msra.mxu0 %v8328_v13  ;;  %6027 = vmatpush1.bf16.msra.mxu1 %v8329_v14  ;;  %v8408_v13 = vld [vmem:[%s9944_s20 + $0x300] ss:$16 sps:$4 sm:$0xff]   ;;  %v8411_v14 = vld [vmem:[%s9944_s20 + $0x308] ss:$16 sps:$4 sm:$0xff]   ;;  %p9314_p13 = pnand %p9313_p11, %p9307_p7 }
 0x3d6   : > { %5700 = vmatprep.subr.bf16.mxu0 %v8330_v17  ;;  %6028 = vmatprep.subr.bf16.mxu1 %v8332_v18  ;;  %v8416_v17 = vld [vmem:[%s9944_s20 + $0x324] ss:$16 sps:$4 sm:$0xff]   ;;  %v8419_v18 = vld [vmem:[%s9944_s20 + $0x32c] ss:$16 sps:$4 sm:$0xff]  }
 0x3d9   : > { %5701 = vmatpush1.bf16.msra.mxu0 %v8334_v20  ;;  %6029 = vmatpush1.bf16.msra.mxu1 %v8335_v5  ;;  %v8414_v20 = vld [vmem:[%s9944_s20 + $0x320] ss:$16 sps:$4 sm:$0xff]   ;;  %v8422_v5 = vld [vmem:[%s9944_s20 + $0x344] ss:$16 sps:$4 sm:$0xff]  }
 0x3da   : > { %5702 = vmatprep.subr.bf16.mxu0 %v8336_v8  ;;  %6030 = vmatprep.subr.bf16.mxu1 %v8338_v22  ;;  %v8425_v8 = vld [vmem:[%s9944_s20 + $0x34c] ss:$16 sps:$4 sm:$0xff]   ;;  %v8420_v22 = vld [vmem:[%s9944_s20 + $0x340] ss:$16 sps:$4 sm:$0xff]  }
 0x3dd   : > { %5703 = vmatpush1.bf16.msra.mxu0 %v8340_v24  ;;  %6031 = vmatpush1.bf16.msra.mxu1 %v8341_v26  ;;  %v8428_v24 = vld [vmem:[%s9944_s20 + $0x364] ss:$16 sps:$4 sm:$0xff]   ;;  %v8426_v26 = vld [vmem:[%s9944_s20 + $0x360] ss:$16 sps:$4 sm:$0xff]  }
 0x3de   : > { %5704 = vmatprep.subr.bf16.mxu0 %v8342_v27  ;;  %6032 = vmatprep.subr.bf16.mxu1 %v8344_v28  ;;  %v8429_v27 = vld [vmem:[%s9944_s20 + $0x368] ss:$16 sps:$4 sm:$0xff]   ;;  %v8434_v28 = vld [vmem:[%s9944_s20 + $0x384] ss:$16 sps:$4 sm:$0xff]  }
 0x3e1   : > { %5705 = vmatpush1.bf16.msra.mxu0 %v8346_v15  ;;  %6033 = vmatpush1.bf16.msra.mxu1 %v8347_v29  ;;  %v8437_v15 = vld [vmem:[%s9944_s20 + $0x38c] ss:$16 sps:$4 sm:$0xff]   ;;  %v8432_v29 = vld [vmem:[%s9944_s20 + $0x380] ss:$16 sps:$4 sm:$0xff]  }
 0x3e2   : > { %5706 = vmatprep.subr.bf16.mxu0 %v8348_v30  ;;  %6034 = vmatprep.subr.bf16.mxu1 %v8350_v31  ;;  %v8435_v30 = vld [vmem:[%s9944_s20 + $0x388] ss:$16 sps:$4 sm:$0xff]   ;;  %v8440_v31 = vld [vmem:[%s9944_s20 + $0x3a4] ss:$16 sps:$4 sm:$0xff]  }
 0x3e5   : > { %5707 = vmatpush1.bf16.msra.mxu0 %v8352_v32  ;;  %6035 = vmatpush1.bf16.msra.mxu1 %v8353_v33  ;;  %v8443_v32 = vld [vmem:[%s9944_s20 + $0x3ac] ss:$16 sps:$4 sm:$0xff]   ;;  %v8438_v33 = vld [vmem:[%s9944_s20 + $0x3a0] ss:$16 sps:$4 sm:$0xff]  }
 0x3e6   : > { %5708 = vmatprep.subr.bf16.mxu0 %v8354_v34  ;;  %6036 = vmatprep.subr.bf16.mxu1 %v8356_v35  ;;  %v8441_v34 = vld [vmem:[%s9944_s20 + $0x3a8] ss:$16 sps:$4 sm:$0xff]   ;;  %v8446_v35 = vld [vmem:[%s9944_s20 + $0x3c4] ss:$16 sps:$4 sm:$0xff]  }
 0x3e9   : > { %5709 = vmatpush1.bf16.msra.mxu0 %v8358_v36  ;;  %6037 = vmatpush1.bf16.msra.mxu1 %v8359_v37  ;;  %v8449_v36 = vld [vmem:[%s9944_s20 + $0x3cc] ss:$16 sps:$4 sm:$0xff]   ;;  %v3004_v37 = vcombine.high %v10243_v19, %v10243_v19  ;;  %v8453_v19 = vld [vmem:[%s9944_s20 + $0x3e8] ss:$16 sps:$4 sm:$0xff]  }
 0x3ea   : > { %5719 = vmatprep.subr.bf16.mxu0 %v8362_v38  ;;  %6047 = vmatprep.subr.bf16.mxu1 %v8365_v39  ;;  %v8444_v38 = vld [vmem:[%s9944_s20 + $0x3c0] ss:$16 sps:$4 sm:$0xff]   ;;  %v8447_v39 = vld [vmem:[%s9944_s20 + $0x3c8] ss:$16 sps:$4 sm:$0xff]  }
 0x3ec   : > { %5711 = vmatmul.mubr.bf16.vlgmr.msra.gmra.mrb[0].mxu0 %v10270_v41  ;;  %6039 = vmatmul.mubr.bf16.vlgmr.msra.gmra.mrb[0].mxu1 %v10270_v41 }
 0x3ed   : > { %5720 = vmatpush1.bf16.msra.mxu0 %v8360_v40  ;;  %6048 = vmatpush1.bf16.msra.mxu1 %v8363_v42  ;;  %v8452_v40 = vld [vmem:[%s9944_s20 + $0x3e4] ss:$16 sps:$4 sm:$0xff]   ;;  %v8455_v42 = vld [vmem:[%s9944_s20 + $0x3ec] ss:$16 sps:$4 sm:$0xff]  }
 0x3ee   : > { %5721 = vmatprep.subr.bf16.mxu0 %v8368_v43  ;;  %6049 = vmatprep.subr.bf16.mxu1 %v8371_v44  ;;  %v10336_v43 = vrot.slane %v3004_v37, %v10239_v16  ;;  %v8450_v44 = vld [vmem:[%s9944_s20 + $0x3e0] ss:$16 sps:$4 sm:$0xff]   ;;  %v8531_v37 = vld [vmem:[%s9944_s20 + $0x588] ss:$16 sps:$4 sm:$0xff]  }
 0x3ef   : > { %5751 = vmatprep.mubr.bf16.mxu0 %v3051_v45  ;;  %6079 = vmatprep.mubr.bf16.mxu1 %v3051_v45  ;;  %v8458_v45 = vld [vmem:[%s9944_s20 + $0x404] ss:$16 sps:$4 sm:$0xff]  }
 0x3f1   : > { %5722 = vmatpush1.bf16.msra.mxu0 %v8366_v46  ;;  %6050 = vmatpush1.bf16.msra.mxu1 %v8369_v48  ;;  %v8461_v46 = vld [vmem:[%s9944_s20 + $0x40c] ss:$16 sps:$4 sm:$0xff]   ;;  %v3020_v48 = vcombine.high %v10336_v43, %v10336_v43 }
 0x3f2   : > { %5723 = vmatprep.subr.bf16.mxu0 %v8374_v49  ;;  %6051 = vmatprep.subr.bf16.mxu1 %v8377_v50  ;;  %v8456_v49 = vld [vmem:[%s9944_s20 + $0x400] ss:$16 sps:$4 sm:$0xff]   ;;  %v3049_v50 = vcombine.high %v10270_v41, %v10270_v41  ;;  %v8465_v41 = vld [vmem:[%s9944_s20 + $0x428] ss:$16 sps:$4 sm:$0xff]  }
 0x3f5   : > { %5724 = vmatpush1.bf16.msra.mxu0 %v8372_v51  ;;  %6052 = vmatpush1.bf16.msra.mxu1 %v8375_v52  ;;  %v8459_v51 = vld [vmem:[%s9944_s20 + $0x408] ss:$16 sps:$4 sm:$0xff]   ;;  %v8464_v52 = vld [vmem:[%s9944_s20 + $0x424] ss:$16 sps:$4 sm:$0xff]  }
 0x3f6   : > { %5725 = vmatprep.subr.bf16.mxu0 %v8380_v53  ;;  %6053 = vmatprep.subr.bf16.mxu1 %v8383_v54  ;;  %v8467_v53 = vld [vmem:[%s9944_s20 + $0x42c] ss:$16 sps:$4 sm:$0xff]   ;;  %v10351_v54 = vrot.slane %v3020_v48, %v10239_v16  ;;  %v8548_v48 = vld [vmem:[%s9944_s20 + $0x5e4] ss:$16 sps:$4 sm:$0xff]  }
 0x3f9   : > { %5726 = vmatpush1.bf16.msra.mxu0 %v8378_v55  ;;  %6054 = vmatpush1.bf16.msra.mxu1 %v8381_v56  ;;  %v8462_v55 = vld [vmem:[%s9944_s20 + $0x420] ss:$16 sps:$4 sm:$0xff]   ;;  %v8470_v56 = vld [vmem:[%s9944_s20 + $0x444] ss:$16 sps:$4 sm:$0xff]  }
 0x3fa   : > { %5727 = vmatprep.subr.bf16.mxu0 %v8386_v57  ;;  %6055 = vmatprep.subr.bf16.mxu1 %v8389_v58  ;;  %v8473_v57 = vld [vmem:[%s9944_s20 + $0x44c] ss:$16 sps:$4 sm:$0xff]   ;;  %v8468_v58 = vld [vmem:[%s9944_s20 + $0x440] ss:$16 sps:$4 sm:$0xff]  }
 0x3fd   : > { %5728 = vmatpush1.bf16.msra.mxu0 %v8384_v59  ;;  %6056 = vmatpush1.bf16.msra.mxu1 %v8387_v60  ;;  %v8471_v59 = vld [vmem:[%s9944_s20 + $0x448] ss:$16 sps:$4 sm:$0xff]   ;;  %v8476_v60 = vld [vmem:[%s9944_s20 + $0x464] ss:$16 sps:$4 sm:$0xff]  }
 0x3fe   : > { %5729 = vmatprep.subr.bf16.mxu0 %v8392_v61  ;;  %6057 = vmatprep.subr.bf16.mxu1 %v8395_v62  ;;  %v8479_v61 = vld [vmem:[%s9944_s20 + $0x46c] ss:$16 sps:$4 sm:$0xff]   ;;  %v8474_v62 = vld [vmem:[%s9944_s20 + $0x460] ss:$16 sps:$4 sm:$0xff]  }
 0x401   : > { %5730 = vmatpush1.bf16.msra.mxu0 %v8390_v63  ;;  %6058 = vmatpush1.bf16.msra.mxu1 %v8393_v0  ;;  %v8477_v63 = vld [vmem:[%s9944_s20 + $0x468] ss:$16 sps:$4 sm:$0xff]   ;;  %v8482_v0 = vld [vmem:[%s9944_s20 + $0x484] ss:$16 sps:$4 sm:$0xff]  }
 0x402   : > { %5731 = vmatprep.subr.bf16.mxu0 %v8398_v1  ;;  %6059 = vmatprep.subr.bf16.mxu1 %v8401_v2  ;;  %v8485_v1 = vld [vmem:[%s9944_s20 + $0x48c] ss:$16 sps:$4 sm:$0xff]   ;;  %v8480_v2 = vld [vmem:[%s9944_s20 + $0x480] ss:$16 sps:$4 sm:$0xff]  }
 0x405   : > { %5732 = vmatpush1.bf16.msra.mxu0 %v8396_v3  ;;  %6060 = vmatpush1.bf16.msra.mxu1 %v8399_v4  ;;  %v8483_v3 = vld [vmem:[%s9944_s20 + $0x488] ss:$16 sps:$4 sm:$0xff]   ;;  %v8488_v4 = vld [vmem:[%s9944_s20 + $0x4a4] ss:$16 sps:$4 sm:$0xff]  }
 0x406   : > { %5733 = vmatprep.subr.bf16.mxu0 %v8404_v47  ;;  %6061 = vmatprep.subr.bf16.mxu1 %v8407_v6  ;;  %v8491_v47 = vld [vmem:[%s9944_s20 + $0x4ac] ss:$16 sps:$4 sm:$0xff]   ;;  %v8486_v6 = vld [vmem:[%s9944_s20 + $0x4a0] ss:$16 sps:$4 sm:$0xff]  }
 0x409   : > { %5734 = vmatpush1.bf16.msra.mxu0 %v8402_v9  ;;  %6062 = vmatpush1.bf16.msra.mxu1 %v8405_v10  ;;  %v8489_v9 = vld [vmem:[%s9944_s20 + $0x4a8] ss:$16 sps:$4 sm:$0xff]   ;;  %v8494_v10 = vld [vmem:[%s9944_s20 + $0x4c4] ss:$16 sps:$4 sm:$0xff]  }
 0x40a   : > { %5735 = vmatprep.subr.bf16.mxu0 %v8410_v11  ;;  %6063 = vmatprep.subr.bf16.mxu1 %v8413_v12  ;;  %v8497_v11 = vld [vmem:[%s9944_s20 + $0x4cc] ss:$16 sps:$4 sm:$0xff]   ;;  %v8492_v12 = vld [vmem:[%s9944_s20 + $0x4c0] ss:$16 sps:$4 sm:$0xff]  }
 0x40d   : > { %5736 = vmatpush1.bf16.msra.mxu0 %v8408_v13  ;;  %6064 = vmatpush1.bf16.msra.mxu1 %v8411_v14  ;;  %v8495_v13 = vld [vmem:[%s9944_s20 + $0x4c8] ss:$16 sps:$4 sm:$0xff]   ;;  %v8500_v14 = vld [vmem:[%s9944_s20 + $0x4e4] ss:$16 sps:$4 sm:$0xff]  }
 0x40e   : > { %5737 = vmatprep.subr.bf16.mxu0 %v8416_v17  ;;  %6065 = vmatprep.subr.bf16.mxu1 %v8419_v18  ;;  %v8503_v17 = vld [vmem:[%s9944_s20 + $0x4ec] ss:$16 sps:$4 sm:$0xff]   ;;  %v8498_v18 = vld [vmem:[%s9944_s20 + $0x4e0] ss:$16 sps:$4 sm:$0xff]  }
 0x411   : > { %5738 = vmatpush1.bf16.msra.mxu0 %v8414_v20  ;;  %6066 = vmatpush1.bf16.msra.mxu1 %v8417_v21  ;;  %v8501_v20 = vld [vmem:[%s9944_s20 + $0x4e8] ss:$16 sps:$4 sm:$0xff]   ;;  %v8506_v21 = vld [vmem:[%s9944_s20 + $0x504] ss:$16 sps:$4 sm:$0xff]  }
 0x412   : > { %5739 = vmatprep.subr.bf16.mxu0 %v8422_v5  ;;  %6067 = vmatprep.subr.bf16.mxu1 %v8425_v8  ;;  %v8509_v5 = vld [vmem:[%s9944_s20 + $0x50c] ss:$16 sps:$4 sm:$0xff]   ;;  %v8504_v8 = vld [vmem:[%s9944_s20 + $0x500] ss:$16 sps:$4 sm:$0xff]  }
 0x415   : > { %5740 = vmatpush1.bf16.msra.mxu0 %v8420_v22  ;;  %6068 = vmatpush1.bf16.msra.mxu1 %v8423_v23  ;;  %v8507_v22 = vld [vmem:[%s9944_s20 + $0x508] ss:$16 sps:$4 sm:$0xff]   ;;  %v8512_v23 = vld [vmem:[%s9944_s20 + $0x524] ss:$16 sps:$4 sm:$0xff]  }
 0x416   : > { %5741 = vmatprep.subr.bf16.mxu0 %v8428_v24  ;;  %6069 = vmatprep.subr.bf16.mxu1 %v8431_v25  ;;  %v8515_v24 = vld [vmem:[%s9944_s20 + $0x52c] ss:$16 sps:$4 sm:$0xff]   ;;  %v8510_v25 = vld [vmem:[%s9944_s20 + $0x520] ss:$16 sps:$4 sm:$0xff]  }
 0x419   : > { %5742 = vmatpush1.bf16.msra.mxu0 %v8426_v26  ;;  %6070 = vmatpush1.bf16.msra.mxu1 %v8429_v27  ;;  %v8513_v26 = vld [vmem:[%s9944_s20 + $0x528] ss:$16 sps:$4 sm:$0xff]   ;;  %v8518_v27 = vld [vmem:[%s9944_s20 + $0x544] ss:$16 sps:$4 sm:$0xff]  }
 0x41a   : > { %5743 = vmatprep.subr.bf16.mxu0 %v8434_v28  ;;  %6071 = vmatprep.subr.bf16.mxu1 %v8437_v15  ;;  %v8521_v28 = vld [vmem:[%s9944_s20 + $0x54c] ss:$16 sps:$4 sm:$0xff]   ;;  %v8516_v15 = vld [vmem:[%s9944_s20 + $0x540] ss:$16 sps:$4 sm:$0xff]  }
 0x41d   : > { %5744 = vmatpush1.bf16.msra.mxu0 %v8432_v29  ;;  %6072 = vmatpush1.bf16.msra.mxu1 %v8435_v30  ;;  %v8519_v29 = vld [vmem:[%s9944_s20 + $0x548] ss:$16 sps:$4 sm:$0xff]   ;;  %v8524_v30 = vld [vmem:[%s9944_s20 + $0x564] ss:$16 sps:$4 sm:$0xff]  }
 0x41e   : > { %5745 = vmatprep.subr.bf16.mxu0 %v8440_v31  ;;  %6073 = vmatprep.subr.bf16.mxu1 %v8443_v32  ;;  %v8527_v31 = vld [vmem:[%s9944_s20 + $0x56c] ss:$16 sps:$4 sm:$0xff]   ;;  %v8522_v32 = vld [vmem:[%s9944_s20 + $0x560] ss:$16 sps:$4 sm:$0xff]  }
 0x421   : > { %5746 = vmatpush1.bf16.msra.mxu0 %v8438_v33  ;;  %6074 = vmatpush1.bf16.msra.mxu1 %v8441_v34  ;;  %v8525_v33 = vld [vmem:[%s9944_s20 + $0x568] ss:$16 sps:$4 sm:$0xff]   ;;  %v8530_v34 = vld [vmem:[%s9944_s20 + $0x584] ss:$16 sps:$4 sm:$0xff]  }
 0x422   : > { %5747 = vmatprep.subr.bf16.mxu0 %v8446_v35  ;;  %6075 = vmatprep.subr.bf16.mxu1 %v8449_v36  ;;  %v8533_v35 = vld [vmem:[%s9944_s20 + $0x58c] ss:$16 sps:$4 sm:$0xff]   ;;  %v8528_v36 = vld [vmem:[%s9944_s20 + $0x580] ss:$16 sps:$4 sm:$0xff]  }
 0x425   : > { %5748 = vmatpush1.bf16.msra.mxu0 %v8444_v38  ;;  %6076 = vmatpush1.bf16.msra.mxu1 %v8447_v39  ;;  %v8536_v38 = vld [vmem:[%s9944_s20 + $0x5a4] ss:$16 sps:$4 sm:$0xff]   ;;  %v8539_v39 = vld [vmem:[%s9944_s20 + $0x5ac] ss:$16 sps:$4 sm:$0xff]  }
 0x426   : > { %5749 = vmatprep.subr.bf16.mxu0 %v8452_v40  ;;  %6077 = vmatprep.subr.bf16.mxu1 %v8455_v42  ;;  %v8534_v40 = vld [vmem:[%s9944_s20 + $0x5a0] ss:$16 sps:$4 sm:$0xff]   ;;  %v8537_v42 = vld [vmem:[%s9944_s20 + $0x5a8] ss:$16 sps:$4 sm:$0xff]  }
 0x429   : > { %5750 = vmatpush1.bf16.msra.mxu0 %v8450_v44  ;;  %6078 = vmatpush1.bf16.msra.mxu1 %v8453_v19  ;;  %v8542_v44 = vld [vmem:[%s9944_s20 + $0x5c4] ss:$16 sps:$4 sm:$0xff]   ;;  %v8545_v19 = vld [vmem:[%s9944_s20 + $0x5cc] ss:$16 sps:$4 sm:$0xff]  }
 0x42a   : > { %5760 = vmatprep.subr.bf16.mxu0 %v8458_v45  ;;  %6088 = vmatprep.subr.bf16.mxu1 %v8461_v46  ;;  %v8540_v45 = vld [vmem:[%s9944_s20 + $0x5c0] ss:$16 sps:$4 sm:$0xff]   ;;  %v8543_v46 = vld [vmem:[%s9944_s20 + $0x5c8] ss:$16 sps:$4 sm:$0xff]  }
 0x42c   : > { %5752 = vmatmul.mubr.bf16.vlgmr.msra.gmra.mrb[0].mxu0 %v3049_v50  ;;  %6080 = vmatmul.mubr.bf16.vlgmr.msra.gmra.mrb[0].mxu1 %v3049_v50  ;;  %v8546_v50 = vld [vmem:[%s9944_s20 + $0x5e0] ss:$16 sps:$4 sm:$0xff]  }
 0x42d   : > { %5761 = vmatpush1.bf16.msra.mxu0 %v8456_v49  ;;  %6089 = vmatpush1.bf16.msra.mxu1 %v8459_v51  ;;  %v8551_v49 = vld [vmem:[%s9944_s20 + $0x5ec] ss:$16 sps:$4 sm:$0xff]   ;;  %v8549_v51 = vld [vmem:[%s9944_s20 + $0x5e8] ss:$16 sps:$4 sm:$0xff]  }
 0x42e   : > { %5762 = vmatprep.subr.bf16.mxu0 %v8464_v52  ;;  %6090 = vmatprep.subr.bf16.mxu1 %v8467_v53  ;;  %v8555_v52 = vld [vmem:[%s9944_s20 + $0x604] ss:$16 sps:$4 sm:$0xff]   ;;  %v8558_v53 = vld [vmem:[%s9944_s20 + $0x60c] ss:$16 sps:$4 sm:$0xff]  }
 0x42f   : > { %5792 = vmatprep.mubr.bf16.mxu0 %v10351_v54  ;;  %6120 = vmatprep.mubr.bf16.mxu1 %v10351_v54 }
 0x431   : > { %5763 = vmatpush1.bf16.msra.mxu0 %v8462_v55  ;;  %6091 = vmatpush1.bf16.msra.mxu1 %v8465_v41  ;;  %v8553_v55 = vld [vmem:[%s9944_s20 + $0x600] ss:$16 sps:$4 sm:$0xff]   ;;  %v10418_v41 = vrot.slane %v10336_v43, %v10239_v16 }
 0x432   : > { %5764 = vmatprep.subr.bf16.mxu0 %v8470_v56  ;;  %6092 = vmatprep.subr.bf16.mxu1 %v8473_v57  ;;  %v8556_v56 = vld [vmem:[%s9944_s20 + $0x608] ss:$16 sps:$4 sm:$0xff]   ;;  %v8561_v57 = vld [vmem:[%s9944_s20 + $0x624] ss:$16 sps:$4 sm:$0xff]   ;;  %v8559_v43 = vld [vmem:[%s9944_s20 + $0x620] ss:$16 sps:$4 sm:$0xff]  }
 0x435   : > { %5765 = vmatpush1.bf16.msra.mxu0 %v8468_v58  ;;  %6093 = vmatpush1.bf16.msra.mxu1 %v8471_v59  ;;  %v8564_v58 = vld [vmem:[%s9944_s20 + $0x62c] ss:$16 sps:$4 sm:$0xff]   ;;  %v3052_v59 = vcombine.high %v10351_v54, %v10351_v54  ;;  %v8565_v54 = vld [vmem:[%s9944_s20 + $0x640] ss:$16 sps:$4 sm:$0xff]  }
 0x436   : > { %5766 = vmatprep.subr.bf16.mxu0 %v8476_v60  ;;  %6094 = vmatprep.subr.bf16.mxu1 %v8479_v61  ;;  %v8562_v60 = vld [vmem:[%s9944_s20 + $0x628] ss:$16 sps:$4 sm:$0xff]   ;;  %v8567_v61 = vld [vmem:[%s9944_s20 + $0x644] ss:$16 sps:$4 sm:$0xff]  }
 0x439   : > { %5767 = vmatpush1.bf16.msra.mxu0 %v8474_v62  ;;  %6095 = vmatpush1.bf16.msra.mxu1 %v8477_v63  ;;  %v8570_v62 = vld [vmem:[%s9944_s20 + $0x64c] ss:$16 sps:$4 sm:$0xff]   ;;  %v8568_v63 = vld [vmem:[%s9944_s20 + $0x648] ss:$16 sps:$4 sm:$0xff]  }
 0x43a   : > { %5768 = vmatprep.subr.bf16.mxu0 %v8482_v0  ;;  %6096 = vmatprep.subr.bf16.mxu1 %v8485_v1  ;;  %v8573_v0 = vld [vmem:[%s9944_s20 + $0x664] ss:$16 sps:$4 sm:$0xff]   ;;  %v8576_v1 = vld [vmem:[%s9944_s20 + $0x66c] ss:$16 sps:$4 sm:$0xff]  }
 0x43d   : > { %5769 = vmatpush1.bf16.msra.mxu0 %v8480_v2  ;;  %6097 = vmatpush1.bf16.msra.mxu1 %v8483_v3  ;;  %v8571_v2 = vld [vmem:[%s9944_s20 + $0x660] ss:$16 sps:$4 sm:$0xff]   ;;  %v8574_v3 = vld [vmem:[%s9944_s20 + $0x668] ss:$16 sps:$4 sm:$0xff]  }
 0x43e   : > { %5770 = vmatprep.subr.bf16.mxu0 %v8488_v4  ;;  %6098 = vmatprep.subr.bf16.mxu1 %v8491_v47  ;;  %v8579_v4 = vld [vmem:[%s9944_s20 + $0x684] ss:$16 sps:$4 sm:$0xff]   ;;  %v8582_v47 = vld [vmem:[%s9944_s20 + $0x68c] ss:$16 sps:$4 sm:$0xff]  }
 0x441   : > { %5771 = vmatpush1.bf16.msra.mxu0 %v8486_v6  ;;  %6099 = vmatpush1.bf16.msra.mxu1 %v8489_v9  ;;  %v8577_v6 = vld [vmem:[%s9944_s20 + $0x680] ss:$16 sps:$4 sm:$0xff]   ;;  %v8580_v9 = vld [vmem:[%s9944_s20 + $0x688] ss:$16 sps:$4 sm:$0xff]  }
 0x442   : > { %5772 = vmatprep.subr.bf16.mxu0 %v8494_v10  ;;  %6100 = vmatprep.subr.bf16.mxu1 %v8497_v11  ;;  %v8585_v10 = vld [vmem:[%s9944_s20 + $0x6a4] ss:$16 sps:$4 sm:$0xff]   ;;  %v8588_v11 = vld [vmem:[%s9944_s20 + $0x6ac] ss:$16 sps:$4 sm:$0xff]  }
 0x445   : > { %5773 = vmatpush1.bf16.msra.mxu0 %v8492_v12  ;;  %6101 = vmatpush1.bf16.msra.mxu1 %v8495_v13  ;;  %v8583_v12 = vld [vmem:[%s9944_s20 + $0x6a0] ss:$16 sps:$4 sm:$0xff]   ;;  %v8586_v13 = vld [vmem:[%s9944_s20 + $0x6a8] ss:$16 sps:$4 sm:$0xff]  }
 0x446   : > { %5774 = vmatprep.subr.bf16.mxu0 %v8500_v14  ;;  %6102 = vmatprep.subr.bf16.mxu1 %v8503_v17  ;;  %v8591_v14 = vld [vmem:[%s9944_s20 + $0x6c4] ss:$16 sps:$4 sm:$0xff]   ;;  %v8594_v17 = vld [vmem:[%s9944_s20 + $0x6cc] ss:$16 sps:$4 sm:$0xff]  }
 0x449   : > { %5775 = vmatpush1.bf16.msra.mxu0 %v8498_v18  ;;  %6103 = vmatpush1.bf16.msra.mxu1 %v8501_v20  ;;  %v8589_v18 = vld [vmem:[%s9944_s20 + $0x6c0] ss:$16 sps:$4 sm:$0xff]   ;;  %v8592_v20 = vld [vmem:[%s9944_s20 + $0x6c8] ss:$16 sps:$4 sm:$0xff]  }
 0x44a   : > { %5776 = vmatprep.subr.bf16.mxu0 %v8506_v21  ;;  %6104 = vmatprep.subr.bf16.mxu1 %v8509_v5  ;;  %v8597_v21 = vld [vmem:[%s9944_s20 + $0x6e4] ss:$16 sps:$4 sm:$0xff]   ;;  %v8600_v5 = vld [vmem:[%s9944_s20 + $0x6ec] ss:$16 sps:$4 sm:$0xff]  }
 0x44d   : > { %5777 = vmatpush1.bf16.msra.mxu0 %v8504_v8  ;;  %6105 = vmatpush1.bf16.msra.mxu1 %v8507_v22  ;;  %v8595_v8 = vld [vmem:[%s9944_s20 + $0x6e0] ss:$16 sps:$4 sm:$0xff]   ;;  %v8598_v22 = vld [vmem:[%s9944_s20 + $0x6e8] ss:$16 sps:$4 sm:$0xff]  }
 0x44e   : > { %5778 = vmatprep.subr.bf16.mxu0 %v8512_v23  ;;  %6106 = vmatprep.subr.bf16.mxu1 %v8515_v24  ;;  %v8603_v23 = vld [vmem:[%s9944_s20 + $0x704] ss:$16 sps:$4 sm:$0xff]   ;;  %v8606_v24 = vld [vmem:[%s9944_s20 + $0x70c] ss:$16 sps:$4 sm:$0xff]  }
 0x451   : > { %5779 = vmatpush1.bf16.msra.mxu0 %v8510_v25  ;;  %6107 = vmatpush1.bf16.msra.mxu1 %v8513_v26  ;;  %v8601_v25 = vld [vmem:[%s9944_s20 + $0x700] ss:$16 sps:$4 sm:$0xff]   ;;  %v8604_v26 = vld [vmem:[%s9944_s20 + $0x708] ss:$16 sps:$4 sm:$0xff]  }
 0x452   : > { %5780 = vmatprep.subr.bf16.mxu0 %v8518_v27  ;;  %6108 = vmatprep.subr.bf16.mxu1 %v8521_v28  ;;  %v8609_v27 = vld [vmem:[%s9944_s20 + $0x724] ss:$16 sps:$4 sm:$0xff]   ;;  %v8612_v28 = vld [vmem:[%s9944_s20 + $0x72c] ss:$16 sps:$4 sm:$0xff]  }
 0x455   : > { %5781 = vmatpush1.bf16.msra.mxu0 %v8516_v15  ;;  %6109 = vmatpush1.bf16.msra.mxu1 %v8519_v29  ;;  %v8607_v15 = vld [vmem:[%s9944_s20 + $0x720] ss:$16 sps:$4 sm:$0xff]   ;;  %v8610_v29 = vld [vmem:[%s9944_s20 + $0x728] ss:$16 sps:$4 sm:$0xff]  }
 0x456   : > { %5782 = vmatprep.subr.bf16.mxu0 %v8524_v30  ;;  %6110 = vmatprep.subr.bf16.mxu1 %v8527_v31  ;;  %v8615_v30 = vld [vmem:[%s9944_s20 + $0x744] ss:$16 sps:$4 sm:$0xff]   ;;  %v8618_v31 = vld [vmem:[%s9944_s20 + $0x74c] ss:$16 sps:$4 sm:$0xff]  }
 0x459   : > { %5783 = vmatpush1.bf16.msra.mxu0 %v8522_v32  ;;  %6111 = vmatpush1.bf16.msra.mxu1 %v8525_v33  ;;  %v8613_v32 = vld [vmem:[%s9944_s20 + $0x740] ss:$16 sps:$4 sm:$0xff]   ;;  %v8616_v33 = vld [vmem:[%s9944_s20 + $0x748] ss:$16 sps:$4 sm:$0xff]  }
 0x45a   : > { %5784 = vmatprep.subr.bf16.mxu0 %v8530_v34  ;;  %6112 = vmatprep.subr.bf16.mxu1 %v8533_v35  ;;  %v8621_v34 = vld [vmem:[%s9944_s20 + $0x764] ss:$16 sps:$4 sm:$0xff]   ;;  %v8624_v35 = vld [vmem:[%s9944_s20 + $0x76c] ss:$16 sps:$4 sm:$0xff]  }
 0x45d   : > { %5785 = vmatpush1.bf16.msra.mxu0 %v8528_v36  ;;  %6113 = vmatpush1.bf16.msra.mxu1 %v8531_v37  ;;  %v8619_v36 = vld [vmem:[%s9944_s20 + $0x760] ss:$16 sps:$4 sm:$0xff]   ;;  %v8622_v37 = vld [vmem:[%s9944_s20 + $0x768] ss:$16 sps:$4 sm:$0xff]  }
 0x45e   : > { %5786 = vmatprep.subr.bf16.mxu0 %v8536_v38  ;;  %6114 = vmatprep.subr.bf16.mxu1 %v8539_v39  ;;  %v8627_v38 = vld [vmem:[%s9944_s20 + $0x784] ss:$16 sps:$4 sm:$0xff]   ;;  %v8630_v39 = vld [vmem:[%s9944_s20 + $0x78c] ss:$16 sps:$4 sm:$0xff]  }
 0x461   : > { %5787 = vmatpush1.bf16.msra.mxu0 %v8534_v40  ;;  %6115 = vmatpush1.bf16.msra.mxu1 %v8537_v42  ;;  %v8625_v40 = vld [vmem:[%s9944_s20 + $0x780] ss:$16 sps:$4 sm:$0xff]   ;;  %v8628_v42 = vld [vmem:[%s9944_s20 + $0x788] ss:$16 sps:$4 sm:$0xff]  }
 0x462   : > { %5788 = vmatprep.subr.bf16.mxu0 %v8542_v44  ;;  %6116 = vmatprep.subr.bf16.mxu1 %v8545_v19  ;;  %v8633_v44 = vld [vmem:[%s9944_s20 + $0x7a4] ss:$16 sps:$4 sm:$0xff]   ;;  %v8636_v19 = vld [vmem:[%s9944_s20 + $0x7ac] ss:$16 sps:$4 sm:$0xff]  }
 0x465   : > { %5789 = vmatpush1.bf16.msra.mxu0 %v8540_v45  ;;  %6117 = vmatpush1.bf16.msra.mxu1 %v8543_v46  ;;  %v8631_v45 = vld [vmem:[%s9944_s20 + $0x7a0] ss:$16 sps:$4 sm:$0xff]   ;;  %v8634_v46 = vld [vmem:[%s9944_s20 + $0x7a8] ss:$16 sps:$4 sm:$0xff]  }
 0x466   : > { %5790 = vmatprep.subr.bf16.mxu0 %v8548_v48  ;;  %6118 = vmatprep.subr.bf16.mxu1 %v8551_v49  ;;  %v8639_v48 = vld [vmem:[%s9944_s20 + $0x7c4] ss:$16 sps:$4 sm:$0xff]   ;;  %v8642_v49 = vld [vmem:[%s9944_s20 + $0x7cc] ss:$16 sps:$4 sm:$0xff]  }
 0x469   : > { %5791 = vmatpush1.bf16.msra.mxu0 %v8546_v50  ;;  %6119 = vmatpush1.bf16.msra.mxu1 %v8549_v51  ;;  %v10479_v50 = vld [vmem:[#allocation2 + $0x8] sm:$0xff] }
 0x46a   : > { %5801 = vmatprep.subr.bf16.mxu0 %v8555_v52  ;;  %6129 = vmatprep.subr.bf16.mxu1 %v8558_v53  ;;  %v8637_v51 = vld [vmem:[%s9944_s20 + $0x7c0] ss:$16 sps:$4 sm:$0xff]   ;;  %v8640_v52 = vld [vmem:[%s9944_s20 + $0x7c8] ss:$16 sps:$4 sm:$0xff]   ;;  %v8645_v53 = vld [vmem:[%s9944_s20 + $0x7e4] ss:$16 sps:$4 sm:$0xff]  }
 0x46c   : > { %5793 = vmatmul.mubr.bf16.vlgmr.msra.gmra.mrb[0].mxu0 %v10418_v41  ;;  %6121 = vmatmul.mubr.bf16.vlgmr.msra.gmra.mrb[0].mxu1 %v10418_v41 }
 0x46d   : > { %5802 = vmatpush1.bf16.msra.mxu0 %v8553_v55  ;;  %6130 = vmatpush1.bf16.msra.mxu1 %v8556_v56  ;;  %v8648_v55 = vld [vmem:[%s9944_s20 + $0x7ec] ss:$16 sps:$4 sm:$0xff]   ;;  %v10487_v56 = vrot.slane %v10479_v50, %v10239_v16 }
 0x46e   : > { %5803 = vmatprep.subr.bf16.mxu0 %v8561_v57  ;;  %6131 = vmatprep.subr.bf16.mxu1 %v8564_v58  ;;  %v8643_v57 = vld [vmem:[%s9944_s20 + $0x7e0] ss:$16 sps:$4 sm:$0xff]   ;;  %v8646_v58 = vld [vmem:[%s9944_s20 + $0x7e8] ss:$16 sps:$4 sm:$0xff]  }
 0x46f   : > { %5833 = vmatprep.mubr.bf16.mxu0 %v3052_v59  ;;  %6161 = vmatprep.mubr.bf16.mxu1 %v3052_v59  ;;  %v8651_v59 = vld [vmem:[%s9944_s20 + $0x804] ss:$16 sps:$4 sm:$0xff]  }
 0x471   : > { %5804 = vmatpush1.bf16.msra.mxu0 %v8559_v43  ;;  %6132 = vmatpush1.bf16.msra.mxu1 %v8562_v60  ;;  %v8654_v43 = vld [vmem:[%s9944_s20 + $0x80c] ss:$16 sps:$4 sm:$0xff]   ;;  %v3068_v60 = vcombine.high %v10487_v56, %v10487_v56 }
 0x472   : > { %5805 = vmatprep.subr.bf16.mxu0 %v8567_v61  ;;  %6133 = vmatprep.subr.bf16.mxu1 %v8570_v62  ;;  %v3050_v61 = vcombine.high %v10418_v41, %v10418_v41  ;;  %v8649_v62 = vld [vmem:[%s9944_s20 + $0x800] ss:$16 sps:$4 sm:$0xff]  }
 0x473   : > { %v8655_v41 = vld [vmem:[%s9944_s20 + $0x820] ss:$16 sps:$4 sm:$0xff]  }
 0x475   : > { %5806 = vmatpush1.bf16.msra.mxu0 %v8565_v54  ;;  %6134 = vmatpush1.bf16.msra.mxu1 %v8568_v63  ;;  %v8652_v54 = vld [vmem:[%s9944_s20 + $0x808] ss:$16 sps:$4 sm:$0xff]   ;;  %v8657_v63 = vld [vmem:[%s9944_s20 + $0x824] ss:$16 sps:$4 sm:$0xff]  }
 0x476   : > { %5807 = vmatprep.subr.bf16.mxu0 %v8573_v0  ;;  %6135 = vmatprep.subr.bf16.mxu1 %v8576_v1  ;;  %v8660_v0 = vld [vmem:[%s9944_s20 + $0x82c] ss:$16 sps:$4 sm:$0xff]   ;;  %v10502_v1 = vrot.slane %v3068_v60, %v10239_v16  ;;  %v8736_v60 = vld [vmem:[%s9944_s20 + $0x9c8] ss:$16 sps:$4 sm:$0xff]  }
 0x479   : > { %5808 = vmatpush1.bf16.msra.mxu0 %v8571_v2  ;;  %6136 = vmatpush1.bf16.msra.mxu1 %v8574_v3  ;;  %v8658_v2 = vld [vmem:[%s9944_s20 + $0x828] ss:$16 sps:$4 sm:$0xff]   ;;  %v8663_v3 = vld [vmem:[%s9944_s20 + $0x844] ss:$16 sps:$4 sm:$0xff]  }
 0x47a   : > { %5809 = vmatprep.subr.bf16.mxu0 %v8579_v4  ;;  %6137 = vmatprep.subr.bf16.mxu1 %v8582_v47  ;;  %v8666_v4 = vld [vmem:[%s9944_s20 + $0x84c] ss:$16 sps:$4 sm:$0xff]   ;;  %v8661_v47 = vld [vmem:[%s9944_s20 + $0x840] ss:$16 sps:$4 sm:$0xff]  }
 0x47d   : > { %5810 = vmatpush1.bf16.msra.mxu0 %v8577_v6  ;;  %6138 = vmatpush1.bf16.msra.mxu1 %v8580_v9  ;;  %v8664_v6 = vld [vmem:[%s9944_s20 + $0x848] ss:$16 sps:$4 sm:$0xff]   ;;  %v8669_v9 = vld [vmem:[%s9944_s20 + $0x864] ss:$16 sps:$4 sm:$0xff]  }
 0x47e   : > { %5811 = vmatprep.subr.bf16.mxu0 %v8585_v10  ;;  %6139 = vmatprep.subr.bf16.mxu1 %v8588_v11  ;;  %v8672_v10 = vld [vmem:[%s9944_s20 + $0x86c] ss:$16 sps:$4 sm:$0xff]   ;;  %v8667_v11 = vld [vmem:[%s9944_s20 + $0x860] ss:$16 sps:$4 sm:$0xff]  }
 0x481   : > { %5812 = vmatpush1.bf16.msra.mxu0 %v8583_v12  ;;  %6140 = vmatpush1.bf16.msra.mxu1 %v8586_v13  ;;  %v8670_v12 = vld [vmem:[%s9944_s20 + $0x868] ss:$16 sps:$4 sm:$0xff]   ;;  %v8675_v13 = vld [vmem:[%s9944_s20 + $0x884] ss:$16 sps:$4 sm:$0xff]  }
 0x482   : > { %5813 = vmatprep.subr.bf16.mxu0 %v8591_v14  ;;  %6141 = vmatprep.subr.bf16.mxu1 %v8594_v17  ;;  %v8678_v14 = vld [vmem:[%s9944_s20 + $0x88c] ss:$16 sps:$4 sm:$0xff]   ;;  %v8673_v17 = vld [vmem:[%s9944_s20 + $0x880] ss:$16 sps:$4 sm:$0xff]  }
 0x485   : > { %5814 = vmatpush1.bf16.msra.mxu0 %v8589_v18  ;;  %6142 = vmatpush1.bf16.msra.mxu1 %v8592_v20  ;;  %v8676_v18 = vld [vmem:[%s9944_s20 + $0x888] ss:$16 sps:$4 sm:$0xff]   ;;  %v8681_v20 = vld [vmem:[%s9944_s20 + $0x8a4] ss:$16 sps:$4 sm:$0xff]  }
 0x486   : > { %5815 = vmatprep.subr.bf16.mxu0 %v8597_v21  ;;  %6143 = vmatprep.subr.bf16.mxu1 %v8600_v5  ;;  %v8684_v21 = vld [vmem:[%s9944_s20 + $0x8ac] ss:$16 sps:$4 sm:$0xff]   ;;  %v8679_v5 = vld [vmem:[%s9944_s20 + $0x8a0] ss:$16 sps:$4 sm:$0xff]  }
 0x489   : > { %5816 = vmatpush1.bf16.msra.mxu0 %v8595_v8  ;;  %6144 = vmatpush1.bf16.msra.mxu1 %v8598_v22  ;;  %v8682_v8 = vld [vmem:[%s9944_s20 + $0x8a8] ss:$16 sps:$4 sm:$0xff]   ;;  %v8687_v22 = vld [vmem:[%s9944_s20 + $0x8c4] ss:$16 sps:$4 sm:$0xff]  }
 0x48a   : > { %5817 = vmatprep.subr.bf16.mxu0 %v8603_v23  ;;  %6145 = vmatprep.subr.bf16.mxu1 %v8606_v24  ;;  %v8690_v23 = vld [vmem:[%s9944_s20 + $0x8cc] ss:$16 sps:$4 sm:$0xff]   ;;  %v8685_v24 = vld [vmem:[%s9944_s20 + $0x8c0] ss:$16 sps:$4 sm:$0xff]  }
 0x48d   : > { %5818 = vmatpush1.bf16.msra.mxu0 %v8601_v25  ;;  %6146 = vmatpush1.bf16.msra.mxu1 %v8604_v26  ;;  %v8688_v25 = vld [vmem:[%s9944_s20 + $0x8c8] ss:$16 sps:$4 sm:$0xff]   ;;  %v8693_v26 = vld [vmem:[%s9944_s20 + $0x8e4] ss:$16 sps:$4 sm:$0xff]  }
 0x48e   : > { %5819 = vmatprep.subr.bf16.mxu0 %v8609_v27  ;;  %6147 = vmatprep.subr.bf16.mxu1 %v8612_v28  ;;  %v8696_v27 = vld [vmem:[%s9944_s20 + $0x8ec] ss:$16 sps:$4 sm:$0xff]   ;;  %v8691_v28 = vld [vmem:[%s9944_s20 + $0x8e0] ss:$16 sps:$4 sm:$0xff]  }
 0x491   : > { %5820 = vmatpush1.bf16.msra.mxu0 %v8607_v15  ;;  %6148 = vmatpush1.bf16.msra.mxu1 %v8610_v29  ;;  %v8694_v15 = vld [vmem:[%s9944_s20 + $0x8e8] ss:$16 sps:$4 sm:$0xff]   ;;  %v8699_v29 = vld [vmem:[%s9944_s20 + $0x904] ss:$16 sps:$4 sm:$0xff]  }
 0x492   : > { %5821 = vmatprep.subr.bf16.mxu0 %v8615_v30  ;;  %6149 = vmatprep.subr.bf16.mxu1 %v8618_v31  ;;  %v8702_v30 = vld [vmem:[%s9944_s20 + $0x90c] ss:$16 sps:$4 sm:$0xff]   ;;  %v8697_v31 = vld [vmem:[%s9944_s20 + $0x900] ss:$16 sps:$4 sm:$0xff]  }
 0x495   : > { %5822 = vmatpush1.bf16.msra.mxu0 %v8613_v32  ;;  %6150 = vmatpush1.bf16.msra.mxu1 %v8616_v33  ;;  %v8700_v32 = vld [vmem:[%s9944_s20 + $0x908] ss:$16 sps:$4 sm:$0xff]   ;;  %v8705_v33 = vld [vmem:[%s9944_s20 + $0x924] ss:$16 sps:$4 sm:$0xff]  }
 0x496   : > { %5823 = vmatprep.subr.bf16.mxu0 %v8621_v34  ;;  %6151 = vmatprep.subr.bf16.mxu1 %v8624_v35  ;;  %v8708_v34 = vld [vmem:[%s9944_s20 + $0x92c] ss:$16 sps:$4 sm:$0xff]   ;;  %v8703_v35 = vld [vmem:[%s9944_s20 + $0x920] ss:$16 sps:$4 sm:$0xff]  }
 0x499   : > { %5824 = vmatpush1.bf16.msra.mxu0 %v8619_v36  ;;  %6152 = vmatpush1.bf16.msra.mxu1 %v8622_v37  ;;  %v8706_v36 = vld [vmem:[%s9944_s20 + $0x928] ss:$16 sps:$4 sm:$0xff]   ;;  %v8711_v37 = vld [vmem:[%s9944_s20 + $0x944] ss:$16 sps:$4 sm:$0xff]  }
 0x49a   : > { %5825 = vmatprep.subr.bf16.mxu0 %v8627_v38  ;;  %6153 = vmatprep.subr.bf16.mxu1 %v8630_v39  ;;  %v8714_v38 = vld [vmem:[%s9944_s20 + $0x94c] ss:$16 sps:$4 sm:$0xff]   ;;  %v8709_v39 = vld [vmem:[%s9944_s20 + $0x940] ss:$16 sps:$4 sm:$0xff]  }
 0x49d   : > { %5826 = vmatpush1.bf16.msra.mxu0 %v8625_v40  ;;  %6154 = vmatpush1.bf16.msra.mxu1 %v8628_v42  ;;  %v8712_v40 = vld [vmem:[%s9944_s20 + $0x948] ss:$16 sps:$4 sm:$0xff]   ;;  %v8717_v42 = vld [vmem:[%s9944_s20 + $0x964] ss:$16 sps:$4 sm:$0xff]  }
 0x49e   : > { %5827 = vmatprep.subr.bf16.mxu0 %v8633_v44  ;;  %6155 = vmatprep.subr.bf16.mxu1 %v8636_v19  ;;  %v8720_v44 = vld [vmem:[%s9944_s20 + $0x96c] ss:$16 sps:$4 sm:$0xff]   ;;  %v8715_v19 = vld [vmem:[%s9944_s20 + $0x960] ss:$16 sps:$4 sm:$0xff]  }
 0x4a1   : > { %5828 = vmatpush1.bf16.msra.mxu0 %v8631_v45  ;;  %6156 = vmatpush1.bf16.msra.mxu1 %v8634_v46  ;;  %v8718_v45 = vld [vmem:[%s9944_s20 + $0x968] ss:$16 sps:$4 sm:$0xff]   ;;  %v8723_v46 = vld [vmem:[%s9944_s20 + $0x984] ss:$16 sps:$4 sm:$0xff]  }
 0x4a2   : > { %5829 = vmatprep.subr.bf16.mxu0 %v8639_v48  ;;  %6157 = vmatprep.subr.bf16.mxu1 %v8642_v49  ;;  %v8726_v48 = vld [vmem:[%s9944_s20 + $0x98c] ss:$16 sps:$4 sm:$0xff]   ;;  %v8721_v49 = vld [vmem:[%s9944_s20 + $0x980] ss:$16 sps:$4 sm:$0xff]  }
 0x4a5   : > { %5830 = vmatpush1.bf16.msra.mxu0 %v8637_v51  ;;  %6158 = vmatpush1.bf16.msra.mxu1 %v8640_v52  ;;  %v8724_v51 = vld [vmem:[%s9944_s20 + $0x988] ss:$16 sps:$4 sm:$0xff]   ;;  %v8729_v52 = vld [vmem:[%s9944_s20 + $0x9a4] ss:$16 sps:$4 sm:$0xff]  }
 0x4a6   : > { %5831 = vmatprep.subr.bf16.mxu0 %v8645_v53  ;;  %6159 = vmatprep.subr.bf16.mxu1 %v8648_v55  ;;  %v8732_v53 = vld [vmem:[%s9944_s20 + $0x9ac] ss:$16 sps:$4 sm:$0xff]   ;;  %v8727_v55 = vld [vmem:[%s9944_s20 + $0x9a0] ss:$16 sps:$4 sm:$0xff]  }
 0x4a9   : > { %5832 = vmatpush1.bf16.msra.mxu0 %v8643_v57  ;;  %6160 = vmatpush1.bf16.msra.mxu1 %v8646_v58  ;;  %v8730_v57 = vld [vmem:[%s9944_s20 + $0x9a8] ss:$16 sps:$4 sm:$0xff]   ;;  %v8735_v58 = vld [vmem:[%s9944_s20 + $0x9c4] ss:$16 sps:$4 sm:$0xff]  }
 0x4aa   : > { %5842 = vmatprep.subr.bf16.mxu0 %v8651_v59  ;;  %6170 = vmatprep.subr.bf16.mxu1 %v8654_v43  ;;  %v8738_v59 = vld [vmem:[%s9944_s20 + $0x9cc] ss:$16 sps:$4 sm:$0xff]   ;;  %v8733_v43 = vld [vmem:[%s9944_s20 + $0x9c0] ss:$16 sps:$4 sm:$0xff]  }
 0x4ac   : > { %5834 = vmatmul.mubr.bf16.vlgmr.msra.gmra.mrb[0].mxu0 %v3050_v61  ;;  %6162 = vmatmul.mubr.bf16.vlgmr.msra.gmra.mrb[0].mxu1 %v3050_v61  ;;  %v8741_v61 = vld [vmem:[%s9944_s20 + $0x9e4] ss:$16 sps:$4 sm:$0xff]  }
 0x4ad   : > { %5843 = vmatpush1.bf16.msra.mxu0 %v8649_v62  ;;  %6171 = vmatpush1.bf16.msra.mxu1 %v8652_v54  ;;  %v8744_v62 = vld [vmem:[%s9944_s20 + $0x9ec] ss:$16 sps:$4 sm:$0xff]   ;;  %v8739_v54 = vld [vmem:[%s9944_s20 + $0x9e0] ss:$16 sps:$4 sm:$0xff]  }
 0x4ae   : > { %5844 = vmatprep.subr.bf16.mxu0 %v8657_v63  ;;  %6172 = vmatprep.subr.bf16.mxu1 %v8660_v0  ;;  %v8742_v63 = vld [vmem:[%s9944_s20 + $0x9e8] ss:$16 sps:$4 sm:$0xff]   ;;  %v8747_v0 = vld [vmem:[%s9944_s20 + $0xa04] ss:$16 sps:$4 sm:$0xff]  }
 0x4af   : > { %5874 = vmatprep.mubr.bf16.mxu0 %v10502_v1  ;;  %6202 = vmatprep.mubr.bf16.mxu1 %v10502_v1 }
 0x4b1   : > { %5845 = vmatpush1.bf16.msra.mxu0 %v8655_v41  ;;  %6173 = vmatpush1.bf16.msra.mxu1 %v8658_v2  ;;  %v8750_v41 = vld [vmem:[%s9944_s20 + $0xa0c] ss:$16 sps:$4 sm:$0xff]   ;;  %v10568_v2 = vrot.slane %v10487_v56, %v10239_v16  ;;  %v8751_v56 = vld [vmem:[%s9944_s20 + $0xa20] ss:$16 sps:$4 sm:$0xff]  }
 0x4b2   : > { %5846 = vmatprep.subr.bf16.mxu0 %v8663_v3  ;;  %6174 = vmatprep.subr.bf16.mxu1 %v8666_v4  ;;  %v8745_v3 = vld [vmem:[%s9944_s20 + $0xa00] ss:$16 sps:$4 sm:$0xff]   ;;  %v8748_v4 = vld [vmem:[%s9944_s20 + $0xa08] ss:$16 sps:$4 sm:$0xff]  }
 0x4b5   : > { %5847 = vmatpush1.bf16.msra.mxu0 %v8661_v47  ;;  %6175 = vmatpush1.bf16.msra.mxu1 %v8664_v6  ;;  %v8753_v47 = vld [vmem:[%s9944_s20 + $0xa24] ss:$16 sps:$4 sm:$0xff]   ;;  %v8756_v6 = vld [vmem:[%s9944_s20 + $0xa2c] ss:$16 sps:$4 sm:$0xff]  }
 0x4b6   : > { %5848 = vmatprep.subr.bf16.mxu0 %v8669_v9  ;;  %6176 = vmatprep.subr.bf16.mxu1 %v8672_v10  ;;  %v3100_v9 = vcombine.high %v10502_v1, %v10502_v1  ;;  %v8754_v10 = vld [vmem:[%s9944_s20 + $0xa28] ss:$16 sps:$4 sm:$0xff]   ;;  %v8757_v1 = vld [vmem:[%s9944_s20 + $0xa40] ss:$16 sps:$4 sm:$0xff]  }
 0x4b9   : > { %5849 = vmatpush1.bf16.msra.mxu0 %v8667_v11  ;;  %6177 = vmatpush1.bf16.msra.mxu1 %v8670_v12  ;;  %v8759_v11 = vld [vmem:[%s9944_s20 + $0xa44] ss:$16 sps:$4 sm:$0xff]   ;;  %v8762_v12 = vld [vmem:[%s9944_s20 + $0xa4c] ss:$16 sps:$4 sm:$0xff]  }
 0x4ba   : > { %5850 = vmatprep.subr.bf16.mxu0 %v8675_v13  ;;  %6178 = vmatprep.subr.bf16.mxu1 %v8678_v14  ;;  %v8760_v13 = vld [vmem:[%s9944_s20 + $0xa48] ss:$16 sps:$4 sm:$0xff]   ;;  %v8765_v14 = vld [vmem:[%s9944_s20 + $0xa64] ss:$16 sps:$4 sm:$0xff]  }
 0x4bd   : > { %5851 = vmatpush1.bf16.msra.mxu0 %v8673_v17  ;;  %6179 = vmatpush1.bf16.msra.mxu1 %v8676_v18  ;;  %v8768_v17 = vld [vmem:[%s9944_s20 + $0xa6c] ss:$16 sps:$4 sm:$0xff]   ;;  %v8763_v18 = vld [vmem:[%s9944_s20 + $0xa60] ss:$16 sps:$4 sm:$0xff]  }
 0x4be   : > { %5852 = vmatprep.subr.bf16.mxu0 %v8681_v20  ;;  %6180 = vmatprep.subr.bf16.mxu1 %v8684_v21  ;;  %v8766_v20 = vld [vmem:[%s9944_s20 + $0xa68] ss:$16 sps:$4 sm:$0xff]   ;;  %v8771_v21 = vld [vmem:[%s9944_s20 + $0xa84] ss:$16 sps:$4 sm:$0xff]  }
 0x4c1   : > { %5853 = vmatpush1.bf16.msra.mxu0 %v8679_v5  ;;  %6181 = vmatpush1.bf16.msra.mxu1 %v8682_v8  ;;  %v8774_v5 = vld [vmem:[%s9944_s20 + $0xa8c] ss:$16 sps:$4 sm:$0xff]   ;;  %v8769_v8 = vld [vmem:[%s9944_s20 + $0xa80] ss:$16 sps:$4 sm:$0xff]  }
 0x4c2   : > { %5854 = vmatprep.subr.bf16.mxu0 %v8687_v22  ;;  %6182 = vmatprep.subr.bf16.mxu1 %v8690_v23  ;;  %v8772_v22 = vld [vmem:[%s9944_s20 + $0xa88] ss:$16 sps:$4 sm:$0xff]   ;;  %v8777_v23 = vld [vmem:[%s9944_s20 + $0xaa4] ss:$16 sps:$4 sm:$0xff]  }
 0x4c5   : > { %5855 = vmatpush1.bf16.msra.mxu0 %v8685_v24  ;;  %6183 = vmatpush1.bf16.msra.mxu1 %v8688_v25  ;;  %v8780_v24 = vld [vmem:[%s9944_s20 + $0xaac] ss:$16 sps:$4 sm:$0xff]   ;;  %v8775_v25 = vld [vmem:[%s9944_s20 + $0xaa0] ss:$16 sps:$4 sm:$0xff]  }
 0x4c6   : > { %5856 = vmatprep.subr.bf16.mxu0 %v8693_v26  ;;  %6184 = vmatprep.subr.bf16.mxu1 %v8696_v27  ;;  %v8778_v26 = vld [vmem:[%s9944_s20 + $0xaa8] ss:$16 sps:$4 sm:$0xff]   ;;  %v8783_v27 = vld [vmem:[%s9944_s20 + $0xac4] ss:$16 sps:$4 sm:$0xff]  }
 0x4c9   : > { %5857 = vmatpush1.bf16.msra.mxu0 %v8691_v28  ;;  %6185 = vmatpush1.bf16.msra.mxu1 %v8694_v15  ;;  %v8786_v28 = vld [vmem:[%s9944_s20 + $0xacc] ss:$16 sps:$4 sm:$0xff]   ;;  %v8781_v15 = vld [vmem:[%s9944_s20 + $0xac0] ss:$16 sps:$4 sm:$0xff]  }
 0x4ca   : > { %5858 = vmatprep.subr.bf16.mxu0 %v8699_v29  ;;  %6186 = vmatprep.subr.bf16.mxu1 %v8702_v30  ;;  %v8784_v29 = vld [vmem:[%s9944_s20 + $0xac8] ss:$16 sps:$4 sm:$0xff]   ;;  %v8789_v30 = vld [vmem:[%s9944_s20 + $0xae4] ss:$16 sps:$4 sm:$0xff]  }
 0x4cd   : > { %5859 = vmatpush1.bf16.msra.mxu0 %v8697_v31  ;;  %6187 = vmatpush1.bf16.msra.mxu1 %v8700_v32  ;;  %v8792_v31 = vld [vmem:[%s9944_s20 + $0xaec] ss:$16 sps:$4 sm:$0xff]   ;;  %v8787_v32 = vld [vmem:[%s9944_s20 + $0xae0] ss:$16 sps:$4 sm:$0xff]  }
 0x4ce   : > { %5860 = vmatprep.subr.bf16.mxu0 %v8705_v33  ;;  %6188 = vmatprep.subr.bf16.mxu1 %v8708_v34  ;;  %v8790_v33 = vld [vmem:[%s9944_s20 + $0xae8] ss:$16 sps:$4 sm:$0xff]   ;;  %v8795_v34 = vld [vmem:[%s9944_s20 + $0xb04] ss:$16 sps:$4 sm:$0xff]  }
 0x4d1   : > { %5861 = vmatpush1.bf16.msra.mxu0 %v8703_v35  ;;  %6189 = vmatpush1.bf16.msra.mxu1 %v8706_v36  ;;  %v8798_v35 = vld [vmem:[%s9944_s20 + $0xb0c] ss:$16 sps:$4 sm:$0xff]   ;;  %v8793_v36 = vld [vmem:[%s9944_s20 + $0xb00] ss:$16 sps:$4 sm:$0xff]  }
 0x4d2   : > { %5862 = vmatprep.subr.bf16.mxu0 %v8711_v37  ;;  %6190 = vmatprep.subr.bf16.mxu1 %v8714_v38  ;;  %v8796_v37 = vld [vmem:[%s9944_s20 + $0xb08] ss:$16 sps:$4 sm:$0xff]   ;;  %v8801_v38 = vld [vmem:[%s9944_s20 + $0xb24] ss:$16 sps:$4 sm:$0xff]  }
 0x4d5   : > { %5863 = vmatpush1.bf16.msra.mxu0 %v8709_v39  ;;  %6191 = vmatpush1.bf16.msra.mxu1 %v8712_v40  ;;  %v8804_v39 = vld [vmem:[%s9944_s20 + $0xb2c] ss:$16 sps:$4 sm:$0xff]   ;;  %v8799_v40 = vld [vmem:[%s9944_s20 + $0xb20] ss:$16 sps:$4 sm:$0xff]  }
 0x4d6   : > { %5864 = vmatprep.subr.bf16.mxu0 %v8717_v42  ;;  %6192 = vmatprep.subr.bf16.mxu1 %v8720_v44  ;;  %v8802_v42 = vld [vmem:[%s9944_s20 + $0xb28] ss:$16 sps:$4 sm:$0xff]   ;;  %v8807_v44 = vld [vmem:[%s9944_s20 + $0xb44] ss:$16 sps:$4 sm:$0xff]  }
 0x4d9   : > { %5865 = vmatpush1.bf16.msra.mxu0 %v8715_v19  ;;  %6193 = vmatpush1.bf16.msra.mxu1 %v8718_v45  ;;  %v8810_v19 = vld [vmem:[%s9944_s20 + $0xb4c] ss:$16 sps:$4 sm:$0xff]   ;;  %v8805_v45 = vld [vmem:[%s9944_s20 + $0xb40] ss:$16 sps:$4 sm:$0xff]  }
 0x4da   : > { %5866 = vmatprep.subr.bf16.mxu0 %v8723_v46  ;;  %6194 = vmatprep.subr.bf16.mxu1 %v8726_v48  ;;  %v8808_v46 = vld [vmem:[%s9944_s20 + $0xb48] ss:$16 sps:$4 sm:$0xff]   ;;  %v8813_v48 = vld [vmem:[%s9944_s20 + $0xb64] ss:$16 sps:$4 sm:$0xff]  }
 0x4dd   : > { %5867 = vmatpush1.bf16.msra.mxu0 %v8721_v49  ;;  %6195 = vmatpush1.bf16.msra.mxu1 %v8724_v51  ;;  %v8816_v49 = vld [vmem:[%s9944_s20 + $0xb6c] ss:$16 sps:$4 sm:$0xff]   ;;  %v8811_v51 = vld [vmem:[%s9944_s20 + $0xb60] ss:$16 sps:$4 sm:$0xff]  }
 0x4de   : > { %5868 = vmatprep.subr.bf16.mxu0 %v8729_v52  ;;  %6196 = vmatprep.subr.bf16.mxu1 %v8732_v53  ;;  %v8814_v52 = vld [vmem:[%s9944_s20 + $0xb68] ss:$16 sps:$4 sm:$0xff]   ;;  %v8819_v53 = vld [vmem:[%s9944_s20 + $0xb84] ss:$16 sps:$4 sm:$0xff]  }
 0x4e1   : > { %5869 = vmatpush1.bf16.msra.mxu0 %v8727_v55  ;;  %6197 = vmatpush1.bf16.msra.mxu1 %v8730_v57  ;;  %v8822_v55 = vld [vmem:[%s9944_s20 + $0xb8c] ss:$16 sps:$4 sm:$0xff]   ;;  %v8817_v57 = vld [vmem:[%s9944_s20 + $0xb80] ss:$16 sps:$4 sm:$0xff]  }
 0x4e2   : > { %5870 = vmatprep.subr.bf16.mxu0 %v8735_v58  ;;  %6198 = vmatprep.subr.bf16.mxu1 %v8738_v59  ;;  %v8820_v58 = vld [vmem:[%s9944_s20 + $0xb88] ss:$16 sps:$4 sm:$0xff]   ;;  %v8825_v59 = vld [vmem:[%s9944_s20 + $0xba4] ss:$16 sps:$4 sm:$0xff]  }
 0x4e5   : > { %5871 = vmatpush1.bf16.msra.mxu0 %v8733_v43  ;;  %6199 = vmatpush1.bf16.msra.mxu1 %v8736_v60  ;;  %v8828_v43 = vld [vmem:[%s9944_s20 + $0xbac] ss:$16 sps:$4 sm:$0xff]   ;;  %v8823_v60 = vld [vmem:[%s9944_s20 + $0xba0] ss:$16 sps:$4 sm:$0xff]  }
 0x4e6   : > { %5872 = vmatprep.subr.bf16.mxu0 %v8741_v61  ;;  %6200 = vmatprep.subr.bf16.mxu1 %v8744_v62  ;;  %v8826_v61 = vld [vmem:[%s9944_s20 + $0xba8] ss:$16 sps:$4 sm:$0xff]   ;;  %v8831_v62 = vld [vmem:[%s9944_s20 + $0xbc4] ss:$16 sps:$4 sm:$0xff]  }
 0x4e9   : > { %5873 = vmatpush1.bf16.msra.mxu0 %v8739_v54  ;;  %6201 = vmatpush1.bf16.msra.mxu1 %v8742_v63  ;;  %v8834_v54 = vld [vmem:[%s9944_s20 + $0xbcc] ss:$16 sps:$4 sm:$0xff]   ;;  %v3053_v63 = vcombine.high %v10479_v50, %v10479_v50  ;;  %v8835_v50 = vld [vmem:[%s9944_s20 + $0xbe0] ss:$16 sps:$4 sm:$0xff]  }
 0x4ea   : > { %5883 = vmatprep.subr.bf16.mxu0 %v8747_v0  ;;  %6211 = vmatprep.subr.bf16.mxu1 %v8750_v41  ;;  %v8829_v0 = vld [vmem:[%s9944_s20 + $0xbc0] ss:$16 sps:$4 sm:$0xff]   ;;  %v8832_v41 = vld [vmem:[%s9944_s20 + $0xbc8] ss:$16 sps:$4 sm:$0xff]  }
 0x4ec   : > { %5875 = vmatmul.mubr.bf16.vlgmr.msra.gmra.mrb[0].mxu0 %v10568_v2  ;;  %6203 = vmatmul.mubr.bf16.vlgmr.msra.gmra.mrb[0].mxu1 %v10568_v2 }
 0x4ed   : > { %5884 = vmatpush1.bf16.msra.mxu0 %v8745_v3  ;;  %6212 = vmatpush1.bf16.msra.mxu1 %v8748_v4  ;;  %v8837_v3 = vld [vmem:[%s9944_s20 + $0xbe4] ss:$16 sps:$4 sm:$0xff]   ;;  %v8840_v4 = vld [vmem:[%s9944_s20 + $0xbec] ss:$16 sps:$4 sm:$0xff]  }
 0x4ee   : > { %5885 = vmatprep.subr.bf16.mxu0 %v8753_v47  ;;  %6213 = vmatprep.subr.bf16.mxu1 %v8756_v6  ;;  %v10637_v47 = vrot.slane %v3053_v63, %v10239_v16  ;;  %v8838_v6 = vld [vmem:[%s9944_s20 + $0xbe8] ss:$16 sps:$4 sm:$0xff]  }
 0x4ef   : > { %5915 = vmatprep.mubr.bf16.mxu0 %v3100_v9  ;;  %6243 = vmatprep.mubr.bf16.mxu1 %v3100_v9  ;;  %v8843_v9 = vld [vmem:[%s9944_s20 + $0xc04] ss:$16 sps:$4 sm:$0xff]   ;;  %v8916_v63 = vld [vmem:[%s9944_s20 + $0xd88] ss:$16 sps:$4 sm:$0xff]  }
 0x4f1   : > { %5886 = vmatpush1.bf16.msra.mxu0 %v8751_v56  ;;  %6214 = vmatpush1.bf16.msra.mxu1 %v8754_v10  ;;  %v8846_v56 = vld [vmem:[%s9944_s20 + $0xc0c] ss:$16 sps:$4 sm:$0xff]   ;;  %v3069_v10 = vcombine.high %v10637_v47, %v10637_v47 }
 0x4f2   : > { %5887 = vmatprep.subr.bf16.mxu0 %v8759_v11  ;;  %6215 = vmatprep.subr.bf16.mxu1 %v8762_v12  ;;  %v3098_v11 = vcombine.high %v10568_v2, %v10568_v2  ;;  %v8841_v12 = vld [vmem:[%s9944_s20 + $0xc00] ss:$16 sps:$4 sm:$0xff]  }
 0x4f3   : > { %v8847_v2 = vld [vmem:[%s9944_s20 + $0xc20] ss:$16 sps:$4 sm:$0xff]  }
 0x4f5   : > { %5888 = vmatpush1.bf16.msra.mxu0 %v8757_v1  ;;  %6216 = vmatpush1.bf16.msra.mxu1 %v8760_v13  ;;  %v8844_v1 = vld [vmem:[%s9944_s20 + $0xc08] ss:$16 sps:$4 sm:$0xff]   ;;  %v8849_v13 = vld [vmem:[%s9944_s20 + $0xc24] ss:$16 sps:$4 sm:$0xff]  }
 0x4f6   : > { %5889 = vmatprep.subr.bf16.mxu0 %v8765_v14  ;;  %6217 = vmatprep.subr.bf16.mxu1 %v8768_v17  ;;  %v8852_v14 = vld [vmem:[%s9944_s20 + $0xc2c] ss:$16 sps:$4 sm:$0xff]   ;;  %v10652_v17 = vrot.slane %v3069_v10, %v10239_v16  ;;  %v8933_v10 = vld [vmem:[%s9944_s20 + $0xde4] ss:$16 sps:$4 sm:$0xff]  }
 0x4f9   : > { %5890 = vmatpush1.bf16.msra.mxu0 %v8763_v18  ;;  %6218 = vmatpush1.bf16.msra.mxu1 %v8766_v20  ;;  %v8850_v18 = vld [vmem:[%s9944_s20 + $0xc28] ss:$16 sps:$4 sm:$0xff]   ;;  %v8855_v20 = vld [vmem:[%s9944_s20 + $0xc44] ss:$16 sps:$4 sm:$0xff]  }
 0x4fa   : > { %5891 = vmatprep.subr.bf16.mxu0 %v8771_v21  ;;  %6219 = vmatprep.subr.bf16.mxu1 %v8774_v5  ;;  %v8858_v21 = vld [vmem:[%s9944_s20 + $0xc4c] ss:$16 sps:$4 sm:$0xff]   ;;  %v8853_v5 = vld [vmem:[%s9944_s20 + $0xc40] ss:$16 sps:$4 sm:$0xff]  }
 0x4fd   : > { %5892 = vmatpush1.bf16.msra.mxu0 %v8769_v8  ;;  %6220 = vmatpush1.bf16.msra.mxu1 %v8772_v22  ;;  %v8856_v8 = vld [vmem:[%s9944_s20 + $0xc48] ss:$16 sps:$4 sm:$0xff]   ;;  %v8861_v22 = vld [vmem:[%s9944_s20 + $0xc64] ss:$16 sps:$4 sm:$0xff]  }
 0x4fe   : > { %5893 = vmatprep.subr.bf16.mxu0 %v8777_v23  ;;  %6221 = vmatprep.subr.bf16.mxu1 %v8780_v24  ;;  %v8864_v23 = vld [vmem:[%s9944_s20 + $0xc6c] ss:$16 sps:$4 sm:$0xff]   ;;  %v8859_v24 = vld [vmem:[%s9944_s20 + $0xc60] ss:$16 sps:$4 sm:$0xff]  }
 0x501   : > { %5894 = vmatpush1.bf16.msra.mxu0 %v8775_v25  ;;  %6222 = vmatpush1.bf16.msra.mxu1 %v8778_v26  ;;  %v8862_v25 = vld [vmem:[%s9944_s20 + $0xc68] ss:$16 sps:$4 sm:$0xff]   ;;  %v8867_v26 = vld [vmem:[%s9944_s20 + $0xc84] ss:$16 sps:$4 sm:$0xff]  }
 0x502   : > { %5895 = vmatprep.subr.bf16.mxu0 %v8783_v27  ;;  %6223 = vmatprep.subr.bf16.mxu1 %v8786_v28  ;;  %v8870_v27 = vld [vmem:[%s9944_s20 + $0xc8c] ss:$16 sps:$4 sm:$0xff]   ;;  %v8865_v28 = vld [vmem:[%s9944_s20 + $0xc80] ss:$16 sps:$4 sm:$0xff]  }
 0x505   : > { %5896 = vmatpush1.bf16.msra.mxu0 %v8781_v15  ;;  %6224 = vmatpush1.bf16.msra.mxu1 %v8784_v29  ;;  %v8868_v15 = vld [vmem:[%s9944_s20 + $0xc88] ss:$16 sps:$4 sm:$0xff]   ;;  %v8873_v29 = vld [vmem:[%s9944_s20 + $0xca4] ss:$16 sps:$4 sm:$0xff]  }
 0x506   : > { %5897 = vmatprep.subr.bf16.mxu0 %v8789_v30  ;;  %6225 = vmatprep.subr.bf16.mxu1 %v8792_v31  ;;  %v8876_v30 = vld [vmem:[%s9944_s20 + $0xcac] ss:$16 sps:$4 sm:$0xff]   ;;  %v8871_v31 = vld [vmem:[%s9944_s20 + $0xca0] ss:$16 sps:$4 sm:$0xff]  }
 0x509   : > { %5898 = vmatpush1.bf16.msra.mxu0 %v8787_v32  ;;  %6226 = vmatpush1.bf16.msra.mxu1 %v8790_v33  ;;  %v8874_v32 = vld [vmem:[%s9944_s20 + $0xca8] ss:$16 sps:$4 sm:$0xff]   ;;  %v8879_v33 = vld [vmem:[%s9944_s20 + $0xcc4] ss:$16 sps:$4 sm:$0xff]  }
 0x50a   : > { %5899 = vmatprep.subr.bf16.mxu0 %v8795_v34  ;;  %6227 = vmatprep.subr.bf16.mxu1 %v8798_v35  ;;  %v8882_v34 = vld [vmem:[%s9944_s20 + $0xccc] ss:$16 sps:$4 sm:$0xff]   ;;  %v8877_v35 = vld [vmem:[%s9944_s20 + $0xcc0] ss:$16 sps:$4 sm:$0xff]  }
 0x50d   : > { %5900 = vmatpush1.bf16.msra.mxu0 %v8793_v36  ;;  %6228 = vmatpush1.bf16.msra.mxu1 %v8796_v37  ;;  %v8880_v36 = vld [vmem:[%s9944_s20 + $0xcc8] ss:$16 sps:$4 sm:$0xff]   ;;  %v8885_v37 = vld [vmem:[%s9944_s20 + $0xce4] ss:$16 sps:$4 sm:$0xff]  }
 0x50e   : > { %5901 = vmatprep.subr.bf16.mxu0 %v8801_v38  ;;  %6229 = vmatprep.subr.bf16.mxu1 %v8804_v39  ;;  %v8888_v38 = vld [vmem:[%s9944_s20 + $0xcec] ss:$16 sps:$4 sm:$0xff]   ;;  %v8883_v39 = vld [vmem:[%s9944_s20 + $0xce0] ss:$16 sps:$4 sm:$0xff]  }
 0x511   : > { %5902 = vmatpush1.bf16.msra.mxu0 %v8799_v40  ;;  %6230 = vmatpush1.bf16.msra.mxu1 %v8802_v42  ;;  %v8886_v40 = vld [vmem:[%s9944_s20 + $0xce8] ss:$16 sps:$4 sm:$0xff]   ;;  %v8891_v42 = vld [vmem:[%s9944_s20 + $0xd04] ss:$16 sps:$4 sm:$0xff]  }
 0x512   : > { %5903 = vmatprep.subr.bf16.mxu0 %v8807_v44  ;;  %6231 = vmatprep.subr.bf16.mxu1 %v8810_v19  ;;  %v8894_v44 = vld [vmem:[%s9944_s20 + $0xd0c] ss:$16 sps:$4 sm:$0xff]   ;;  %v8889_v19 = vld [vmem:[%s9944_s20 + $0xd00] ss:$16 sps:$4 sm:$0xff]  }
 0x515   : > { %5904 = vmatpush1.bf16.msra.mxu0 %v8805_v45  ;;  %6232 = vmatpush1.bf16.msra.mxu1 %v8808_v46  ;;  %v8892_v45 = vld [vmem:[%s9944_s20 + $0xd08] ss:$16 sps:$4 sm:$0xff]   ;;  %v8897_v46 = vld [vmem:[%s9944_s20 + $0xd24] ss:$16 sps:$4 sm:$0xff]  }
 0x516   : > { %5905 = vmatprep.subr.bf16.mxu0 %v8813_v48  ;;  %6233 = vmatprep.subr.bf16.mxu1 %v8816_v49  ;;  %v8900_v48 = vld [vmem:[%s9944_s20 + $0xd2c] ss:$16 sps:$4 sm:$0xff]   ;;  %v8895_v49 = vld [vmem:[%s9944_s20 + $0xd20] ss:$16 sps:$4 sm:$0xff]  }
 0x519   : > { %5906 = vmatpush1.bf16.msra.mxu0 %v8811_v51  ;;  %6234 = vmatpush1.bf16.msra.mxu1 %v8814_v52  ;;  %v8898_v51 = vld [vmem:[%s9944_s20 + $0xd28] ss:$16 sps:$4 sm:$0xff]   ;;  %v8903_v52 = vld [vmem:[%s9944_s20 + $0xd44] ss:$16 sps:$4 sm:$0xff]  }
 0x51a   : > { %5907 = vmatprep.subr.bf16.mxu0 %v8819_v53  ;;  %6235 = vmatprep.subr.bf16.mxu1 %v8822_v55  ;;  %v8906_v53 = vld [vmem:[%s9944_s20 + $0xd4c] ss:$16 sps:$4 sm:$0xff]   ;;  %v8901_v55 = vld [vmem:[%s9944_s20 + $0xd40] ss:$16 sps:$4 sm:$0xff]  }
 0x51d   : > { %5908 = vmatpush1.bf16.msra.mxu0 %v8817_v57  ;;  %6236 = vmatpush1.bf16.msra.mxu1 %v8820_v58  ;;  %v8904_v57 = vld [vmem:[%s9944_s20 + $0xd48] ss:$16 sps:$4 sm:$0xff]   ;;  %v8909_v58 = vld [vmem:[%s9944_s20 + $0xd64] ss:$16 sps:$4 sm:$0xff]  }
 0x51e   : > { %5909 = vmatprep.subr.bf16.mxu0 %v8825_v59  ;;  %6237 = vmatprep.subr.bf16.mxu1 %v8828_v43  ;;  %v8912_v59 = vld [vmem:[%s9944_s20 + $0xd6c] ss:$16 sps:$4 sm:$0xff]   ;;  %v8907_v43 = vld [vmem:[%s9944_s20 + $0xd60] ss:$16 sps:$4 sm:$0xff]  }
 0x521   : > { %5910 = vmatpush1.bf16.msra.mxu0 %v8823_v60  ;;  %6238 = vmatpush1.bf16.msra.mxu1 %v8826_v61  ;;  %v8910_v60 = vld [vmem:[%s9944_s20 + $0xd68] ss:$16 sps:$4 sm:$0xff]   ;;  %v8915_v61 = vld [vmem:[%s9944_s20 + $0xd84] ss:$16 sps:$4 sm:$0xff]  }
 0x522   : > { %5911 = vmatprep.subr.bf16.mxu0 %v8831_v62  ;;  %6239 = vmatprep.subr.bf16.mxu1 %v8834_v54  ;;  %v8918_v62 = vld [vmem:[%s9944_s20 + $0xd8c] ss:$16 sps:$4 sm:$0xff]   ;;  %v8913_v54 = vld [vmem:[%s9944_s20 + $0xd80] ss:$16 sps:$4 sm:$0xff]  }
 0x525   : > { %5912 = vmatpush1.bf16.msra.mxu0 %v8829_v0  ;;  %6240 = vmatpush1.bf16.msra.mxu1 %v8832_v41  ;;  %v8921_v0 = vld [vmem:[%s9944_s20 + $0xda4] ss:$16 sps:$4 sm:$0xff]   ;;  %v8924_v41 = vld [vmem:[%s9944_s20 + $0xdac] ss:$16 sps:$4 sm:$0xff]  }
 0x526   : > { %5913 = vmatprep.subr.bf16.mxu0 %v8837_v3  ;;  %6241 = vmatprep.subr.bf16.mxu1 %v8840_v4  ;;  %v8919_v3 = vld [vmem:[%s9944_s20 + $0xda0] ss:$16 sps:$4 sm:$0xff]   ;;  %v8922_v4 = vld [vmem:[%s9944_s20 + $0xda8] ss:$16 sps:$4 sm:$0xff]  }
 0x529   : > { %5914 = vmatpush1.bf16.msra.mxu0 %v8835_v50  ;;  %6242 = vmatpush1.bf16.msra.mxu1 %v8838_v6  ;;  %v8927_v50 = vld [vmem:[%s9944_s20 + $0xdc4] ss:$16 sps:$4 sm:$0xff]   ;;  %v8930_v6 = vld [vmem:[%s9944_s20 + $0xdcc] ss:$16 sps:$4 sm:$0xff]  }
 0x52a   : > { %5924 = vmatprep.subr.bf16.mxu0 %v8843_v9  ;;  %6252 = vmatprep.subr.bf16.mxu1 %v8846_v56  ;;  %v8925_v9 = vld [vmem:[%s9944_s20 + $0xdc0] ss:$16 sps:$4 sm:$0xff]   ;;  %v8928_v56 = vld [vmem:[%s9944_s20 + $0xdc8] ss:$16 sps:$4 sm:$0xff]  }
 0x52c   : > { %5916 = vmatmul.mubr.bf16.vlgmr.msra.gmra.mrb[0].mxu0 %v3098_v11  ;;  %6244 = vmatmul.mubr.bf16.vlgmr.msra.gmra.mrb[0].mxu1 %v3098_v11  ;;  %v8936_v11 = vld [vmem:[%s9944_s20 + $0xdec] ss:$16 sps:$4 sm:$0xff]  }
 0x52d   : > { %5925 = vmatpush1.bf16.msra.mxu0 %v8841_v12  ;;  %6253 = vmatpush1.bf16.msra.mxu1 %v8844_v1  ;;  %v8931_v12 = vld [vmem:[%s9944_s20 + $0xde0] ss:$16 sps:$4 sm:$0xff]   ;;  %v8934_v1 = vld [vmem:[%s9944_s20 + $0xde8] ss:$16 sps:$4 sm:$0xff]  }
 0x52e   : > { %5926 = vmatprep.subr.bf16.mxu0 %v8849_v13  ;;  %6254 = vmatprep.subr.bf16.mxu1 %v8852_v14  ;;  %v8940_v13 = vld [vmem:[%s9944_s20 + $0xe04] ss:$16 sps:$4 sm:$0xff]   ;;  %v8943_v14 = vld [vmem:[%s9944_s20 + $0xe0c] ss:$16 sps:$4 sm:$0xff]  }
 0x52f   : > { %5956 = vmatprep.mubr.bf16.mxu0 %v10652_v17  ;;  %6284 = vmatprep.mubr.bf16.mxu1 %v10652_v17 }
 0x531   : > { %5927 = vmatpush1.bf16.msra.mxu0 %v8847_v2  ;;  %6255 = vmatpush1.bf16.msra.mxu1 %v8850_v18  ;;  %v10718_v2 = vrot.slane %v10637_v47, %v10239_v16  ;;  %v8938_v18 = vld [vmem:[%s9944_s20 + $0xe00] ss:$16 sps:$4 sm:$0xff]   ;;  %v8947_v47 = vld [vmem:[%s9944_s20 + $0xe28] ss:$16 sps:$4 sm:$0xff]  }
 0x532   : > { %5928 = vmatprep.subr.bf16.mxu0 %v8855_v20  ;;  %6256 = vmatprep.subr.bf16.mxu1 %v8858_v21  ;;  %v8941_v20 = vld [vmem:[%s9944_s20 + $0xe08] ss:$16 sps:$4 sm:$0xff]   ;;  %v8946_v21 = vld [vmem:[%s9944_s20 + $0xe24] ss:$16 sps:$4 sm:$0xff]   ;;  %v8944_v16 = vld [vmem:[%s9944_s20 + $0xe20] ss:$16 sps:$4 sm:$0xff]  }
 0x535   : > { %5929 = vmatpush1.bf16.msra.mxu0 %v8853_v5  ;;  %6257 = vmatpush1.bf16.msra.mxu1 %v8856_v8  ;;  %v8949_v5 = vld [vmem:[%s9944_s20 + $0xe2c] ss:$16 sps:$4 sm:$0xff]   ;;  %v3101_v8 = vcombine.high %v10652_v17, %v10652_v17  ;;  %v8950_v17 = vld [vmem:[%s9944_s20 + $0xe40] ss:$16 sps:$4 sm:$0xff]  }
 0x536   : > { %5930 = vmatprep.subr.bf16.mxu0 %v8861_v22  ;;  %6258 = vmatprep.subr.bf16.mxu1 %v8864_v23  ;;  %v8952_v22 = vld [vmem:[%s9944_s20 + $0xe44] ss:$16 sps:$4 sm:$0xff]   ;;  %v8955_v23 = vld [vmem:[%s9944_s20 + $0xe4c] ss:$16 sps:$4 sm:$0xff]  }
 0x539   : > { %5931 = vmatpush1.bf16.msra.mxu0 %v8859_v24  ;;  %6259 = vmatpush1.bf16.msra.mxu1 %v8862_v25  ;;  %v8953_v24 = vld [vmem:[%s9944_s20 + $0xe48] ss:$16 sps:$4 sm:$0xff]   ;;  %v8958_v25 = vld [vmem:[%s9944_s20 + $0xe64] ss:$16 sps:$4 sm:$0xff]  }
 0x53a   : > { %5932 = vmatprep.subr.bf16.mxu0 %v8867_v26  ;;  %6260 = vmatprep.subr.bf16.mxu1 %v8870_v27  ;;  %v8961_v26 = vld [vmem:[%s9944_s20 + $0xe6c] ss:$16 sps:$4 sm:$0xff]   ;;  %v8956_v27 = vld [vmem:[%s9944_s20 + $0xe60] ss:$16 sps:$4 sm:$0xff]  }
 0x53d   : > { %5933 = vmatpush1.bf16.msra.mxu0 %v8865_v28  ;;  %6261 = vmatpush1.bf16.msra.mxu1 %v8868_v15  ;;  %v8959_v28 = vld [vmem:[%s9944_s20 + $0xe68] ss:$16 sps:$4 sm:$0xff]   ;;  %v8964_v15 = vld [vmem:[%s9944_s20 + $0xe84] ss:$16 sps:$4 sm:$0xff]  }
 0x53e   : > { %5934 = vmatprep.subr.bf16.mxu0 %v8873_v29  ;;  %6262 = vmatprep.subr.bf16.mxu1 %v8876_v30  ;;  %v8967_v29 = vld [vmem:[%s9944_s20 + $0xe8c] ss:$16 sps:$4 sm:$0xff]   ;;  %v8962_v30 = vld [vmem:[%s9944_s20 + $0xe80] ss:$16 sps:$4 sm:$0xff]  }
 0x541   : > { %5935 = vmatpush1.bf16.msra.mxu0 %v8871_v31  ;;  %6263 = vmatpush1.bf16.msra.mxu1 %v8874_v32  ;;  %v8965_v31 = vld [vmem:[%s9944_s20 + $0xe88] ss:$16 sps:$4 sm:$0xff]   ;;  %v8970_v32 = vld [vmem:[%s9944_s20 + $0xea4] ss:$16 sps:$4 sm:$0xff]  }
 0x542   : > { %5936 = vmatprep.subr.bf16.mxu0 %v8879_v33  ;;  %6264 = vmatprep.subr.bf16.mxu1 %v8882_v34  ;;  %v8973_v33 = vld [vmem:[%s9944_s20 + $0xeac] ss:$16 sps:$4 sm:$0xff]   ;;  %v8968_v34 = vld [vmem:[%s9944_s20 + $0xea0] ss:$16 sps:$4 sm:$0xff]  }
 0x545   : > { %5937 = vmatpush1.bf16.msra.mxu0 %v8877_v35  ;;  %6265 = vmatpush1.bf16.msra.mxu1 %v8880_v36  ;;  %v8971_v35 = vld [vmem:[%s9944_s20 + $0xea8] ss:$16 sps:$4 sm:$0xff]   ;;  %v8976_v36 = vld [vmem:[%s9944_s20 + $0xec4] ss:$16 sps:$4 sm:$0xff]  }
 0x546   : > { %5938 = vmatprep.subr.bf16.mxu0 %v8885_v37  ;;  %6266 = vmatprep.subr.bf16.mxu1 %v8888_v38  ;;  %v8979_v37 = vld [vmem:[%s9944_s20 + $0xecc] ss:$16 sps:$4 sm:$0xff]   ;;  %v8974_v38 = vld [vmem:[%s9944_s20 + $0xec0] ss:$16 sps:$4 sm:$0xff]  }
 0x549   : > { %5939 = vmatpush1.bf16.msra.mxu0 %v8883_v39  ;;  %6267 = vmatpush1.bf16.msra.mxu1 %v8886_v40  ;;  %v8977_v39 = vld [vmem:[%s9944_s20 + $0xec8] ss:$16 sps:$4 sm:$0xff]   ;;  %v8982_v40 = vld [vmem:[%s9944_s20 + $0xee4] ss:$16 sps:$4 sm:$0xff]  }
 0x54a   : > { %5940 = vmatprep.subr.bf16.mxu0 %v8891_v42  ;;  %6268 = vmatprep.subr.bf16.mxu1 %v8894_v44  ;;  %v8985_v42 = vld [vmem:[%s9944_s20 + $0xeec] ss:$16 sps:$4 sm:$0xff]   ;;  %v8980_v44 = vld [vmem:[%s9944_s20 + $0xee0] ss:$16 sps:$4 sm:$0xff]  }
 0x54d   : > { %5941 = vmatpush1.bf16.msra.mxu0 %v8889_v19  ;;  %6269 = vmatpush1.bf16.msra.mxu1 %v8892_v45  ;;  %v8983_v19 = vld [vmem:[%s9944_s20 + $0xee8] ss:$16 sps:$4 sm:$0xff]   ;;  %v8988_v45 = vld [vmem:[%s9944_s20 + $0xf04] ss:$16 sps:$4 sm:$0xff]  }
 0x54e   : > { %5942 = vmatprep.subr.bf16.mxu0 %v8897_v46  ;;  %6270 = vmatprep.subr.bf16.mxu1 %v8900_v48  ;;  %v8991_v46 = vld [vmem:[%s9944_s20 + $0xf0c] ss:$16 sps:$4 sm:$0xff]   ;;  %v8986_v48 = vld [vmem:[%s9944_s20 + $0xf00] ss:$16 sps:$4 sm:$0xff]  }
 0x551   : > { %5943 = vmatpush1.bf16.msra.mxu0 %v8895_v49  ;;  %6271 = vmatpush1.bf16.msra.mxu1 %v8898_v51  ;;  %v8989_v49 = vld [vmem:[%s9944_s20 + $0xf08] ss:$16 sps:$4 sm:$0xff]   ;;  %v8994_v51 = vld [vmem:[%s9944_s20 + $0xf24] ss:$16 sps:$4 sm:$0xff]  }
 0x552   : > { %5944 = vmatprep.subr.bf16.mxu0 %v8903_v52  ;;  %6272 = vmatprep.subr.bf16.mxu1 %v8906_v53  ;;  %v8997_v52 = vld [vmem:[%s9944_s20 + $0xf2c] ss:$16 sps:$4 sm:$0xff]   ;;  %v8992_v53 = vld [vmem:[%s9944_s20 + $0xf20] ss:$16 sps:$4 sm:$0xff]  }
 0x555   : > { %5945 = vmatpush1.bf16.msra.mxu0 %v8901_v55  ;;  %6273 = vmatpush1.bf16.msra.mxu1 %v8904_v57  ;;  %v8995_v55 = vld [vmem:[%s9944_s20 + $0xf28] ss:$16 sps:$4 sm:$0xff]   ;;  %v9000_v57 = vld [vmem:[%s9944_s20 + $0xf44] ss:$16 sps:$4 sm:$0xff]  }
 0x556   : > { %5946 = vmatprep.subr.bf16.mxu0 %v8909_v58  ;;  %6274 = vmatprep.subr.bf16.mxu1 %v8912_v59  ;;  %v9003_v58 = vld [vmem:[%s9944_s20 + $0xf4c] ss:$16 sps:$4 sm:$0xff]   ;;  %v8998_v59 = vld [vmem:[%s9944_s20 + $0xf40] ss:$16 sps:$4 sm:$0xff]  }
 0x559   : > { %5947 = vmatpush1.bf16.msra.mxu0 %v8907_v43  ;;  %6275 = vmatpush1.bf16.msra.mxu1 %v8910_v60  ;;  %v9001_v43 = vld [vmem:[%s9944_s20 + $0xf48] ss:$16 sps:$4 sm:$0xff]   ;;  %v9006_v60 = vld [vmem:[%s9944_s20 + $0xf64] ss:$16 sps:$4 sm:$0xff]  }
 0x55a   : > { %5948 = vmatprep.subr.bf16.mxu0 %v8915_v61  ;;  %6276 = vmatprep.subr.bf16.mxu1 %v8918_v62  ;;  %v9009_v61 = vld [vmem:[%s9944_s20 + $0xf6c] ss:$16 sps:$4 sm:$0xff]   ;;  %v9004_v62 = vld [vmem:[%s9944_s20 + $0xf60] ss:$16 sps:$4 sm:$0xff]  }
 0x55d   : > { %5949 = vmatpush1.bf16.msra.mxu0 %v8913_v54  ;;  %6277 = vmatpush1.bf16.msra.mxu1 %v8916_v63  ;;  %v9007_v54 = vld [vmem:[%s9944_s20 + $0xf68] ss:$16 sps:$4 sm:$0xff]   ;;  %v9012_v63 = vld [vmem:[%s9944_s20 + $0xf84] ss:$16 sps:$4 sm:$0xff]  }
 0x55e   : > { %5950 = vmatprep.subr.bf16.mxu0 %v8921_v0  ;;  %6278 = vmatprep.subr.bf16.mxu1 %v8924_v41  ;;  %v9015_v0 = vld [vmem:[%s9944_s20 + $0xf8c] ss:$16 sps:$4 sm:$0xff]   ;;  %v9010_v41 = vld [vmem:[%s9944_s20 + $0xf80] ss:$16 sps:$4 sm:$0xff]  }
 0x561   : > { %5951 = vmatpush1.bf16.msra.mxu0 %v8919_v3  ;;  %6279 = vmatpush1.bf16.msra.mxu1 %v8922_v4  ;;  %v9013_v3 = vld [vmem:[%s9944_s20 + $0xf88] ss:$16 sps:$4 sm:$0xff]   ;;  %v9018_v4 = vld [vmem:[%s9944_s20 + $0xfa4] ss:$16 sps:$4 sm:$0xff]  }
 0x562   : > { %5952 = vmatprep.subr.bf16.mxu0 %v8927_v50  ;;  %6280 = vmatprep.subr.bf16.mxu1 %v8930_v6  ;;  %v9021_v50 = vld [vmem:[%s9944_s20 + $0xfac] ss:$16 sps:$4 sm:$0xff]   ;;  %v9016_v6 = vld [vmem:[%s9944_s20 + $0xfa0] ss:$16 sps:$4 sm:$0xff]  }
 0x565   : > { %5953 = vmatpush1.bf16.msra.mxu0 %v8925_v9  ;;  %6281 = vmatpush1.bf16.msra.mxu1 %v8928_v56  ;;  %v9019_v9 = vld [vmem:[%s9944_s20 + $0xfa8] ss:$16 sps:$4 sm:$0xff]   ;;  %v9024_v56 = vld [vmem:[%s9944_s20 + $0xfc4] ss:$16 sps:$4 sm:$0xff]  }
 0x566   : > { %5954 = vmatprep.subr.bf16.mxu0 %v8933_v10  ;;  %6282 = vmatprep.subr.bf16.mxu1 %v8936_v11  ;;  %v9027_v10 = vld [vmem:[%s9944_s20 + $0xfcc] ss:$16 sps:$4 sm:$0xff]   ;;  %v9022_v11 = vld [vmem:[%s9944_s20 + $0xfc0] ss:$16 sps:$4 sm:$0xff]  }
 0x569   : > { %5955 = vmatpush1.bf16.msra.mxu0 %v8931_v12  ;;  %6283 = vmatpush1.bf16.msra.mxu1 %v8934_v1  ;;  %v9025_v12 = vld [vmem:[%s9944_s20 + $0xfc8] ss:$16 sps:$4 sm:$0xff]   ;;  %v9030_v1 = vld [vmem:[%s9944_s20 + $0xfe4] ss:$16 sps:$4 sm:$0xff]  }
 0x56a   : > { %5965 = vmatprep.subr.bf16.mxu0 %v8940_v13  ;;  %6293 = vmatprep.subr.bf16.mxu1 %v8943_v14  ;;  %v9033_v13 = vld [vmem:[%s9944_s20 + $0xfec] ss:$16 sps:$4 sm:$0xff]   ;;  %v9028_v14 = vld [vmem:[%s9944_s20 + $0xfe0] ss:$16 sps:$4 sm:$0xff]  }
 0x56c   : > { %5957 = vmatmul.mubr.bf16.vlgmr.msra.gmra.mrb[0].mxu0 %v10718_v2  ;;  %6285 = vmatmul.mubr.bf16.vlgmr.msra.gmra.mrb[0].mxu1 %v10718_v2 }
 0x56d   : > { %5966 = vmatpush1.bf16.msra.mxu0 %v8938_v18  ;;  %6294 = vmatpush1.bf16.msra.mxu1 %v8941_v20  ;;  %v9031_v18 = vld [vmem:[%s9944_s20 + $0xfe8] ss:$16 sps:$4 sm:$0xff]  }
 0x56e   : > { %5967 = vmatprep.subr.bf16.mxu0 %v8946_v21  ;;  %6295 = vmatprep.subr.bf16.mxu1 %v8949_v5  ;;  %v9034_v20 = vld [vmem:[%s9956_s24 + $0x40] sm:$0xff]   ;;  %v3099_v5 = vcombine.high %v10718_v2, %v10718_v2  ;;  %v9041_v2 = vld [vmem:[%s9956_s24 + $0x88] sm:$0xff]  }
 0x56f   : > { %5997 = vmatprep.mubr.bf16.mxu0 %v3101_v8  ;;  %6325 = vmatprep.mubr.bf16.mxu1 %v3101_v8  ;;  %v9035_v21 = vld [vmem:[%s9956_s24 + $0xc0] sm:$0xff]  }
 0x570   : > { %v9036_v8 = vld [vmem:[%s9956_s24] sm:$0xff]  }
 0x571   : > { %5968 = vmatpush1.bf16.msra.mxu0 %v8944_v16  ;;  %6296 = vmatpush1.bf16.msra.mxu1 %v8947_v47  ;;  %v9037_v16 = vld [vmem:[%s9956_s24 + $0x80] sm:$0xff]   ;;  %v9038_v47 = vld [vmem:[%s9956_s24 + $0x48] sm:$0xff]  }
 0x572   : > { %5969 = vmatprep.subr.bf16.mxu0 %v8952_v22  ;;  %6297 = vmatprep.subr.bf16.mxu1 %v8955_v23  ;;  %v9039_v22 = vld [vmem:[%s9956_s24 + $0xc8] sm:$0xff]  }
 0x573   : > { %v9040_v23 = vld [vmem:[%s9956_s24 + $0x8] sm:$0xff]  }
 0x575   : > { %5970 = vmatpush1.bf16.msra.mxu0 %v8950_v17  ;;  %6298 = vmatpush1.bf16.msra.mxu1 %v8953_v24  ;;  %v9042_v17 = vld [vmem:[%s9956_s24 + $0x50] sm:$0xff]  }
 0x576   : > { %5971 = vmatprep.subr.bf16.mxu0 %v8958_v25  ;;  %6299 = vmatprep.subr.bf16.mxu1 %v8961_v26  ;;  %v9043_v24 = vld [vmem:[%s9956_s24 + $0xd0] sm:$0xff]  }
 0x577   : > { %v9044_v25 = vld [vmem:[%s9956_s24 + $0x10] sm:$0xff]  }
 0x578   : > { %v9045_v26 = vld [vmem:[%s9956_s24 + $0x90] sm:$0xff]  }
 0x579   : > { %5972 = vmatpush1.bf16.msra.mxu0 %v8956_v27  ;;  %6300 = vmatpush1.bf16.msra.mxu1 %v8959_v28  ;;  %v9046_v27 = vld [vmem:[%s9956_s24 + $0x58] sm:$0xff]  }
 0x57a   : > { %5973 = vmatprep.subr.bf16.mxu0 %v8964_v15  ;;  %6301 = vmatprep.subr.bf16.mxu1 %v8967_v29  ;;  %v9047_v28 = vld [vmem:[%s9956_s24 + $0xd8] sm:$0xff]  }
 0x57b   : > { %v9048_v15 = vld [vmem:[%s9956_s24 + $0x18] sm:$0xff]  }
 0x57c   : > { %v9049_v29 = vld [vmem:[%s9956_s24 + $0x98] sm:$0xff]  }
 0x57d   : > { %5974 = vmatpush1.bf16.msra.mxu0 %v8962_v30  ;;  %6302 = vmatpush1.bf16.msra.mxu1 %v8965_v31  ;;  %v9050_v30 = vld [vmem:[%s9956_s24 + $0x60] sm:$0xff]  }
 0x57e   : > { %5975 = vmatprep.subr.bf16.mxu0 %v8970_v32  ;;  %6303 = vmatprep.subr.bf16.mxu1 %v8973_v33  ;;  %v9051_v31 = vld [vmem:[%s9956_s24 + $0xe0] sm:$0xff]  }
 0x57f   : > { %v9052_v32 = vld [vmem:[%s9956_s24 + $0x20] sm:$0xff]  }
 0x580   : > { %v9053_v33 = vld [vmem:[%s9956_s24 + $0xa0] sm:$0xff]  }
 0x581   : > { %5976 = vmatpush1.bf16.msra.mxu0 %v8968_v34  ;;  %6304 = vmatpush1.bf16.msra.mxu1 %v8971_v35  ;;  %v9054_v34 = vld [vmem:[%s9956_s24 + $0x68] sm:$0xff]  }
 0x582   : > { %5977 = vmatprep.subr.bf16.mxu0 %v8976_v36  ;;  %6305 = vmatprep.subr.bf16.mxu1 %v8979_v37  ;;  %v9055_v35 = vld [vmem:[%s9956_s24 + $0xe8] sm:$0xff]  }
 0x583   : > { %v9056_v36 = vld [vmem:[%s9956_s24 + $0x28] sm:$0xff]  }
 0x584   : > { %v9057_v37 = vld [vmem:[%s9956_s24 + $0xa8] sm:$0xff]  }
 0x585   : > { %5978 = vmatpush1.bf16.msra.mxu0 %v8974_v38  ;;  %6306 = vmatpush1.bf16.msra.mxu1 %v8977_v39  ;;  %v9058_v38 = vld [vmem:[%s9956_s24 + $0x70] sm:$0xff]  }
 0x586   : > { %5979 = vmatprep.subr.bf16.mxu0 %v8982_v40  ;;  %6307 = vmatprep.subr.bf16.mxu1 %v8985_v42  ;;  %v9059_v39 = vld [vmem:[%s9956_s24 + $0xf0] sm:$0xff]  }
 0x587   : > { %v9060_v40 = vld [vmem:[%s9956_s24 + $0x30] sm:$0xff]  }
 0x588   : > { %v9061_v42 = vld [vmem:[%s9956_s24 + $0xb0] sm:$0xff]  }
 0x589   : > { %5980 = vmatpush1.bf16.msra.mxu0 %v8980_v44  ;;  %6308 = vmatpush1.bf16.msra.mxu1 %v8983_v19  ;;  %v9062_v44 = vld [vmem:[%s9956_s24 + $0x78] sm:$0xff]  }
 0x58a   : > { %5981 = vmatprep.subr.bf16.mxu0 %v8988_v45  ;;  %6309 = vmatprep.subr.bf16.mxu1 %v8991_v46  ;;  %v9063_v19 = vld [vmem:[%s9956_s24 + $0xf8] sm:$0xff]  }
 0x58b   : > { %v9064_v45 = vld [vmem:[%s9956_s24 + $0x38] sm:$0xff]  }
 0x58c   : > { %v9065_v46 = vld [vmem:[%s9956_s24 + $0xb8] sm:$0xff]  }
 0x58d   : > { %5982 = vmatpush1.bf16.msra.mxu0 %v8986_v48  ;;  %6310 = vmatpush1.bf16.msra.mxu1 %v8989_v49  ;;  %v2984_v48 = vsub.s32 0, %v10231_v7  ;;  %v2992_v49 = vsub.s32 2, %v10231_v7 }
 0x58e   : > { %5983 = vmatprep.subr.bf16.mxu0 %v8994_v51  ;;  %6311 = vmatprep.subr.bf16.mxu1 %v8997_v52  ;;  %v2980_v51 = vld [vmem:[%s9950_s25] sm:$0xf]  ;;  %v2988_v52 = vsub.s32 1, %v10231_v7 }
 0x591   : > { %5984 = vmatpush1.bf16.msra.mxu0 %v8992_v53  ;;  %6312 = vmatpush1.bf16.msra.mxu1 %v8995_v55  ;;  %v2996_v53 = vsub.s32 3, %v10231_v7  ;;  %v2985_v55 = vrot.slane %v2980_v51, %v2984_v48 }
 0x592   : > { %5985 = vmatprep.subr.bf16.mxu0 %v9000_v57  ;;  %6313 = vmatprep.subr.bf16.mxu1 %v9003_v58  ;;  %v2993_v57 = vrot.slane %v2980_v51, %v2992_v49  ;;  %v2989_v58 = vrot.slane %v2980_v51, %v2988_v52 }
 0x595   : > { %5986 = vmatpush1.bf16.msra.mxu0 %v8998_v59  ;;  %6314 = vmatpush1.bf16.msra.mxu1 %v9001_v43  ;;  %v2997_v59 = vrot.slane %v2980_v51, %v2996_v53 }
 0x596   : > { %5987 = vmatprep.subr.bf16.mxu0 %v9006_v60  ;;  %6315 = vmatprep.subr.bf16.mxu1 %v9009_v61 }
 0x599   : > { %5988 = vmatpush1.bf16.msra.mxu0 %v9004_v62  ;;  %6316 = vmatpush1.bf16.msra.mxu1 %v9007_v54 }
 0x59a   : > { %5989 = vmatprep.subr.bf16.mxu0 %v9012_v63  ;;  %6317 = vmatprep.subr.bf16.mxu1 %v9015_v0 }
 0x59d   : > { %5990 = vmatpush1.bf16.msra.mxu0 %v9010_v41  ;;  %6318 = vmatpush1.bf16.msra.mxu1 %v9013_v3 }
 0x59e   : > { %5991 = vmatprep.subr.bf16.mxu0 %v9018_v4  ;;  %6319 = vmatprep.subr.bf16.mxu1 %v9021_v50 }
 0x5a1   : > { %5992 = vmatpush1.bf16.msra.mxu0 %v9016_v6  ;;  %6320 = vmatpush1.bf16.msra.mxu1 %v9019_v9 }
 0x5a2   : > { %5993 = vmatprep.subr.bf16.mxu0 %v9024_v56  ;;  %6321 = vmatprep.subr.bf16.mxu1 %v9027_v10 }
 0x5a5   : > { %5994 = vmatpush1.bf16.msra.mxu0 %v9022_v11  ;;  %6322 = vmatpush1.bf16.msra.mxu1 %v9025_v12 }
 0x5a6   : > { %5995 = vmatprep.subr.bf16.mxu0 %v9030_v1  ;;  %6323 = vmatprep.subr.bf16.mxu1 %v9033_v13 }
 0x5a9   : > { %5996 = vmatpush1.bf16.msra.mxu0 %v9028_v14  ;;  %6324 = vmatpush1.bf16.msra.mxu1 %v9031_v18 }
 0x5aa   : > { %7761 = vmatprep.subr.bf16.mxu0 %v9034_v20  ;;  %7783 = vmatprep.subr.bf16.mxu1 %v9035_v21 }
 0x5ac   : > { %5998 = vmatmul.mubr.bf16.vlgmr.msra.gmra.mrb[0].mxu0 %v3099_v5  ;;  %6326 = vmatmul.mubr.bf16.vlgmr.msra.gmra.mrb[0].mxu1 %v3099_v5 }
 0x5ad   : > { %7762 = vmatpush3.bf16.msra.mxu0 %v9036_v8  ;;  %7784 = vmatpush3.bf16.msra.mxu1 %v9037_v16 }
 0x5ae   : > { %7763 = vmatprep.subr.bf16.mxu0 %v9038_v47  ;;  %7785 = vmatprep.subr.bf16.mxu1 %v9039_v22  ;;  %v6342_v22 = vld [vmem:[%s9968_s0] sm:$0x3] }
 0x5b1   : > { %7764 = vmatpush3.bf16.msra.mxu0 %v9040_v23  ;;  %7786 = vmatpush3.bf16.msra.mxu1 %v9041_v2 }
 0x5b2   : > { %7765 = vmatprep.subr.bf16.mxu0 %v9042_v17  ;;  %7787 = vmatprep.subr.bf16.mxu1 %v9043_v24 }
 0x5b5   : > { %7766 = vmatpush3.bf16.msra.mxu0 %v9044_v25  ;;  %7788 = vmatpush3.bf16.msra.mxu1 %v9045_v26 }
 0x5b6   : > { %7767 = vmatprep.subr.bf16.mxu0 %v9046_v27  ;;  %7789 = vmatprep.subr.bf16.mxu1 %v9047_v28 }
 0x5b9   : > { %7768 = vmatpush3.bf16.msra.mxu0 %v9048_v15  ;;  %7790 = vmatpush3.bf16.msra.mxu1 %v9049_v29 }
 0x5ba   : > { %7769 = vmatprep.subr.bf16.mxu0 %v9050_v30  ;;  %7791 = vmatprep.subr.bf16.mxu1 %v9051_v31 }
 0x5bd   : > { %7770 = vmatpush3.bf16.msra.mxu0 %v9052_v32  ;;  %7792 = vmatpush3.bf16.msra.mxu1 %v9053_v33 }
 0x5be   : > { %7771 = vmatprep.subr.bf16.mxu0 %v9054_v34  ;;  %7793 = vmatprep.subr.bf16.mxu1 %v9055_v35 }
 0x5c1   : > { %7772 = vmatpush3.bf16.msra.mxu0 %v9056_v36  ;;  %7794 = vmatpush3.bf16.msra.mxu1 %v9057_v37 }
 0x5c2   : > { %7773 = vmatprep.subr.bf16.mxu0 %v9058_v38  ;;  %7795 = vmatprep.subr.bf16.mxu1 %v9059_v39 }
 0x5c5   : > { %7774 = vmatpush3.bf16.msra.mxu0 %v9060_v40  ;;  %7796 = vmatpush3.bf16.msra.mxu1 %v9061_v42 }
 0x5c6   : > { %7775 = vmatprep.subr.bf16.mxu0 %v9062_v44  ;;  %7797 = vmatprep.subr.bf16.mxu1 %v9063_v19 }
 0x5c9   : > { %7776 = vmatpush3.bf16.msra.mxu0 %v9064_v45  ;;  %7798 = vmatpush3.bf16.msra.mxu1 %v9065_v46 }
 0x67f   : > { %v5999_v43 = vpop.f32.mrb[0].mxu0  ;;  %v6327_v60 = vpop.f32.mrb[0].mxu1 }
 0x680   : > { %v7827_v61 = vadd.f32 %v5999_v43, %v2985_v55  ;;  %v7829_v62 = vadd.f32 %v6327_v60, %v2993_v57  ;;  %v6001_v54 = vpop.f32.mrb[1].mxu0  ;;  %v6329_v63 = vpop.f32.mrb[1].mxu1 }
 0x681   : > { %v7828_v0 = vadd.f32 %v6001_v54, %v2989_v58  ;;  %v7830_v41 = vadd.f32 %v6329_v63, %v2997_v59  ;;  %v6003_v3 = vpop.f32.mrb[2].mxu0  ;;  %v6331_v4 = vpop.f32.mrb[2].mxu1 }
 0x682   : > { %v6334_v50 = vmax.f32 %v7827_v61, 0.0  ;;  %v6336_v6 = vmax.f32 %v7829_v62, 0.0  ;;  %v6004_v9 = vpop.f32.mrb[3].mxu0  ;;  %v6332_v56 = vpop.f32.mrb[3].mxu1 }
 0x683   : > { %v6335_v10 = vmax.f32 %v7828_v0, 0.0  ;;  %v6337_v7 = vmax.f32 %v7830_v41, 0.0 }
 0x684   : > { %v6338_v1 = vpack.c.bf16 %v6334_v50, %v6334_v50  ;;  %v6340_v13 = vpack.c.bf16 %v6336_v6, %v6336_v6 }
 0x685   : > { %v6339_v11 = vpack.c.bf16 %v6335_v10, %v6335_v10  ;;  %v6341_v12 = vpack.c.bf16 %v6337_v7, %v6337_v7 }
 0x687   : > { %6631 = vmatprep.mubr.bf16.mxu0 %v6339_v11  ;;  %6671 = vmatprep.mubr.bf16.mxu1 %v6341_v12 }
 0x688   : > { %6632 = vmatmul.mubr.bf16.vlgmr.msra.gmra.mrb[4].mxu0 %v6338_v1  ;;  %6672 = vmatmul.mubr.bf16.vlgmr.msra.gmra.mrb[4].mxu1 %v6340_v13 }
 0x75b   : > { %v7777_v14 = vpop.f32.mrb[4].mxu0  ;;  %v7799_v18 = vpop.f32.mrb[4].mxu1 }
 0x75c   : > { %v7778_v20 = vpop.f32.mrb[5].mxu0  ;;  %v7800_v21 = vpop.f32.mrb[5].mxu1 }
 0x75d   : > { %v7779_v5 = vadd.f32 %v7778_v20, %v7777_v14  ;;  %v7801_v8 = vadd.f32 %v7800_v21, %v7799_v18  ;;  %v7780_v16 = vpop.f32.mrb[6].mxu0  ;;  %v7802_v47 = vpop.f32.mrb[6].mxu1 }
 0x75e   : > { %v7781_v23 = vpop.f32.mrb[7].mxu0  ;;  %v7803_v2 = vpop.f32.mrb[7].mxu1 }
 0x75f   : > { %v6674_v17 = vadd.f32 %v7801_v8, %v7779_v5 }
 0x761   : > { %v6679_v24 = vadd.f32 %v6674_v17, %v6342_v22 }
 0x763   : > { %6680 = vst [vmem:[%s9968_s0] sm:$0x3] %v6679_v24 }
 0x764   : > { %9317 = shalt.err (!%p9314_p13)
}
 0x765   : > { %s9318_s3 = scalar_lea.hbm %s10831_s23, 32  ;;  %s9322_s25 = scalar_lea.hbm %s11010_s6, 64 }
 0x766   : > { %p9319_p10 = scmp.ne.s32.totalorder %s10831_s23, %s9318_s3  ;;  %p9323_p8 = scmp.lt.u32.totalorder %s10831_s23, %s11010_s6 }
 0x767   : > { %p9324_p5 = scmp.lt.u32.totalorder %s9322_s25, %s9318_s3  ;;  %p9326_p2 = scmp.lt.u32.totalorder %s9318_s3, %s10831_s23 }
 0x768   : > { %p9320_p3 = pnand %p9319_p10, %p11011_p6 }
 0x769   : > { %p9325_p4 = por %p9324_p5, %p9323_p8 }
 0x76a   : > { %p9321_p0 = pneg %p9320_p3 }
 0x76b   : > { %p9327_p1 = por %p9326_p2, %p9325_p4 }
 0x76d   : > { %p9328_p7 = pnand %p9327_p1, %p9321_p0 }
 0x76f   : > { %9331 = shalt.err (!%p9328_p7)
}
 0x770   : > { %7911 = dma.vmem_to_hbm [thread:$0]  (%p11011_p6), %s10833_s18, 32, %s10831_s23, %s6682_s26  }
 0x771 PF: > { %p7946_p12 = scmp.ge.s32.totalorder %s9450_s15, 2  ;;  %s6707_s5 = sand.u32 1, %s9422_s30  }
 0x772   : > { %p11012_p9 = scmp.ne.s32.totalorder %s10982_s27, 0  ;;  %s6708_s10 = scalar_lea.sflag [#allocation5], %s6707_s5 }
 0x774   : > { %p7940_p11 = pnand %p7946_p12, %p11012_p9 }
 0x776   : > { %9405 = dma.done.wait (!%p7940_p11), %s6708_s10, 32  }
 0x777   : > { %9407 = vsyncadd (!%p7940_p11), %s6708_s10, 4294967264  ;;  %s28_s15 = sadd.s32 1, %s9450_s15   ;;  %s11013_s27 = sld [smem:[#allocation24_spill]] }
 0x778   : > { %p25_p13 = scmp.ge.s32.totalorder %s28_s15, 6   ;;  %s11014_s28 = sld [smem:[#allocation25_spill]] }
 0x779   : > { %s11015_s29 = sld [smem:[#allocation36_spill]]  ;;  %s11016_s11 = sld [smem:[#allocation26_spill]] }
 0x77a   : > { %s11017_s10 = sld [smem:[#allocation35_spill]]  ;;  %s11018_s0 = sld [smem:[#allocation29_spill]] }
 0x77b   : > { %s11019_s13 = sld [smem:[#allocation33_spill]]  ;;  %s11020_s7 = sld [smem:[#allocation34_spill]] }
 0x77c   : > { %s11021_s30 = smov %s9426_s9  ;;  %s11024_s12 = smov %s9446_s14 }
 0x77d   :  { %27 = sbr.rel (!%p25_p13) target bundleno = 22 (0x16), region = 173 }
 0x77f   : > { %s11022_s9 = smov %s11016_s11 }
 0x780   : > { %s11023_s11 = smov %s11018_s0 }
 0x781   : > { %s11025_s14 = smov %s11020_s7 }
 0x784   :  { %6713 = vsyncpa [#allocation4], 1 }
 0x785   :  { %6715 = vsyncpa [#allocation4 + $0x1], 1 }
 0x786   :  { %6716 = vsyncpa [#allocation7], 1 }
 0x787   :  { %6718 = vsyncpa [#allocation7 + $0x1], 1 }
 0x788   :  { %6719 = vsyncpa [#allocation10], 1 }
 0x789   :  { %6720 = vsyncpa [#allocation5], 1 }
 0x78a   :  { %6722 = vsyncpa [#allocation5 + $0x1], 1 }

</bundles_post_ra>
